<compile_context>
chip_gen: v5e
topology: v5e:2x2
jax: 0.10.0
libtpu: 0.0.40
codegen_flags: <defaults>
</compile_context>

<pallas_src>
import math
import functools

import jax
import jax.numpy as jnp
from jax.experimental import pallas as pl
from jax.experimental.pallas import tpu as pltpu

LN_EPS = 1e-5
LEAKY_SLOPE = 0.1   # module uses nn.LeakyReLU(0.1)


def decoder_block_kernel(
    patches_ref,      # (BT, HW, CKp)  bf16  im2col patches, contraction padded to CKp
    wmat_ref,         # (CKp, C)       bf16  deconv weight as matmul matrix
    bconv_ref,        # (1, C)         f32
    ln1g_hwc_ref,     # (HW, C)        f32   LN1 gamma, token-major (first LN)
    ln1b_hwc_ref,     # (HW, C)        f32
    ln1g_chw_ref,     # (C, HW)        f32   LN1 gamma, native layout (final LN)
    ln1b_chw_ref,     # (C, HW)        f32
    seq_ref,          # (BT, L, 512)   bf16
    wk_ref, bk_ref,   # (512, C4), (1, C4)
    wv_ref, bv_ref,   # (512, C),  (1, C)
    wq_ref, bq_ref,   # (C, C4),   (1, C4)
    wik_ref, bik_ref, # (C, C),    (1, C)
    alng_ref, alnb_ref,   # (1, C)   attn_LN1 affine
    out_ref,          # (BT, C, HW)    f32   lane-dense output
):
    BT, HW, CKp = patches_ref.shape
    C = wmat_ref.shape[1]
    C4 = wq_ref.shape[1]
    L = seq_ref.shape[1]

    inv_sqrt_c4 = 1.0 / math.sqrt(C4)
    inv_sqrt_c = 1.0 / math.sqrt(C)

    def leaky(v):
        return jnp.where(v >= 0, v, LEAKY_SLOPE * v)

    def softmax_last(s):
        # divide -> EUP reciprocal: co-issues with the VPU work on the s2 path.
        m = jnp.max(s, axis=-1, keepdims=True)
        e = jnp.exp(s - m)
        return e * pl.reciprocal(jnp.sum(e, axis=-1, keepdims=True), approx=True)

    # ---- deconv as one bf16 matmul over the padded Cin*K*K contraction ------
    patches = patches_ref[...].reshape(BT * HW, CKp)
    y = (jnp.dot(patches, wmat_ref[...], preferred_element_type=jnp.float32)
         + bconv_ref[...]).reshape(BT, HW, C)

    # ---- LN1 over the whole (C,H,W) slab per batch + LeakyReLU (token-major) -
    mu = jnp.mean(y, axis=(1, 2), keepdims=True)
    var = jnp.mean((y - mu) ** 2, axis=(1, 2), keepdims=True)
    y = (y - mu) * jax.lax.rsqrt(var + LN_EPS) * ln1g_hwc_ref[...] + ln1b_hwc_ref[...]
    y = leaky(y)                                                  # (BT, HW, C) f32

    # ---- skinny projections (unfused: every operand is lane-aligned) --------
    seq2 = seq_ref[...].reshape(BT * L, 512)
    seq_k = (jnp.dot(seq2, wk_ref[...], preferred_element_type=jnp.float32)
             + bk_ref[...]).reshape(BT, L, C4)
    seq_v = (jnp.dot(seq2, wv_ref[...], preferred_element_type=jnp.float32)
             + bv_ref[...]).reshape(BT, L, C)

    y_bf = y.astype(jnp.bfloat16).reshape(BT * HW, C)
    q = (jnp.dot(y_bf, wq_ref[...], preferred_element_type=jnp.float32)
         + bq_ref[...]).reshape(BT, HW, C4)
    ik = (jnp.dot(y_bf, wik_ref[...], preferred_element_type=jnp.float32)
          + bik_ref[...]).reshape(BT, HW, C)

    # ---- attention 1: image_attention(q, seq_k, seq_v); scale folded into q;
    #      dropout = inference identity --------------------------------------
    s1 = jnp.einsum('bqd,bkd->bqk', q * inv_sqrt_c4, seq_k,
                    preferred_element_type=jnp.float32)           # (BT, HW, L)
    attn1 = jnp.einsum('bqk,bkd->bqd', softmax_last(s1), seq_v,
                       preferred_element_type=jnp.float32)        # (BT, HW, C)

    # ---- attn_LN1 over the channel dim --------------------------------------
    z = attn1 + y
    mu1 = jnp.mean(z, axis=-1, keepdims=True)
    var1 = jnp.mean((z - mu1) ** 2, axis=-1, keepdims=True)
    ax1 = (z - mu1) * jax.lax.rsqrt(var1 + LN_EPS) * alng_ref[...] + alnb_ref[...]

    # ---- attention 2: image_attention(attn_x1, image_k1, y); scale folded
    #      into the (HW, C) query, NOT the (HW, HW) score matrix --------------
    # NOTE: s2 is (HW, HW) per batch; row-tile with online softmax before
    # HW ~ 1-2K on v7x (64 MiB VMEM) / ~4K on v5e/v6e.
    s2 = jnp.einsum('bqc,bkc->bqk', ax1 * inv_sqrt_c, ik,
                    preferred_element_type=jnp.float32)           # (BT, HW, HW)
    y2 = jnp.einsum('bqk,bkc->bqc', softmax_last(s2), y,
                    preferred_element_type=jnp.float32)           # (BT, HW, C)

    # ---- one bulk transpose to (C, HW), then lane-dense final LN1 (same LN1
    #      instance as above, matching the PyTorch module) + LeakyReLU, and a
    #      single unmasked whole-block store ----------------------------------
    y2_cq = jnp.transpose(y2, (0, 2, 1))                          # (BT, C, HW)
    mu2 = jnp.mean(y2_cq, axis=(1, 2), keepdims=True)
    var2 = jnp.mean((y2_cq - mu2) ** 2, axis=(1, 2), keepdims=True)
    out = ((y2_cq - mu2) * jax.lax.rsqrt(var2 + LN_EPS)
           * ln1g_chw_ref[...] + ln1b_chw_ref[...])
    out_ref[...] = leaky(out)


def _pick_batch_tile(B, cap=8):
    """Largest divisor of B that is <= cap AND keeps >= 2 grid steps when B >= 2,
    so the 'parallel' batch axis can be split across v7x's two TensorCores
    (no-op on v5e/v6e, which have a single TC)."""
    limit = max(1, min(cap, B // 2)) if B >= 2 else 1
    for bt in range(limit, 0, -1):
        if B % bt == 0:
            return bt
    return 1


@functools.partial(jax.jit,
                   static_argnames=("kernel_size", "stride", "output_padding", "img_size"))
def decoder_block_forward(x, seq_feat, params, *, kernel_size, stride,
                          output_padding, img_size):
    """x: (B, Cin, Hin, Win) NCHW;  seq_feat: (B, L, 512).  Returns (B, C, H, W)."""
    B, Cin, Hin, Win = x.shape
    K = kernel_size
    padding = K // 2
    H = W = img_size
    HW = H * W
    L = seq_feat.shape[1]
    C = params["deconv_b"].shape[0]
    C4 = C // 4
    CinKK = Cin * K * K
    CKp = ((CinKK + 127) // 128) * 128          # pad contraction dim to lane width

    # ---- ConvTranspose2d -> stride-1 conv patches, built by one fused XLA op
    # (no manual dilate/scatter + stack/transpose chain), emitted as bf16.
    lo = K - 1 - padding
    hi = K - 1 - padding + output_padding
    patches = jax.lax.conv_general_dilated_patches(
        x.astype(jnp.float32),
        filter_shape=(K, K),
        window_strides=(1, 1),
        padding=((lo, hi), (lo, hi)),
        lhs_dilation=(stride, stride),
        dimension_numbers=("NCHW", "OIHW", "NHWC"),
    )                                            # (B, H, W, Cin*K*K), idx = cin*K*K + kh*K + kw
    patches = patches.reshape(B, HW, CinKK)
    patches = jnp.pad(patches, ((0, 0), (0, 0), (0, CKp - CinKK))).astype(jnp.bfloat16)

    # ConvTranspose2d weight (Cin, Cout, K, K): spatial flip -> matmul matrix with
    # the same (cin, kh, kw) flattening as the patches; zero-padded rows to CKp.
    wmat = jnp.flip(params["deconv_w"], axis=(2, 3)).transpose(0, 2, 3, 1).reshape(CinKK, C)
    wmat = jnp.pad(wmat, ((0, CKp - CinKK), (0, 0))).astype(jnp.bfloat16)
    bconv = params["deconv_b"].reshape(1, C)

    # LN1 affine in both layouts: (HW, C) for the post-deconv LN (token-major) and
    # native (C, HW) for the final lane-dense LN.  Tiny constants, fetched once.
    ln1g_chw = params["ln1_g"].reshape(C, HW)
    ln1b_chw = params["ln1_b"].reshape(C, HW)
    ln1g_hwc = ln1g_chw.T
    ln1b_hwc = ln1b_chw.T

    # Projection weights kept separate (nothing sliced at a non-128 lane offset).
    # Stored as (in, out); transpose PyTorch's (out, in) for real checkpoints.
    wk = params["seq_k_w"].astype(jnp.bfloat16)
    wv = params["seq_v_w"].astype(jnp.bfloat16)
    wq = params["image_q1_w"].astype(jnp.bfloat16)
    wik = params["image_k1_w"].astype(jnp.bfloat16)
    bk = params["seq_k_b"].reshape(1, C4)
    bv = params["seq_v_b"].reshape(1, C)
    bq = params["image_q1_b"].reshape(1, C4)
    bik = params["image_k1_b"].reshape(1, C)
    alng = params["aln_g"].reshape(1, C)
    alnb = params["aln_b"].reshape(1, C)

    BT = _pick_batch_tile(B)
    grid = (B // BT,)

    const2 = lambda shp: pl.BlockSpec(shp, lambda g: (0, 0))       # fetched once
    batched3 = lambda shp: pl.BlockSpec(shp, lambda g: (g, 0, 0))

    out = pl.pallas_call(
        decoder_block_kernel,
        out_shape=jax.ShapeDtypeStruct((B, C, HW), jnp.float32),
        grid=grid,
        in_specs=[
            batched3((BT, HW, CKp)),      # patches (bf16)
            const2((CKp, C)),             # wmat (bf16)
            const2((1, C)),               # bconv
            const2((HW, C)),              # LN1 gamma (token-major)
            const2((HW, C)),              # LN1 beta  (token-major)
            const2((C, HW)),              # LN1 gamma (native)
            const2((C, HW)),              # LN1 beta  (native)
            batched3((BT, L, 512)),       # seq_feat (bf16)
            const2((512, C4)),            # seq_k W
            const2((1, C4)),              # seq_k b
            const2((512, C)),             # seq_v W
            const2((1, C)),               # seq_v b
            const2((C, C4)),              # image_q1 W
            const2((1, C4)),              # image_q1 b
            const2((C, C)),               # image_k1 W
            const2((1, C)),               # image_k1 b
            const2((1, C)),               # attn_LN1 gamma
            const2((1, C)),               # attn_LN1 beta
        ],
        out_specs=batched3((BT, C, HW)),  # lane-dense output
        compiler_params=pltpu.CompilerParams(
            dimension_semantics=("parallel",)),   # shard batch steps over v7x's 2 TCs
    )(patches, wmat, bconv, ln1g_hwc, ln1b_hwc, ln1g_chw, ln1b_chw,
      seq_feat.astype(jnp.bfloat16), wk, bk, wv, bv, wq, bq, wik, bik,
      alng, alnb)

    # (B, C, HW) is already the NCHW flatten -> plain reshape, no transpose.
    return out.reshape(B, C, H, W)


def init_params(key, Cin, C, K, img_size):
    """Deterministic synthetic parameters (shapes match the nn.Module __init__)."""
    C4 = C // 4
    ks = jax.random.split(key, 8)
    return {
        "deconv_w": 0.1 * jax.random.normal(ks[0], (Cin, C, K, K), jnp.float32),
        "deconv_b": 0.1 * jax.random.normal(ks[1], (C,), jnp.float32),
        "ln1_g": jnp.ones((C, img_size, img_size), jnp.float32),
        "ln1_b": jnp.zeros((C, img_size, img_size), jnp.float32),
        "seq_k_w": 0.1 * jax.random.normal(ks[2], (512, C4), jnp.float32),
        "seq_k_b": 0.1 * jax.random.normal(ks[3], (C4,), jnp.float32),
        "seq_v_w": 0.1 * jax.random.normal(ks[4], (512, C), jnp.float32),
        "seq_v_b": 0.1 * jax.random.normal(ks[5], (C,), jnp.float32),
        "image_q1_w": 0.1 * jax.random.normal(ks[6], (C, C4), jnp.float32),
        "image_q1_b": jnp.zeros((C4,), jnp.float32),
        "image_k1_w": 0.1 * jax.random.normal(ks[7], (C, C), jnp.float32),
        "image_k1_b": jnp.zeros((C,), jnp.float32),
        "aln_g": jnp.ones((C,), jnp.float32),
        "aln_b": jnp.zeros((C,), jnp.float32),
    }


if __name__ == "__main__":
    # decoder_block(input_channels=8, output_channels=16, kernel_size=3,
    #               stride=2, output_padding=1, img_size=16, attn=True)
    B, Cin, Hin = 2, 8, 8
    C, K, stride, out_pad = 16, 3, 2, 1
    img_size = (Hin - 1) * stride - 2 * (K // 2) + K + out_pad   # = 16
    L = 8

    key = jax.random.PRNGKey(0)
    kx, ks, kp = jax.random.split(key, 3)
    x = jax.random.normal(kx, (B, Cin, Hin, Hin), jnp.float32)          # NCHW
    seq_feat = jax.random.normal(ks, (B, L, 512), jnp.float32)
    params = init_params(kp, Cin, C, K, img_size)

    y = decoder_block_forward(
        x, seq_feat, params,
        kernel_size=K, stride=stride, output_padding=out_pad, img_size=img_size)
    jax.block_until_ready(y)
    assert y.shape == (B, C, img_size, img_size)
    assert bool(jnp.all(jnp.isfinite(y)))
    print("KERNEL_OK")
</pallas_src>

<mosaic_0001>
module attributes {stable_mosaic.version = 11 : i64} {
  func.func @decoder_block_kernel(%arg0: i32, %arg1: memref<1x256x128xbf16, #tpu.memory_space<vmem>>, %arg2: memref<128x16xbf16, #tpu.memory_space<vmem>>, %arg3: memref<1x16xf32, #tpu.memory_space<vmem>>, %arg4: memref<256x16xf32, #tpu.memory_space<vmem>>, %arg5: memref<256x16xf32, #tpu.memory_space<vmem>>, %arg6: memref<16x256xf32, #tpu.memory_space<vmem>>, %arg7: memref<16x256xf32, #tpu.memory_space<vmem>>, %arg8: memref<1x8x512xbf16, #tpu.memory_space<vmem>>, %arg9: memref<512x4xbf16, #tpu.memory_space<vmem>>, %arg10: memref<1x4xf32, #tpu.memory_space<vmem>>, %arg11: memref<512x16xbf16, #tpu.memory_space<vmem>>, %arg12: memref<1x16xf32, #tpu.memory_space<vmem>>, %arg13: memref<16x4xbf16, #tpu.memory_space<vmem>>, %arg14: memref<1x4xf32, #tpu.memory_space<vmem>>, %arg15: memref<16x16xbf16, #tpu.memory_space<vmem>>, %arg16: memref<1x16xf32, #tpu.memory_space<vmem>>, %arg17: memref<1x16xf32, #tpu.memory_space<vmem>>, %arg18: memref<1x16xf32, #tpu.memory_space<vmem>>, %arg19: memref<1x16x256xf32, #tpu.memory_space<vmem>>) attributes {dimension_semantics = [#tpu.dimension_semantics<parallel>], iteration_bounds = array<i64: 2>, scalar_prefetch = 0 : i64, scratch_operands = 0 : i64, tpu.core_type = #tpu.core_type<tc>, window_params = [{transform_indices = @transform_0, window_bounds = array<i64: 1, 256, 128>}, {pipeline_mode = #tpu.pipeline_mode<synchronous>, transform_indices = @transform_1, window_bounds = array<i64: 128, 16>}, {pipeline_mode = #tpu.pipeline_mode<synchronous>, transform_indices = @transform_2, window_bounds = array<i64: 1, 16>}, {pipeline_mode = #tpu.pipeline_mode<synchronous>, transform_indices = @transform_3, window_bounds = array<i64: 256, 16>}, {pipeline_mode = #tpu.pipeline_mode<synchronous>, transform_indices = @transform_4, window_bounds = array<i64: 256, 16>}, {pipeline_mode = #tpu.pipeline_mode<synchronous>, transform_indices = @transform_5, window_bounds = array<i64: 16, 256>}, {pipeline_mode = #tpu.pipeline_mode<synchronous>, transform_indices = @transform_6, window_bounds = array<i64: 16, 256>}, {transform_indices = @transform_7, window_bounds = array<i64: 1, 8, 512>}, {pipeline_mode = #tpu.pipeline_mode<synchronous>, transform_indices = @transform_8, window_bounds = array<i64: 512, 4>}, {pipeline_mode = #tpu.pipeline_mode<synchronous>, transform_indices = @transform_9, window_bounds = array<i64: 1, 4>}, {pipeline_mode = #tpu.pipeline_mode<synchronous>, transform_indices = @transform_10, window_bounds = array<i64: 512, 16>}, {pipeline_mode = #tpu.pipeline_mode<synchronous>, transform_indices = @transform_11, window_bounds = array<i64: 1, 16>}, {pipeline_mode = #tpu.pipeline_mode<synchronous>, transform_indices = @transform_12, window_bounds = array<i64: 16, 4>}, {pipeline_mode = #tpu.pipeline_mode<synchronous>, transform_indices = @transform_13, window_bounds = array<i64: 1, 4>}, {pipeline_mode = #tpu.pipeline_mode<synchronous>, transform_indices = @transform_14, window_bounds = array<i64: 16, 16>}, {pipeline_mode = #tpu.pipeline_mode<synchronous>, transform_indices = @transform_15, window_bounds = array<i64: 1, 16>}, {pipeline_mode = #tpu.pipeline_mode<synchronous>, transform_indices = @transform_16, window_bounds = array<i64: 1, 16>}, {pipeline_mode = #tpu.pipeline_mode<synchronous>, transform_indices = @transform_17, window_bounds = array<i64: 1, 16>}, {transform_indices = @transform_18, window_bounds = array<i64: 1, 16, 256>}]} {
    %c0 = arith.constant 0 : index
    %c0_0 = arith.constant 0 : index
    %c0_1 = arith.constant 0 : index
    %0 = vector.load %arg1[%c0, %c0_0, %c0_1] : memref<1x256x128xbf16, #tpu.memory_space<vmem>>, vector<1x256x128xbf16>
    %1 = vector.shape_cast %0 : vector<1x256x128xbf16> to vector<256x128xbf16>
    %c0_2 = arith.constant 0 : index
    %c0_3 = arith.constant 0 : index
    %2 = vector.load %arg2[%c0_2, %c0_3] : memref<128x16xbf16, #tpu.memory_space<vmem>>, vector<128x16xbf16>
    %cst = arith.constant dense<0.000000e+00> : vector<256x16xf32>
    %3 = tpu.matmul %1, %2, %cst {dimension_numbers = #tpu.dot_dimension_numbers<[1], [0], [0], [1], [0, 0, 1, 1], [], []>} : vector<256x128xbf16>, vector<128x16xbf16>, vector<256x16xf32> -> vector<256x16xf32>
    %c0_4 = arith.constant 0 : index
    %c0_5 = arith.constant 0 : index
    %4 = vector.load %arg3[%c0_4, %c0_5] : memref<1x16xf32, #tpu.memory_space<vmem>>, vector<1x16xf32>
    %5 = vector.broadcast %4 : vector<1x16xf32> to vector<256x16xf32>
    %6 = arith.addf %3, %5 : vector<256x16xf32>
    %7 = vector.shape_cast %6 : vector<256x16xf32> to vector<1x256x16xf32>
    %cst_6 = arith.constant dense<0.000000e+00> : vector<1xf32>
    %8 = vector.multi_reduction <add>, %7, %cst_6 [1, 2] : vector<1x256x16xf32> to vector<1xf32>
    %9 = vector.shape_cast %8 : vector<1xf32> to vector<1x1x1xf32>
    %cst_7 = arith.constant 4.096000e+03 : f32
    %10 = vector.broadcast %cst_7 : f32 to vector<1x1x1xf32>
    %11 = arith.divf %9, %10 : vector<1x1x1xf32>
    %12 = vector.broadcast %11 : vector<1x1x1xf32> to vector<1x256x16xf32>
    %13 = arith.subf %7, %12 : vector<1x256x16xf32>
    %14 = arith.mulf %13, %13 : vector<1x256x16xf32>
    %cst_8 = arith.constant dense<0.000000e+00> : vector<1xf32>
    %15 = vector.multi_reduction <add>, %14, %cst_8 [1, 2] : vector<1x256x16xf32> to vector<1xf32>
    %16 = vector.shape_cast %15 : vector<1xf32> to vector<1x1x1xf32>
    %cst_9 = arith.constant 4.096000e+03 : f32
    %17 = vector.broadcast %cst_9 : f32 to vector<1x1x1xf32>
    %18 = arith.divf %16, %17 : vector<1x1x1xf32>
    %19 = vector.broadcast %11 : vector<1x1x1xf32> to vector<1x256x16xf32>
    %20 = arith.subf %7, %19 : vector<1x256x16xf32>
    %cst_10 = arith.constant 9.99999974E-6 : f32
    %21 = vector.broadcast %cst_10 : f32 to vector<1x1x1xf32>
    %22 = arith.addf %18, %21 : vector<1x1x1xf32>
    %23 = math.rsqrt %22 : vector<1x1x1xf32>
    %24 = vector.broadcast %23 : vector<1x1x1xf32> to vector<1x256x16xf32>
    %25 = arith.mulf %20, %24 : vector<1x256x16xf32>
    %c0_11 = arith.constant 0 : index
    %c0_12 = arith.constant 0 : index
    %26 = vector.load %arg4[%c0_11, %c0_12] : memref<256x16xf32, #tpu.memory_space<vmem>>, vector<256x16xf32>
    %27 = vector.shape_cast %26 : vector<256x16xf32> to vector<1x256x16xf32>
    %28 = arith.mulf %25, %27 : vector<1x256x16xf32>
    %c0_13 = arith.constant 0 : index
    %c0_14 = arith.constant 0 : index
    %29 = vector.load %arg5[%c0_13, %c0_14] : memref<256x16xf32, #tpu.memory_space<vmem>>, vector<256x16xf32>
    %30 = vector.shape_cast %29 : vector<256x16xf32> to vector<1x256x16xf32>
    %31 = arith.addf %28, %30 : vector<1x256x16xf32>
    %cst_15 = arith.constant 0.000000e+00 : f32
    %32 = vector.broadcast %cst_15 : f32 to vector<1x256x16xf32>
    %33 = arith.cmpf oge, %31, %32 : vector<1x256x16xf32>
    %cst_16 = arith.constant 1.000000e-01 : f32
    %34 = vector.broadcast %cst_16 : f32 to vector<1x256x16xf32>
    %35 = arith.mulf %34, %31 : vector<1x256x16xf32>
    %36 = arith.select %33, %31, %35 : vector<1x256x16xi1>, vector<1x256x16xf32>
    %c0_17 = arith.constant 0 : index
    %c0_18 = arith.constant 0 : index
    %c0_19 = arith.constant 0 : index
    %37 = vector.load %arg8[%c0_17, %c0_18, %c0_19] : memref<1x8x512xbf16, #tpu.memory_space<vmem>>, vector<1x8x512xbf16>
    %38 = vector.shape_cast %37 : vector<1x8x512xbf16> to vector<8x512xbf16>
    %c0_20 = arith.constant 0 : index
    %c0_21 = arith.constant 0 : index
    %39 = vector.load %arg9[%c0_20, %c0_21] : memref<512x4xbf16, #tpu.memory_space<vmem>>, vector<512x4xbf16>
    %cst_22 = arith.constant dense<0.000000e+00> : vector<8x4xf32>
    %40 = tpu.matmul %38, %39, %cst_22 {dimension_numbers = #tpu.dot_dimension_numbers<[1], [0], [0], [1], [0, 0, 1, 1], [], []>} : vector<8x512xbf16>, vector<512x4xbf16>, vector<8x4xf32> -> vector<8x4xf32>
    %c0_23 = arith.constant 0 : index
    %c0_24 = arith.constant 0 : index
    %41 = vector.load %arg10[%c0_23, %c0_24] : memref<1x4xf32, #tpu.memory_space<vmem>>, vector<1x4xf32>
    %42 = vector.broadcast %41 : vector<1x4xf32> to vector<8x4xf32>
    %43 = arith.addf %40, %42 : vector<8x4xf32>
    %44 = vector.shape_cast %43 : vector<8x4xf32> to vector<1x8x4xf32>
    %c0_25 = arith.constant 0 : index
    %c0_26 = arith.constant 0 : index
    %45 = vector.load %arg11[%c0_25, %c0_26] : memref<512x16xbf16, #tpu.memory_space<vmem>>, vector<512x16xbf16>
    %cst_27 = arith.constant dense<0.000000e+00> : vector<8x16xf32>
    %46 = tpu.matmul %38, %45, %cst_27 {dimension_numbers = #tpu.dot_dimension_numbers<[1], [0], [0], [1], [0, 0, 1, 1], [], []>} : vector<8x512xbf16>, vector<512x16xbf16>, vector<8x16xf32> -> vector<8x16xf32>
    %c0_28 = arith.constant 0 : index
    %c0_29 = arith.constant 0 : index
    %47 = vector.load %arg12[%c0_28, %c0_29] : memref<1x16xf32, #tpu.memory_space<vmem>>, vector<1x16xf32>
    %48 = vector.broadcast %47 : vector<1x16xf32> to vector<8x16xf32>
    %49 = arith.addf %46, %48 : vector<8x16xf32>
    %50 = vector.shape_cast %49 : vector<8x16xf32> to vector<1x8x16xf32>
    %51 = arith.truncf %36 : vector<1x256x16xf32> to vector<1x256x16xbf16>
    %52 = vector.shape_cast %51 : vector<1x256x16xbf16> to vector<256x16xbf16>
    %c0_30 = arith.constant 0 : index
    %c0_31 = arith.constant 0 : index
    %53 = vector.load %arg13[%c0_30, %c0_31] : memref<16x4xbf16, #tpu.memory_space<vmem>>, vector<16x4xbf16>
    %cst_32 = arith.constant dense<0.000000e+00> : vector<256x4xf32>
    %54 = tpu.matmul %52, %53, %cst_32 {dimension_numbers = #tpu.dot_dimension_numbers<[1], [0], [0], [1], [0, 0, 1, 1], [], []>} : vector<256x16xbf16>, vector<16x4xbf16>, vector<256x4xf32> -> vector<256x4xf32>
    %c0_33 = arith.constant 0 : index
    %c0_34 = arith.constant 0 : index
    %55 = vector.load %arg14[%c0_33, %c0_34] : memref<1x4xf32, #tpu.memory_space<vmem>>, vector<1x4xf32>
    %56 = vector.broadcast %55 : vector<1x4xf32> to vector<256x4xf32>
    %57 = arith.addf %54, %56 : vector<256x4xf32>
    %58 = vector.shape_cast %57 : vector<256x4xf32> to vector<1x256x4xf32>
    %c0_35 = arith.constant 0 : index
    %c0_36 = arith.constant 0 : index
    %59 = vector.load %arg15[%c0_35, %c0_36] : memref<16x16xbf16, #tpu.memory_space<vmem>>, vector<16x16xbf16>
    %cst_37 = arith.constant dense<0.000000e+00> : vector<256x16xf32>
    %60 = tpu.matmul %52, %59, %cst_37 {dimension_numbers = #tpu.dot_dimension_numbers<[1], [0], [0], [1], [0, 0, 1, 1], [], []>} : vector<256x16xbf16>, vector<16x16xbf16>, vector<256x16xf32> -> vector<256x16xf32>
    %c0_38 = arith.constant 0 : index
    %c0_39 = arith.constant 0 : index
    %61 = vector.load %arg16[%c0_38, %c0_39] : memref<1x16xf32, #tpu.memory_space<vmem>>, vector<1x16xf32>
    %62 = vector.broadcast %61 : vector<1x16xf32> to vector<256x16xf32>
    %63 = arith.addf %60, %62 : vector<256x16xf32>
    %64 = vector.shape_cast %63 : vector<256x16xf32> to vector<1x256x16xf32>
    %cst_40 = arith.constant 5.000000e-01 : f32
    %65 = vector.broadcast %cst_40 : f32 to vector<1x256x4xf32>
    %66 = arith.mulf %58, %65 : vector<1x256x4xf32>
    "tpu.trace_start"() <{level = 10 : i32, message = "bqd,bkd->bqk"}> : () -> ()
    %cst_41 = arith.constant dense<0.000000e+00> : vector<1x256x8xf32>
    %67 = tpu.matmul %66, %44, %cst_41 {dimension_numbers = #tpu.dot_dimension_numbers<[2], [2], [1], [1], [0, 0, 0, 1, 1, 1], [0], [0]>} : vector<1x256x4xf32>, vector<1x8x4xf32>, vector<1x256x8xf32> -> vector<1x256x8xf32>
    "tpu.trace_stop"() : () -> ()
    %cst_42 = arith.constant dense<0xFF800000> : vector<1x256xf32>
    %68 = vector.multi_reduction <maximumf>, %67, %cst_42 [2] : vector<1x256x8xf32> to vector<1x256xf32>
    %69 = vector.shape_cast %68 : vector<1x256xf32> to vector<1x256x1xf32>
    %70 = vector.broadcast %69 : vector<1x256x1xf32> to vector<1x256x8xf32>
    %71 = arith.subf %67, %70 : vector<1x256x8xf32>
    %72 = math.exp %71 : vector<1x256x8xf32>
    %cst_43 = arith.constant dense<0.000000e+00> : vector<1x256xf32>
    %73 = vector.multi_reduction <add>, %72, %cst_43 [2] : vector<1x256x8xf32> to vector<1x256xf32>
    %74 = vector.shape_cast %73 : vector<1x256xf32> to vector<1x256x1xf32>
    %75 = tpu.reciprocal %74 {approx = true} : vector<1x256x1xf32> -> vector<1x256x1xf32>
    %76 = vector.broadcast %75 : vector<1x256x1xf32> to vector<1x256x8xf32>
    %77 = arith.mulf %72, %76 : vector<1x256x8xf32>
    "tpu.trace_start"() <{level = 10 : i32, message = "bqk,bkd->bqd"}> : () -> ()
    %cst_44 = arith.constant dense<0.000000e+00> : vector<1x256x16xf32>
    %78 = tpu.matmul %77, %50, %cst_44 {dimension_numbers = #tpu.dot_dimension_numbers<[2], [1], [1], [2], [0, 0, 0, 1, 1, 2], [0], [0]>} : vector<1x256x8xf32>, vector<1x8x16xf32>, vector<1x256x16xf32> -> vector<1x256x16xf32>
    "tpu.trace_stop"() : () -> ()
    %79 = arith.addf %78, %36 : vector<1x256x16xf32>
    %cst_45 = arith.constant dense<0.000000e+00> : vector<1x256xf32>
    %80 = vector.multi_reduction <add>, %79, %cst_45 [2] : vector<1x256x16xf32> to vector<1x256xf32>
    %81 = vector.shape_cast %80 : vector<1x256xf32> to vector<1x256x1xf32>
    %cst_46 = arith.constant 1.600000e+01 : f32
    %82 = vector.broadcast %cst_46 : f32 to vector<1x256x1xf32>
    %83 = arith.divf %81, %82 : vector<1x256x1xf32>
    %84 = vector.broadcast %83 : vector<1x256x1xf32> to vector<1x256x16xf32>
    %85 = arith.subf %79, %84 : vector<1x256x16xf32>
    %86 = arith.mulf %85, %85 : vector<1x256x16xf32>
    %cst_47 = arith.constant dense<0.000000e+00> : vector<1x256xf32>
    %87 = vector.multi_reduction <add>, %86, %cst_47 [2] : vector<1x256x16xf32> to vector<1x256xf32>
    %88 = vector.shape_cast %87 : vector<1x256xf32> to vector<1x256x1xf32>
    %cst_48 = arith.constant 1.600000e+01 : f32
    %89 = vector.broadcast %cst_48 : f32 to vector<1x256x1xf32>
    %90 = arith.divf %88, %89 : vector<1x256x1xf32>
    %91 = vector.broadcast %83 : vector<1x256x1xf32> to vector<1x256x16xf32>
    %92 = arith.subf %79, %91 : vector<1x256x16xf32>
    %cst_49 = arith.constant 9.99999974E-6 : f32
    %93 = vector.broadcast %cst_49 : f32 to vector<1x256x1xf32>
    %94 = arith.addf %90, %93 : vector<1x256x1xf32>
    %95 = math.rsqrt %94 : vector<1x256x1xf32>
    %96 = vector.broadcast %95 : vector<1x256x1xf32> to vector<1x256x16xf32>
    %97 = arith.mulf %92, %96 : vector<1x256x16xf32>
    %c0_50 = arith.constant 0 : index
    %c0_51 = arith.constant 0 : index
    %98 = vector.load %arg17[%c0_50, %c0_51] : memref<1x16xf32, #tpu.memory_space<vmem>>, vector<1x16xf32>
    %99 = vector.shape_cast %98 : vector<1x16xf32> to vector<1x1x16xf32>
    %100 = vector.broadcast %99 : vector<1x1x16xf32> to vector<1x256x16xf32>
    %101 = arith.mulf %97, %100 : vector<1x256x16xf32>
    %c0_52 = arith.constant 0 : index
    %c0_53 = arith.constant 0 : index
    %102 = vector.load %arg18[%c0_52, %c0_53] : memref<1x16xf32, #tpu.memory_space<vmem>>, vector<1x16xf32>
    %103 = vector.shape_cast %102 : vector<1x16xf32> to vector<1x1x16xf32>
    %104 = vector.broadcast %103 : vector<1x1x16xf32> to vector<1x256x16xf32>
    %105 = arith.addf %101, %104 : vector<1x256x16xf32>
    %cst_54 = arith.constant 2.500000e-01 : f32
    %106 = vector.broadcast %cst_54 : f32 to vector<1x256x16xf32>
    %107 = arith.mulf %105, %106 : vector<1x256x16xf32>
    "tpu.trace_start"() <{level = 10 : i32, message = "bqc,bkc->bqk"}> : () -> ()
    %cst_55 = arith.constant dense<0.000000e+00> : vector<1x256x256xf32>
    %108 = tpu.matmul %107, %64, %cst_55 {dimension_numbers = #tpu.dot_dimension_numbers<[2], [2], [1], [1], [0, 0, 0, 1, 1, 1], [0], [0]>} : vector<1x256x16xf32>, vector<1x256x16xf32>, vector<1x256x256xf32> -> vector<1x256x256xf32>
    "tpu.trace_stop"() : () -> ()
    %cst_56 = arith.constant dense<0xFF800000> : vector<1x256xf32>
    %109 = vector.multi_reduction <maximumf>, %108, %cst_56 [2] : vector<1x256x256xf32> to vector<1x256xf32>
    %110 = vector.shape_cast %109 : vector<1x256xf32> to vector<1x256x1xf32>
    %111 = vector.broadcast %110 : vector<1x256x1xf32> to vector<1x256x256xf32>
    %112 = arith.subf %108, %111 : vector<1x256x256xf32>
    %113 = math.exp %112 : vector<1x256x256xf32>
    %cst_57 = arith.constant dense<0.000000e+00> : vector<1x256xf32>
    %114 = vector.multi_reduction <add>, %113, %cst_57 [2] : vector<1x256x256xf32> to vector<1x256xf32>
    %115 = vector.shape_cast %114 : vector<1x256xf32> to vector<1x256x1xf32>
    %116 = tpu.reciprocal %115 {approx = true} : vector<1x256x1xf32> -> vector<1x256x1xf32>
    %117 = vector.broadcast %116 : vector<1x256x1xf32> to vector<1x256x256xf32>
    %118 = arith.mulf %113, %117 : vector<1x256x256xf32>
    "tpu.trace_start"() <{level = 10 : i32, message = "bqk,bkc->bqc"}> : () -> ()
    %cst_58 = arith.constant dense<0.000000e+00> : vector<1x256x16xf32>
    %119 = tpu.matmul %118, %36, %cst_58 {dimension_numbers = #tpu.dot_dimension_numbers<[2], [1], [1], [2], [0, 0, 0, 1, 1, 2], [0], [0]>} : vector<1x256x256xf32>, vector<1x256x16xf32>, vector<1x256x16xf32> -> vector<1x256x16xf32>
    "tpu.trace_stop"() : () -> ()
    %120 = tpu.transpose %119, [0, 2, 1] : vector<1x256x16xf32> -> vector<1x16x256xf32>
    %cst_59 = arith.constant dense<0.000000e+00> : vector<1xf32>
    %121 = vector.multi_reduction <add>, %120, %cst_59 [1, 2] : vector<1x16x256xf32> to vector<1xf32>
    %122 = vector.shape_cast %121 : vector<1xf32> to vector<1x1x1xf32>
    %cst_60 = arith.constant 4.096000e+03 : f32
    %123 = vector.broadcast %cst_60 : f32 to vector<1x1x1xf32>
    %124 = arith.divf %122, %123 : vector<1x1x1xf32>
    %125 = vector.broadcast %124 : vector<1x1x1xf32> to vector<1x16x256xf32>
    %126 = arith.subf %120, %125 : vector<1x16x256xf32>
    %127 = arith.mulf %126, %126 : vector<1x16x256xf32>
    %cst_61 = arith.constant dense<0.000000e+00> : vector<1xf32>
    %128 = vector.multi_reduction <add>, %127, %cst_61 [1, 2] : vector<1x16x256xf32> to vector<1xf32>
    %129 = vector.shape_cast %128 : vector<1xf32> to vector<1x1x1xf32>
    %cst_62 = arith.constant 4.096000e+03 : f32
    %130 = vector.broadcast %cst_62 : f32 to vector<1x1x1xf32>
    %131 = arith.divf %129, %130 : vector<1x1x1xf32>
    %132 = vector.broadcast %124 : vector<1x1x1xf32> to vector<1x16x256xf32>
    %133 = arith.subf %120, %132 : vector<1x16x256xf32>
    %cst_63 = arith.constant 9.99999974E-6 : f32
    %134 = vector.broadcast %cst_63 : f32 to vector<1x1x1xf32>
    %135 = arith.addf %131, %134 : vector<1x1x1xf32>
    %136 = math.rsqrt %135 : vector<1x1x1xf32>
    %137 = vector.broadcast %136 : vector<1x1x1xf32> to vector<1x16x256xf32>
    %138 = arith.mulf %133, %137 : vector<1x16x256xf32>
    %c0_64 = arith.constant 0 : index
    %c0_65 = arith.constant 0 : index
    %139 = vector.load %arg6[%c0_64, %c0_65] : memref<16x256xf32, #tpu.memory_space<vmem>>, vector<16x256xf32>
    %140 = vector.shape_cast %139 : vector<16x256xf32> to vector<1x16x256xf32>
    %141 = arith.mulf %138, %140 : vector<1x16x256xf32>
    %c0_66 = arith.constant 0 : index
    %c0_67 = arith.constant 0 : index
    %142 = vector.load %arg7[%c0_66, %c0_67] : memref<16x256xf32, #tpu.memory_space<vmem>>, vector<16x256xf32>
    %143 = vector.shape_cast %142 : vector<16x256xf32> to vector<1x16x256xf32>
    %144 = arith.addf %141, %143 : vector<1x16x256xf32>
    %cst_68 = arith.constant 0.000000e+00 : f32
    %145 = vector.broadcast %cst_68 : f32 to vector<1x16x256xf32>
    %146 = arith.cmpf oge, %144, %145 : vector<1x16x256xf32>
    %cst_69 = arith.constant 1.000000e-01 : f32
    %147 = vector.broadcast %cst_69 : f32 to vector<1x16x256xf32>
    %148 = arith.mulf %147, %144 : vector<1x16x256xf32>
    %149 = arith.select %146, %144, %148 : vector<1x16x256xi1>, vector<1x16x256xf32>
    %c0_70 = arith.constant 0 : index
    %c0_71 = arith.constant 0 : index
    %c0_72 = arith.constant 0 : index
    %150 = vector.load %arg19[%c0_70, %c0_71, %c0_72] : memref<1x16x256xf32, #tpu.memory_space<vmem>>, vector<1x16x256xf32>
    tpu.vector_store %arg19[%c0_70, %c0_71, %c0_72], %149 {strides = array<i32>} : memref<1x16x256xf32, #tpu.memory_space<vmem>>, vector<1x16x256xf32>,
    return
  }
  func.func @transform_0(%arg0: i32) -> (i32, i32, i32) {
    %c0_i32 = arith.constant 0 : i32
    %c0_i32_0 = arith.constant 0 : i32
    %c0_i32_1 = arith.constant 0 : i32
    return %arg0, %c0_i32, %c0_i32_0 : i32, i32, i32
  }
  func.func @transform_1(%arg0: i32) -> (i32, i32) {
    %c0_i32 = arith.constant 0 : i32
    %c0_i32_0 = arith.constant 0 : i32
    %c0_i32_1 = arith.constant 0 : i32
    return %c0_i32, %c0_i32_0 : i32, i32
  }
  func.func @transform_2(%arg0: i32) -> (i32, i32) {
    %c0_i32 = arith.constant 0 : i32
    %c0_i32_0 = arith.constant 0 : i32
    %c0_i32_1 = arith.constant 0 : i32
    return %c0_i32, %c0_i32_0 : i32, i32
  }
  func.func @transform_3(%arg0: i32) -> (i32, i32) {
    %c0_i32 = arith.constant 0 : i32
    %c0_i32_0 = arith.constant 0 : i32
    %c0_i32_1 = arith.constant 0 : i32
    return %c0_i32, %c0_i32_0 : i32, i32
  }
  func.func @transform_4(%arg0: i32) -> (i32, i32) {
    %c0_i32 = arith.constant 0 : i32
    %c0_i32_0 = arith.constant 0 : i32
    %c0_i32_1 = arith.constant 0 : i32
    return %c0_i32, %c0_i32_0 : i32, i32
  }
  func.func @transform_5(%arg0: i32) -> (i32, i32) {
    %c0_i32 = arith.constant 0 : i32
    %c0_i32_0 = arith.constant 0 : i32
    %c0_i32_1 = arith.constant 0 : i32
    return %c0_i32, %c0_i32_0 : i32, i32
  }
  func.func @transform_6(%arg0: i32) -> (i32, i32) {
    %c0_i32 = arith.constant 0 : i32
    %c0_i32_0 = arith.constant 0 : i32
    %c0_i32_1 = arith.constant 0 : i32
    return %c0_i32, %c0_i32_0 : i32, i32
  }
  func.func @transform_7(%arg0: i32) -> (i32, i32, i32) {
    %c0_i32 = arith.constant 0 : i32
    %c0_i32_0 = arith.constant 0 : i32
    %c0_i32_1 = arith.constant 0 : i32
    return %arg0, %c0_i32, %c0_i32_0 : i32, i32, i32
  }
  func.func @transform_8(%arg0: i32) -> (i32, i32) {
    %c0_i32 = arith.constant 0 : i32
    %c0_i32_0 = arith.constant 0 : i32
    %c0_i32_1 = arith.constant 0 : i32
    return %c0_i32, %c0_i32_0 : i32, i32
  }
  func.func @transform_9(%arg0: i32) -> (i32, i32) {
    %c0_i32 = arith.constant 0 : i32
    %c0_i32_0 = arith.constant 0 : i32
    %c0_i32_1 = arith.constant 0 : i32
    return %c0_i32, %c0_i32_0 : i32, i32
  }
  func.func @transform_10(%arg0: i32) -> (i32, i32) {
    %c0_i32 = arith.constant 0 : i32
    %c0_i32_0 = arith.constant 0 : i32
    %c0_i32_1 = arith.constant 0 : i32
    return %c0_i32, %c0_i32_0 : i32, i32
  }
  func.func @transform_11(%arg0: i32) -> (i32, i32) {
    %c0_i32 = arith.constant 0 : i32
    %c0_i32_0 = arith.constant 0 : i32
    %c0_i32_1 = arith.constant 0 : i32
    return %c0_i32, %c0_i32_0 : i32, i32
  }
  func.func @transform_12(%arg0: i32) -> (i32, i32) {
    %c0_i32 = arith.constant 0 : i32
    %c0_i32_0 = arith.constant 0 : i32
    %c0_i32_1 = arith.constant 0 : i32
    return %c0_i32, %c0_i32_0 : i32, i32
  }
  func.func @transform_13(%arg0: i32) -> (i32, i32) {
    %c0_i32 = arith.constant 0 : i32
    %c0_i32_0 = arith.constant 0 : i32
    %c0_i32_1 = arith.constant 0 : i32
    return %c0_i32, %c0_i32_0 : i32, i32
  }
  func.func @transform_14(%arg0: i32) -> (i32, i32) {
    %c0_i32 = arith.constant 0 : i32
    %c0_i32_0 = arith.constant 0 : i32
    %c0_i32_1 = arith.constant 0 : i32
    return %c0_i32, %c0_i32_0 : i32, i32
  }
  func.func @transform_15(%arg0: i32) -> (i32, i32) {
    %c0_i32 = arith.constant 0 : i32
    %c0_i32_0 = arith.constant 0 : i32
    %c0_i32_1 = arith.constant 0 : i32
    return %c0_i32, %c0_i32_0 : i32, i32
  }
  func.func @transform_16(%arg0: i32) -> (i32, i32) {
    %c0_i32 = arith.constant 0 : i32
    %c0_i32_0 = arith.constant 0 : i32
    %c0_i32_1 = arith.constant 0 : i32
    return %c0_i32, %c0_i32_0 : i32, i32
  }
  func.func @transform_17(%arg0: i32) -> (i32, i32) {
    %c0_i32 = arith.constant 0 : i32
    %c0_i32_0 = arith.constant 0 : i32
    %c0_i32_1 = arith.constant 0 : i32
    return %c0_i32, %c0_i32_0 : i32, i32
  }
  func.func @transform_18(%arg0: i32) -> (i32, i32, i32) {
    %c0_i32 = arith.constant 0 : i32
    %c0_i32_0 = arith.constant 0 : i32
    %c0_i32_1 = arith.constant 0 : i32
    return %arg0, %c0_i32, %c0_i32_0 : i32, i32, i32
  }
}

</mosaic_0001>

<bundles_post_ra>
// kernel: decoder_block_forward.1
= control target key start
LH: loop header
LB: loop body
LE: loop exit
PB: predicated region body
PF: predicated region fallthrough
CT: control target
= control target key end

     0   :  { %s6538_s27 = smov 0   ;;  %s9555_s0 = inlined_call_operand.vmem [shape: bf16[2,256,128], index: 0, kind: input, shape index: {}]   ;;  %s9556_s1 = inlined_call_operand.vmem [shape: bf16[128,16], index: 1, kind: input, shape index: {}]   ;;  %s9557_s2 = inlined_call_operand.vmem [shape: f32[1,16], index: 2, kind: input, shape index: {}]   ;;  %s9558_s3 = inlined_call_operand.vmem [shape: f32[256,16], index: 3, kind: input, shape index: {}]   ;;  %s9559_s4 = inlined_call_operand.vmem [shape: f32[256,16], index: 4, kind: input, shape index: {}]   ;;  %s9560_s5 = inlined_call_operand.vmem [shape: f32[16,256], index: 5, kind: input, shape index: {}]   ;;  %s9561_s6 = inlined_call_operand.vmem [shape: f32[16,256], index: 6, kind: input, shape index: {}]   ;;  %s9562_s7 = inlined_call_operand.vmem [shape: bf16[2,8,512], index: 7, kind: input, shape index: {}]   ;;  %s9563_s8 = inlined_call_operand.vmem [shape: bf16[512,4], index: 8, kind: input, shape index: {}]   ;;  %s9564_s9 = inlined_call_operand.vmem [shape: f32[1,4], index: 9, kind: input, shape index: {}]   ;;  %s9565_s10 = inlined_call_operand.vmem [shape: bf16[512,16], index: 10, kind: input, shape index: {}]   ;;  %s9566_s11 = inlined_call_operand.vmem [shape: f32[1,16], index: 11, kind: input, shape index: {}]   ;;  %s9567_s12 = inlined_call_operand.vmem [shape: bf16[16,4], index: 12, kind: input, shape index: {}]   ;;  %s9568_s13 = inlined_call_operand.vmem [shape: f32[1,4], index: 13, kind: input, shape index: {}]   ;;  %s9569_s14 = inlined_call_operand.vmem [shape: bf16[16,16], index: 14, kind: input, shape index: {}]   ;;  %s9570_s15 = inlined_call_operand.vmem [shape: f32[1,16], index: 15, kind: input, shape index: {}]   ;;  %s9571_s16 = inlined_call_operand.vmem [shape: f32[1,16], index: 16, kind: input, shape index: {}]   ;;  %s9572_s17 = inlined_call_operand.vmem [shape: f32[1,16], index: 17, kind: input, shape index: {}]   ;;  %s9573_s18 = inlined_call_operand.vmem [shape: f32[2,16,256], index: 18, kind: output, shape index: {}]  }
   0x1   :  { %9582 = sst [smem:[#allocation8_spill]] %s9555_s0 }
   0x2   :  { %9583 = sst [smem:[#allocation9_spill]] %s9556_s1 }
   0x3   :  { %9584 = sst [smem:[#allocation10_spill]] %s9557_s2 }
   0x4 LB: > { %s5323_s28 = sadd.s32 4294967295, %s6439_s27   ;;  %p5327_p0 = scmp.ge.s32.totalorder %s6439_s27, 1  ;;  %s6439_s27 = sphi %s6538_s27, %s28_s27  }
   0x5   : > { %p522_p1 = scmp.lt.s32.totalorder %s6439_s27, 3 }
   0x7   : > { %p523_p2 = pnand %p5327_p0, %p522_p1 }
   0x9   : > { %526 = sbr.rel (%p523_p2) target bundleno = 3284 (0xcd4), region = 92 }
   0xe   : > { %s9585_s0 = sld [smem:[#allocation9_spill]]  ;;  %p581_p3 = scmp.lt.s32.totalorder %s5323_s28, 1  ;;  %vm882_vm0 = vcmask 130048   ;;  %vm2399_vm2 = vcmask 31744  }
   0xf   : > { %s9586_s2 = sld [smem:[#allocation8_spill]] }
  0x10   : > { %s9601_s28 = smov (!%p581_p3, %s5323_s28), 1  ;;  %s9587_s26 = sld [smem:[#allocation10_spill]] }
  0x11   : > { %s5889_s19 = sshll.u32 %s9601_s28, 7  ;;  %s5891_s25 = sshll.u32 %s9601_s28, 5 }
  0x12   : > { %s595_s30 = scalar_lea.vmem %s9573_s18, %s5891_s25 }
  0x14   : > { %v5915_v0 = vld [vmem:[%s9585_s0 + $0x38] sm:$0xff]  ;;  %v5914_v1 = vld [vmem:[%s9585_s0 + $0x30] sm:$0xff]  ;;  %v5913_v2 = vld [vmem:[%s9585_s0 + $0x28] sm:$0xff] }
  0x15   : > { %793 = vmatpush.bf16.msra.mxu0 %v5915_v0  ;;  %5984 = vmatpush.bf16.msra.mxu3 %v5915_v0  ;;  %v5912_v3 = vld [vmem:[%s9585_s0 + $0x20] sm:$0xff]  ;;  %v5911_v4 = vld [vmem:[%s9585_s0 + $0x18] sm:$0xff]  ;;  %v5910_v5 = vld [vmem:[%s9585_s0 + $0x10] sm:$0xff]  ;;  %s6580_s23 = scalar_lea.vmem %s9586_s2, %s5889_s19 }
  0x16   : > { %5982 = vmatpush.bf16.msra.mxu1 %v5915_v0  ;;  %5983 = vmatpush.bf16.msra.mxu2 %v5915_v0  ;;  %v5909_v6 = vld [vmem:[%s9585_s0 + $0x8] sm:$0xff]  ;;  %v5908_v7 = vld [vmem:[%s9585_s0] sm:$0xff]  ;;  %v5894_v10 = vld [vmem:[%s6580_s23 + $0x10] sm:$0xff] }
  0x17   : > { %v5892_v8 = vld [vmem:[%s6580_s23] sm:$0xff]  ;;  %v5893_v9 = vld [vmem:[%s6580_s23 + $0x8] sm:$0xff]  ;;  %v5903_v11 = vld [vmem:[%s6580_s23 + $0x58] sm:$0xff] }
  0x18   : > { %v5895_v12 = vld [vmem:[%s6580_s23 + $0x18] sm:$0xff]  ;;  %v5904_v13 = vld [vmem:[%s6580_s23 + $0x60] sm:$0xff]  ;;  %v5905_v16 = vld [vmem:[%s6580_s23 + $0x68] sm:$0xff] }
  0x19   : > { %794 = vmatpush.bf16.msra.mxu0 %v5914_v1  ;;  %5987 = vmatpush.bf16.msra.mxu3 %v5914_v1  ;;  %v5896_v14 = vld [vmem:[%s6580_s23 + $0x20] sm:$0xff]  ;;  %v5902_v17 = vld [vmem:[%s6580_s23 + $0x50] sm:$0xff]  ;;  %v5897_v18 = vld [vmem:[%s6580_s23 + $0x28] sm:$0xff] }
  0x1a   : > { %5985 = vmatpush.bf16.msra.mxu1 %v5914_v1  ;;  %5986 = vmatpush.bf16.msra.mxu2 %v5914_v1  ;;  %v5900_v15 = vld [vmem:[%s6580_s23 + $0x40] sm:$0xff]  ;;  %v5901_v19 = vld [vmem:[%s6580_s23 + $0x48] sm:$0xff]  ;;  %v5906_v20 = vld [vmem:[%s6580_s23 + $0x70] sm:$0xff] }
  0x1b   : > { %v5898_v21 = vld [vmem:[%s6580_s23 + $0x30] sm:$0xff]  ;;  %v5907_v22 = vld [vmem:[%s6580_s23 + $0x78] sm:$0xff]  ;;  %v6607_v38 = vld [vmem:[%s9587_s26] ss:$0 sm:$0xff] }
  0x1c   : > { %v5899_v23 = vld [vmem:[%s6580_s23 + $0x38] sm:$0xff]  ;;  %s5890_s23 = sshll.u32 %s9601_s28, 4 }
  0x1d   : > { %795 = vmatpush.bf16.msra.mxu0 %v5913_v2  ;;  %5990 = vmatpush.bf16.msra.mxu3 %v5913_v2  ;;  %s6963_s21 = scalar_lea.vmem %s9562_s7, %s5890_s23 }
  0x1e   : > { %5988 = vmatpush.bf16.msra.mxu1 %v5913_v2  ;;  %5989 = vmatpush.bf16.msra.mxu2 %v5913_v2 }
  0x21   : > { %796 = vmatpush.bf16.msra.mxu0 %v5912_v3  ;;  %5993 = vmatpush.bf16.msra.mxu3 %v5912_v3 }
  0x22   : > { %5991 = vmatpush.bf16.msra.mxu1 %v5912_v3  ;;  %5992 = vmatpush.bf16.msra.mxu2 %v5912_v3 }
  0x25   : > { %797 = vmatpush.bf16.msra.mxu0 %v5911_v4  ;;  %5996 = vmatpush.bf16.msra.mxu3 %v5911_v4 }
  0x26   : > { %5994 = vmatpush.bf16.msra.mxu1 %v5911_v4  ;;  %5995 = vmatpush.bf16.msra.mxu2 %v5911_v4 }
  0x29   : > { %798 = vmatpush.bf16.msra.mxu0 %v5910_v5  ;;  %5999 = vmatpush.bf16.msra.mxu3 %v5910_v5 }
  0x2a   : > { %5997 = vmatpush.bf16.msra.mxu1 %v5910_v5  ;;  %5998 = vmatpush.bf16.msra.mxu2 %v5910_v5 }
  0x2d   : > { %799 = vmatpush.bf16.msra.mxu0 %v5909_v6  ;;  %6002 = vmatpush.bf16.msra.mxu3 %v5909_v6 }
  0x2e   : > { %6000 = vmatpush.bf16.msra.mxu1 %v5909_v6  ;;  %6001 = vmatpush.bf16.msra.mxu2 %v5909_v6 }
  0x31   : > { %800 = vmatpush.bf16.msra.mxu0 %v5908_v7  ;;  %6005 = vmatpush.bf16.msra.mxu3 %v5908_v7 }
  0x32   : > { %6003 = vmatpush.bf16.msra.mxu1 %v5908_v7  ;;  %6004 = vmatpush.bf16.msra.mxu2 %v5908_v7 }
  0x34   : > { %801 = vmatmul.bf16.vlgmr.msra.gmra.mxu0 %v5892_v8  ;;  %856 = vmatmul.bf16.vlgmr.msra.gmra.mxu3 %v5903_v11 }
  0x35   : > { %841 = vmatmul.bf16.vlgmr.msra.gmra.mxu1 %v5900_v15  ;;  %851 = vmatmul.bf16.vlgmr.msra.gmra.mxu2 %v5902_v17 }
  0x44   : > { %806 = vmatmul.bf16.gmra.mxu0 %v5893_v9  ;;  %861 = vmatmul.bf16.gmra.mxu3 %v5904_v13 }
  0x45   : > { %846 = vmatmul.bf16.gmra.mxu1 %v5901_v19 }
  0x54   : > { %811 = vmatmul.bf16.gmra.mxu0 %v5894_v10  ;;  %866 = vmatmul.bf16.gmra.mxu3 %v5905_v16 }
  0x64   : > { %816 = vmatmul.bf16.gmra.mxu0 %v5895_v12  ;;  %871 = vmatmul.bf16.gmra.mxu3 %v5906_v20 }
  0x74   : > { %821 = vmatmul.bf16.gmra.mxu0 %v5896_v14  ;;  %876 = vmatmul.bf16.gmra.mxu3 %v5907_v22 }
  0x84   : > { %826 = vmatmul.bf16.gmra.mxu0 %v5897_v18 }
  0x94   : > { %831 = vmatmul.bf16.gmra.mxu0 %v5898_v21 }
  0xa4   : > { %836 = vmatmul.bf16.gmra.mxu0 %v5899_v23 }
  0xb1   : > { %v802_v24 = vpop.f32.mrf.mxu0 }
  0xb2   : > { %v6615_v42 = vadd.f32 %v6607_v38, %v802_v24  ;;  %v842_v46 = vpop.f32.mrf.mxu1 }
  0xb4   : > { %v883_v47 = vsel %vm882_vm0, %v6615_v42, 0.0 }
  0xb7   : > { %v6598_v32 = vpop.f32.mrf.mxu3 }
  0xb9   : > { %v804_v25 = vpop.f32.mrf.mxu0 }
  0xba   : > { %v6612_v41 = vadd.f32 %v6607_v38, %v804_v25  ;;  %v844_v2 = vpop.f32.mrf.mxu1 }
  0xbc   : > { %v884_v44 = vsel %vm882_vm0, %v6612_v41, 0.0 }
  0xbd   : > { %v885_v50 = vadd.f32 %v884_v44, %v883_v47 }
  0xbf   : > { %v6600_v34 = vpop.f32.mrf.mxu3 }
  0xc1   : > { %v807_v26 = vpop.f32.mrf.mxu0 }
  0xc2   : > { %v6618_v43 = vadd.f32 %v6607_v38, %v807_v26  ;;  %v847_v20 = vpop.f32.mrf.mxu1  ;;  %v852_v26 = vpop.f32.mrf.mxu2 }
  0xc4   : > { %v886_v48 = vsel %vm882_vm0, %v6618_v43, 0.0 }
  0xc5   : > { %v887_v54 = vadd.f32 %v886_v48, %v885_v50  ;;  %v6702_v50 = vadd.f32 %v6607_v38, %v847_v20 }
  0xc7   : > { %v6602_v36 = vpop.f32.mrf.mxu3 }
  0xc9   : > { %v809_v27 = vpop.f32.mrf.mxu0 }
  0xca   : > { %v6623_v45 = vadd.f32 %v6607_v38, %v809_v27  ;;  %v849_v47 = vpop.f32.mrf.mxu1 }
  0xcc   : > { %v888_v52 = vsel %vm882_vm0, %v6623_v45, 0.0 }
  0xcd   : > { %v889_v58 = vadd.f32 %v888_v52, %v887_v54  ;;  %v6707_v52 = vadd.f32 %v6607_v38, %v849_v47 }
  0xcf   : > { %v6609_v40 = vpop.f32.mrf.mxu3 }
  0xd1   : > { %v812_v28 = vpop.f32.mrf.mxu0 }
  0xd2   : > { %v6630_v49 = vadd.f32 %v6607_v38, %v812_v28 }
  0xd4   : > { %v890_v56 = vsel %vm882_vm0, %v6630_v49, 0.0 }
  0xd5   : > { %v891_v61 = vadd.f32 %v890_v56, %v889_v58  ;;  %v854_v56 = vpop.f32.mrf.mxu2 }
  0xd7   : > { %v6637_v55 = vpop.f32.mrf.mxu3 }
  0xd9   : > { %v814_v29 = vpop.f32.mrf.mxu0 }
  0xda   : > { %v6635_v53 = vadd.f32 %v6607_v38, %v814_v29 }
  0xdc   : > { %v892_v59 = vsel %vm882_vm0, %v6635_v53, 0.0 }
  0xdd   : > { %v893_v0 = vadd.f32 %v892_v59, %v891_v61  ;;  %v918_v59 = vsel %vm882_vm0, %v6702_v50, 0.0  ;;  %v6712_v61 = vadd.f32 %v6607_v38, %v852_v26 }
  0xdf   : > { %v869_v9 = vpop.f32.mrf.mxu3 }
  0xe1   : > { %v817_v30 = vpop.f32.mrf.mxu0 }
  0xe2   : > { %v6642_v57 = vadd.f32 %v6607_v38, %v817_v30 }
  0xe4   : > { %v894_v62 = vsel %vm882_vm0, %v6642_v57, 0.0 }
  0xe5   : > { %v895_v5 = vadd.f32 %v894_v62, %v893_v0  ;;  %v920_v0 = vsel %vm882_vm0, %v6707_v52, 0.0 }
  0xe7   : > { %v872_v27 = vpop.f32.mrf.mxu3 }
  0xe8   : > { %v6757_v26 = vadd.f32 %v6607_v38, %v872_v27 }
  0xe9   : > { %v819_v31 = vpop.f32.mrf.mxu0 }
  0xea   : > { %v6647_v60 = vadd.f32 %v6607_v38, %v819_v31  ;;  %v6689_v31 = vadd.f32 %v6607_v38, %v842_v46 }
  0xec   : > { %v896_v3 = vsel %vm882_vm0, %v6647_v60, 0.0  ;;  %v914_v48 = vsel %vm882_vm0, %v6689_v31, 0.0 }
  0xed   : > { %v897_v8 = vadd.f32 %v896_v3, %v895_v5  ;;  %v6721_v3 = vadd.f32 %v6607_v38, %v6598_v32  ;;  %v922_v5 = vsel %vm882_vm0, %v6712_v61, 0.0 }
  0xef   : > { %v874_v58 = vpop.f32.mrf.mxu3 }
  0xf1   : > { %v822_v33 = vpop.f32.mrf.mxu0 }
  0xf2   : > { %v6652_v63 = vadd.f32 %v6607_v38, %v822_v33 }
  0xf4   : > { %v898_v6 = vsel %vm882_vm0, %v6652_v63, 0.0 }
  0xf5   : > { %v899_v12 = vadd.f32 %v898_v6, %v897_v8  ;;  %v6727_v8 = vadd.f32 %v6607_v38, %v6600_v34  ;;  %v6741_v34 = vadd.f32 %v6607_v38, %v6609_v40 }
  0xf9   : > { %v824_v35 = vpop.f32.mrf.mxu0 }
  0xfa   : > { %v6657_v4 = vadd.f32 %v6607_v38, %v824_v35 }
  0xfc   : > { %v900_v10 = vsel %vm882_vm0, %v6657_v4, 0.0 }
  0xfd   : > { %v901_v15 = vadd.f32 %v900_v10, %v899_v12 }
 0x101   : > { %v827_v37 = vpop.f32.mrf.mxu0 }
 0x102   : > { %v6662_v7 = vadd.f32 %v6607_v38, %v827_v37  ;;  %v6695_v37 = vadd.f32 %v6607_v38, %v844_v2 }
 0x104   : > { %v902_v13 = vsel %vm882_vm0, %v6662_v7, 0.0 }
 0x105   : > { %v903_v19 = vadd.f32 %v902_v13, %v901_v15  ;;  %v926_v13 = vsel %vm882_vm0, %v6721_v3, 0.0  ;;  %v6735_v15 = vadd.f32 %v6607_v38, %v6602_v36  ;;  %v932_v36 = vsel %vm882_vm0, %v6741_v34, 0.0 }
 0x107   : > { %v930_v20 = vsel %vm882_vm0, %v6735_v15, 0.0 }
 0x109   : > { %v829_v39 = vpop.f32.mrf.mxu0 }
 0x10a   : > { %v6667_v11 = vadd.f32 %v6607_v38, %v829_v39 }
 0x10c   : > { %v904_v17 = vsel %vm882_vm0, %v6667_v11, 0.0 }
 0x10d   : > { %v905_v23 = vadd.f32 %v904_v17, %v903_v19  ;;  %v928_v17 = vsel %vm882_vm0, %v6727_v8, 0.0 }
 0x111   : > { %v832_v51 = vpop.f32.mrf.mxu0 }
 0x112   : > { %v6672_v14 = vadd.f32 %v6607_v38, %v832_v51  ;;  %v916_v51 = vsel %vm882_vm0, %v6695_v37, 0.0 }
 0x114   : > { %v906_v21 = vsel %vm882_vm0, %v6672_v14, 0.0 }
 0x115   : > { %v907_v25 = vadd.f32 %v906_v21, %v905_v23  ;;  %v6747_v21 = vadd.f32 %v6607_v38, %v6637_v55  ;;  %v6762_v55 = vadd.f32 %v6607_v38, %v874_v58  ;;  %v6441_v58 = vmov 4096.0  }
 0x116   : > { %6039 = vrcp.f32 %v6441_v58 }
 0x117   : > { %v934_v40 = vsel %vm882_vm0, %v6747_v21, 0.0  ;;  %v940_v27 = vsel %vm882_vm0, %v6762_v55, 0.0 }
 0x119   : > { %v834_v1 = vpop.f32.mrf.mxu0 }
 0x11a   : > { %v6677_v18 = vadd.f32 %v6607_v38, %v834_v1  ;;  %v6717_v1 = vadd.f32 %v6607_v38, %v854_v56 }
 0x11c   : > { %v908_v24 = vsel %vm882_vm0, %v6677_v18, 0.0  ;;  %v924_v10 = vsel %vm882_vm0, %v6717_v1, 0.0 }
 0x11d   : > { %v909_v29 = vadd.f32 %v908_v24, %v907_v25  ;;  %v6752_v24 = vadd.f32 %v6607_v38, %v869_v9  ;;  %v938_v9 = vsel %vm882_vm0, %v6757_v26, 0.0 }
 0x121   : > { %v837_v16 = vpop.f32.mrf.mxu0 }
 0x122   : > { %v6682_v22 = vadd.f32 %v6607_v38, %v837_v16  ;;  %v877_v16 = vpop.f32.mrf.mxu3 }
 0x124   : > { %v910_v28 = vsel %vm882_vm0, %v6682_v22, 0.0 }
 0x125   : > { %v911_v35 = vadd.f32 %v910_v28, %v909_v29  ;;  %v936_v29 = vsel %vm882_vm0, %v6752_v24, 0.0 }
 0x129   : > { %v839_v30 = vpop.f32.mrf.mxu0 }
 0x12a   : > { %v6692_v33 = vadd.f32 %v6607_v38, %v839_v30  ;;  %v879_v30 = vpop.f32.mrf.mxu3 }
 0x12b   : > { %v6772_v47 = vadd.f32 %v6607_v38, %v879_v30  ;;  %v5920_v30 = vld [vmem:[%s9563_s8 + $0x20] sm:$0xff] }
 0x12c   : > { %v912_v39 = vsel %vm882_vm0, %v6692_v33, 0.0 }
 0x12d   : > { %v913_v44 = vadd.f32 %v912_v39, %v911_v35  ;;  %v6767_v39 = vadd.f32 %v6607_v38, %v877_v16 }
 0x12f   : > { %v915_v46 = vadd.f32 %v914_v48, %v913_v44 }
 0x131   : > { %v917_v54 = vadd.f32 %v916_v51, %v915_v46  ;;  %v942_v46 = vsel %vm882_vm0, %v6767_v39, 0.0 }
 0x133   : > { %v919_v62 = vadd.f32 %v918_v59, %v917_v54  ;;  %v944_v54 = vsel %vm882_vm0, %v6772_v47, 0.0  ;;  %v5931_v59 = vld [vmem:[%s9563_s8 + $0x78] sm:$0xff] }
 0x134   : > { %1654 = vmatpush.bf16.msrb.mxu2 %v5931_v59 }
 0x135   : > { %v921_v2 = vadd.f32 %v920_v0, %v919_v62  ;;  %v6040_v62 = vpop.eup %6039 }
 0x136   : > { %v955_v38 = vmul.f32 4096.0, %v6040_v62  ;;  %vm959_vm1 = vweird.f32 %v6040_v62 }
 0x137   : > { %v923_v6 = vadd.f32 %v922_v5, %v921_v2 }
 0x138   : > { %v956_v5 = vsub.f32 1.0, %v955_v38  ;;  %v5924_v38 = vld [vmem:[%s9563_s8 + $0x40] sm:$0xff] }
 0x139   : > { %v925_v12 = vadd.f32 %v924_v10, %v923_v6 }
 0x13b   : > { %v927_v32 = vadd.f32 %v926_v13, %v925_v12  ;;  %v5923_v12 = vld [vmem:[%s9563_s8 + $0x38] sm:$0xff]  ;;  %v5930_v13 = vld [vmem:[%s9563_s8 + $0x70] sm:$0xff] }
 0x13c   : > { %1641 = vmatpush.bf16.msrb.mxu1 %v5923_v12  ;;  %1655 = vmatpush.bf16.msrb.mxu2 %v5930_v13 }
 0x13d   : > { %v929_v19 = vadd.f32 %v928_v17, %v927_v32  ;;  %v957_v32 = vmul.f32 %v6040_v62, %v956_v5  ;;  %v5938_v5 = vld [vmem:[%s9563_s8 + $0xb0] sm:$0xff] }
 0x13f   : > { %v931_v23 = vadd.f32 %v930_v20, %v929_v19  ;;  %v5922_v19 = vld [vmem:[%s9563_s8 + $0x30] sm:$0xff]  ;;  %v5929_v20 = vld [vmem:[%s9563_s8 + $0x68] sm:$0xff] }
 0x140   : > { %1642 = vmatpush.bf16.msrb.mxu1 %v5922_v19  ;;  %1656 = vmatpush.bf16.msrb.mxu2 %v5929_v20  ;;  %v5937_v20 = vld [vmem:[%s9563_s8 + $0xa8] sm:$0xff] }
 0x141   : > { %v933_v25 = vadd.f32 %v932_v36, %v931_v23  ;;  %v958_v23 = vadd.f32 %v6040_v62, %v957_v32 }
 0x143   : > { %v935_v28 = vadd.f32 %v934_v40, %v933_v25  ;;  %v5921_v25 = vld [vmem:[%s9563_s8 + $0x28] sm:$0xff]  ;;  %v5928_v40 = vld [vmem:[%s9563_s8 + $0x60] sm:$0xff] }
 0x144   : > { %1643 = vmatpush.bf16.msrb.mxu1 %v5921_v25  ;;  %1657 = vmatpush.bf16.msrb.mxu2 %v5928_v40 }
 0x145   : > { %v937_v35 = vadd.f32 %v936_v29, %v935_v28  ;;  %v6799_v28 = vsel %vm959_vm1, %v6040_v62, %v958_v23  ;;  %v5947_v23 = vld [vmem:[%s9563_s8 + $0xf8] sm:$0xff] }
 0x146   : > { %9588 = vst [vmem:[#allocation2_spill] sm:$0xff] %v6799_v28 }
 0x147   : > { %v939_v44 = vadd.f32 %v938_v9, %v937_v35  ;;  %v5927_v35 = vld [vmem:[%s9563_s8 + $0x58] sm:$0xff] }
 0x148   : > { %1644 = vmatpush.bf16.msrb.mxu1 %v5920_v30  ;;  %1658 = vmatpush.bf16.msrb.mxu2 %v5927_v35 }
 0x149   : > { %v941_v48 = vadd.f32 %v940_v27, %v939_v44  ;;  %v5919_v44 = vld [vmem:[%s9563_s8 + $0x18] sm:$0xff]  ;;  %v5926_v27 = vld [vmem:[%s9563_s8 + $0x50] sm:$0xff] }
 0x14b   : > { %v943_v51 = vadd.f32 %v942_v46, %v941_v48 }
 0x14c   : > { %1645 = vmatpush.bf16.msrb.mxu1 %v5919_v44  ;;  %1659 = vmatpush.bf16.msrb.mxu2 %v5926_v27 }
 0x14d   : > { %v945_v56 = vadd.f32 %v944_v54, %v943_v51  ;;  %v5918_v51 = vld [vmem:[%s9563_s8 + $0x10] sm:$0xff]  ;;  %v5925_v54 = vld [vmem:[%s9563_s8 + $0x48] sm:$0xff] }
 0x14f   : > { %946 = vadd.xlane.f32.xlu0 %v945_v56  ;;  %v5939_v56 = vld [vmem:[%s9563_s8 + $0xb8] sm:$0xff] }
 0x150   : > { %1646 = vmatpush.bf16.msrb.mxu1 %v5918_v51  ;;  %1660 = vmatpush.bf16.msrb.mxu2 %v5925_v54  ;;  %v5946_v51 = vld [vmem:[%s9563_s8 + $0xf0] sm:$0xff]  ;;  %v5953_v54 = vld [vmem:[%s9565_s10 + $0x28] sm:$0xff] }
 0x151   : > { %1667 = vmatpush.bf16.msrb.mxu3 %v5939_v56 }
 0x154   : > { %1661 = vmatpush.bf16.msrb.mxu2 %v5924_v38 }
 0x155   : > { %1668 = vmatpush.bf16.msrb.mxu3 %v5938_v5  ;;  %v5952_v5 = vld [vmem:[%s9565_s10 + $0x20] sm:$0xff] }
 0x159   : > { %1669 = vmatpush.bf16.msrb.mxu3 %v5937_v20 }
 0x1c2   : > { %v947_v0 = vpop.xlane.xlu0 %946 }
 0x1c3   : > { %v948_v2 = vrot.slane %v947_v0, 4 }
 0x1c5   : > { %v949_v6 = vadd.f32 %v948_v2, %v947_v0 }
 0x1c7   : > { %v950_v10 = vrot.slane %v949_v6, 2 }
 0x1c9   : > { %v951_v16 = vadd.f32 %v950_v10, %v949_v6  ;;  %v5955_v6 = vld [vmem:[%s9565_s10 + $0x38] sm:$0xff] }
 0x1ca   : > { %1953 = vmatpush.bf16.msra.mxu2 %v5955_v6 }
 0x1cb   : > { %v952_v17 = vrot.slane %v951_v16, 1 }
 0x1cd   : > { %v953_v36 = vadd.f32 %v952_v17, %v951_v16  ;;  %v5916_v16 = vld [vmem:[%s9563_s8] sm:$0xff] }
 0x1cf   : > { %v6802_v29 = vmul.f32 %v6799_v28, %v953_v36 }
 0x1d1   : > { %v6812_v9 = vsub.f32 %v6615_v42, %v6802_v29  ;;  %v6822_v48 = vsub.f32 %v6612_v41, %v6802_v29  ;;  %v6826_v46 = vsub.f32 %v6618_v43, %v6802_v29  ;;  %v6838_v41 = vsub.f32 %v6623_v45, %v6802_v29  ;;  %v5917_v45 = vld [vmem:[%s9563_s8 + $0x8] sm:$0xff] }
 0x1d2   : > { %v6847_v58 = vsub.f32 %v6630_v49, %v6802_v29  ;;  %v6860_v0 = vsub.f32 %v6635_v53, %v6802_v29  ;;  %1647 = vmatpush.bf16.msrb.mxu1 %v5917_v45  ;;  %v6873_v12 = vsub.f32 %v6642_v57, %v6802_v29  ;;  %v6883_v17 = vsub.f32 %v6647_v60, %v6802_v29  ;;  %v5954_v60 = vld [vmem:[%s9565_s10 + $0x30] sm:$0xff] }
 0x1d3   : > { %v994_v42 = vmul.f32 %v6812_v9, %v6812_v9  ;;  %v995_v43 = vmul.f32 %v6822_v48, %v6822_v48  ;;  %v996_v59 = vmul.f32 %v6826_v46, %v6826_v46  ;;  %v997_v49 = vmul.f32 %v6838_v41, %v6838_v41  ;;  %1954 = vmatpush.bf16.msra.mxu2 %v5954_v60 }
 0x1d4   : > { %v998_v53 = vmul.f32 %v6847_v58, %v6847_v58  ;;  %v999_v57 = vmul.f32 %v6860_v0, %v6860_v0  ;;  %v6899_v25 = vsub.f32 %v6652_v63, %v6802_v29  ;;  %v1000_v40 = vmul.f32 %v6873_v12, %v6873_v12  ;;  %v5936_v63 = vld [vmem:[%s9563_s8 + $0xa0] sm:$0xff] }
 0x1d5   : > { %v1026_v62 = vsel %vm882_vm0, %v994_v42, 0.0  ;;  %v1027_v2 = vsel %vm882_vm0, %v995_v43, 0.0  ;;  %v1029_v13 = vsel %vm882_vm0, %v996_v59, 0.0  ;;  %v1031_v19 = vsel %vm882_vm0, %v997_v49, 0.0  ;;  %1670 = vmatpush.bf16.msrb.mxu3 %v5936_v63 }
 0x1d6   : > { %v1028_v10 = vadd.f32 %v1027_v2, %v1026_v62  ;;  %1648 = vmatpush.bf16.msrb.mxu1 %v5916_v16  ;;  %v1033_v30 = vsel %vm882_vm0, %v998_v53, 0.0  ;;  %v6906_v44 = vsub.f32 %v6657_v4, %v6802_v29  ;;  %v1001_v27 = vmul.f32 %v6883_v17, %v6883_v17  ;;  %v5945_v2 = vld [vmem:[%s9563_s8 + $0xe8] sm:$0xff]  ;;  %v5944_v16 = vld [vmem:[%s9563_s8 + $0xe0] sm:$0xff] }
 0x1d7   : > { %v1035_v42 = vsel %vm882_vm0, %v999_v57, 0.0  ;;  %v6922_v43 = vsub.f32 %v6662_v7, %v6802_v29  ;;  %v1002_v56 = vmul.f32 %v6899_v25, %v6899_v25  ;;  %v1037_v59 = vsel %vm882_vm0, %v1000_v40, 0.0  ;;  %1955 = vmatpush.bf16.msra.mxu2 %v5953_v54  ;;  %v5935_v7 = vld [vmem:[%s9563_s8 + $0x98] sm:$0xff] }
 0x1d8   : > { %v1030_v32 = vadd.f32 %v1029_v13, %v1028_v10  ;;  %v6929_v45 = vsub.f32 %v6667_v11, %v6802_v29  ;;  %v1003_v38 = vmul.f32 %v6906_v44, %v6906_v44  ;;  %v1039_v49 = vsel %vm882_vm0, %v1001_v27, 0.0  ;;  %v5933_v27 = vld [vmem:[%s9563_s8 + $0x88] sm:$0xff] }
 0x1d9   : > { %v6946_v6 = vsub.f32 %v6672_v14, %v6802_v29  ;;  %v1004_v10 = vmul.f32 %v6922_v43, %v6922_v43  ;;  %v1041_v53 = vsel %vm882_vm0, %v1002_v56, 0.0  ;;  %1671 = vmatpush.bf16.msrb.mxu3 %v5935_v7  ;;  %v5951_v14 = vld [vmem:[%s9565_s10 + $0x18] sm:$0xff]  ;;  %v6967_v57 = vsub.f32 %v6677_v18, %v6802_v29  ;;  %v5942_v7 = vld [vmem:[%s9563_s8 + $0xd0] sm:$0xff] }
 0x1da   : > { %v1032_v36 = vadd.f32 %v1031_v19, %v1030_v32  ;;  %1680 = vmatpush.bf16.msra.mxu1 %v5947_v23  ;;  %v5934_v32 = vld [vmem:[%s9563_s8 + $0x90] sm:$0xff]  ;;  %v1005_v19 = vmul.f32 %v6929_v45, %v6929_v45  ;;  %v1043_v20 = vsel %vm882_vm0, %v1003_v38, 0.0  ;;  %v5943_v18 = vld [vmem:[%s9563_s8 + $0xd8] sm:$0xff]  ;;  %v7002_v38 = vsub.f32 %v6689_v31, %v6802_v29  ;;  %v5949_v31 = vld [vmem:[%s9565_s10 + $0x8] sm:$0xff] }
 0x1db   : > { %1956 = vmatpush.bf16.msra.mxu2 %v5952_v5  ;;  %v1006_v60 = vmul.f32 %v6946_v6, %v6946_v6  ;;  %v1045_v40 = vsel %vm882_vm0, %v1004_v10, 0.0  ;;  %v1007_v54 = vmul.f32 %v6967_v57, %v6967_v57  ;;  %v5932_v5 = vld [vmem:[%s9563_s8 + $0x80] sm:$0xff] }
 0x1dc   : > { %v1034_v35 = vadd.f32 %v1033_v30, %v1032_v36  ;;  %v6974_v36 = vsub.f32 %v6682_v22, %v6802_v29  ;;  %v1365_v30 = vld [vmem:[%s6963_s21] sm:$0xff]  ;;  %v5950_v22 = vld [vmem:[%s9565_s10 + $0x10] sm:$0xff] }
 0x1dd   : > { %1672 = vmatpush.bf16.msrb.mxu3 %v5934_v32  ;;  %v1437_v63 = vunpack.c.l.b16 %v1365_v30 }
 0x1de   : > { %v1036_v4 = vadd.f32 %v1035_v42, %v1034_v35  ;;  %1681 = vmatpush.bf16.msra.mxu1 %v5946_v51  ;;  %v1438_v42 = vunpack.c.h.b16 %v1365_v30  ;;  %v6991_v51 = vsub.f32 %v6692_v33, %v6802_v29  ;;  %v1049_v33 = vsel %vm882_vm0, %v1006_v60, 0.0  ;;  %v5979_v30 = vld [vmem:[%s9565_s10 + $0xf8] sm:$0xff] }
 0x1df   : > { %1957 = vmatpush.bf16.msra.mxu2 %v5951_v14 }
 0x1e0   : > { %v1038_v62 = vadd.f32 %v1037_v59, %v1036_v4  ;;  %v1047_v4 = vsel %vm882_vm0, %v1005_v19, 0.0  ;;  %v6996_v59 = vpack.c.b16 %v1438_v42, %v1438_v42  ;;  %v1009_v10 = vmul.f32 %v6991_v51, %v6991_v51  ;;  %v5941_v19 = vld [vmem:[%s9563_s8 + $0xc8] sm:$0xff]  ;;  %v5940_v42 = vld [vmem:[%s9563_s8 + $0xc0] sm:$0xff] }
 0x1e1   : > { %1673 = vmatpush.bf16.msrb.mxu3 %v5933_v27 }
 0x1e2   : > { %v1040_v11 = vadd.f32 %v1039_v49, %v1038_v62  ;;  %1682 = vmatpush.bf16.msra.mxu1 %v5945_v2  ;;  %v6998_v62 = vpack.c.b16 %v1437_v63, %v1437_v63  ;;  %v1008_v49 = vmul.f32 %v6974_v36, %v6974_v36  ;;  %1662 = vmatmul.bf16.vlgmr.msrb.gmra.mxu2 %v6996_v59 }
 0x1e3   : > { %1958 = vmatpush.bf16.msra.mxu2 %v5950_v22 }
 0x1e4   : > { %v1042_v13 = vadd.f32 %v1041_v53, %v1040_v11  ;;  %v7018_v11 = vsub.f32 %v6695_v37, %v6802_v29  ;;  %v1051_v53 = vsel %vm882_vm0, %v1007_v54, 0.0  ;;  %1649 = vmatmul.bf16.vlgmr.msrb.gmra.mxu1 %v6998_v62  ;;  %v1010_v37 = vmul.f32 %v7002_v38, %v7002_v38  ;;  %v5971_v54 = vld [vmem:[%s9565_s10 + $0xb8] sm:$0xff] }
 0x1e5   : > { %v1053_v14 = vsel %vm882_vm0, %v1008_v49, 0.0  ;;  %1674 = vmatpush.bf16.msrb.mxu3 %v5932_v5  ;;  %v5961_v49 = vld [vmem:[%s9565_s10 + $0x68] sm:$0xff] }
 0x1e6   : > { %v1044_v23 = vadd.f32 %v1043_v20, %v1042_v13  ;;  %1683 = vmatpush.bf16.msra.mxu1 %v5944_v16  ;;  %v5963_v13 = vld [vmem:[%s9565_s10 + $0x78] sm:$0xff]  ;;  %v7030_v16 = vsub.f32 %v6702_v50, %v6802_v29  ;;  %v7043_v50 = vsub.f32 %v6707_v52, %v6802_v29  ;;  %v1011_v60 = vmul.f32 %v7018_v11, %v7018_v11 }
 0x1e7   : > { %1959 = vmatpush.bf16.msra.mxu2 %v5949_v31  ;;  %v7056_v52 = vsub.f32 %v6712_v61, %v6802_v29  ;;  %v1057_v22 = vsel %vm882_vm0, %v1010_v37, 0.0  ;;  %v7069_v61 = vsub.f32 %v6717_v1, %v6802_v29  ;;  %v7083_v31 = vsub.f32 %v6721_v3, %v6802_v29 }
 0x1e8   : > { %v1046_v35 = vadd.f32 %v1045_v40, %v1044_v23  ;;  %v5948_v23 = vld [vmem:[%s9565_s10] sm:$0xff]  ;;  %v1055_v40 = vsel %vm882_vm0, %v1009_v10, 0.0  ;;  %v1012_v27 = vmul.f32 %v7030_v16, %v7030_v16 }
 0x1e9   : > { %1966 = vmatpush.bf16.msra.mxu3 %v5963_v13  ;;  %v1014_v10 = vmul.f32 %v7056_v52, %v7056_v52  ;;  %v1015_v3 = vmul.f32 %v7069_v61, %v7069_v61 }
 0x1ea   : > { %v1048_v56 = vadd.f32 %v1047_v4, %v1046_v35  ;;  %1684 = vmatpush.bf16.msra.mxu1 %v5943_v18  ;;  %v5962_v18 = vld [vmem:[%s9565_s10 + $0x70] sm:$0xff]  ;;  %v1013_v4 = vmul.f32 %v7043_v50, %v7043_v50 }
 0x1eb   : > { %1960 = vmatpush.bf16.msra.mxu2 %v5948_v23  ;;  %v5977_v23 = vld [vmem:[%s9565_s10 + $0xe8] sm:$0xff] }
 0x1ec   : > { %v1050_v2 = vadd.f32 %v1049_v33, %v1048_v56  ;;  %v1059_v56 = vsel %vm882_vm0, %v1011_v60, 0.0  ;;  %v5978_v33 = vld [vmem:[%s9565_s10 + $0xf0] sm:$0xff] }
 0x1ed   : > { %1967 = vmatpush.bf16.msra.mxu3 %v5962_v18  ;;  %v1016_v18 = vmul.f32 %v7083_v31, %v7083_v31 }
 0x1ee   : > { %v1052_v32 = vadd.f32 %v1051_v53, %v1050_v2  ;;  %1685 = vmatpush.bf16.msra.mxu1 %v5942_v7  ;;  %v1366_v7 = vld [vmem:[%s6963_s21 + $0x8] sm:$0xff]  ;;  %v1061_v53 = vsel %vm882_vm0, %v1012_v27, 0.0 }
 0x1ef   : > { %1992 = vmatpush.bf16.msrb.mxu2 %v5979_v30  ;;  %v1439_v5 = vunpack.c.l.b16 %v1366_v7  ;;  %v1440_v1 = vunpack.c.h.b16 %v1366_v7  ;;  %v1065_v30 = vsel %vm882_vm0, %v1014_v10, 0.0  ;;  %v5969_v27 = vld [vmem:[%s9565_s10 + $0xa8] sm:$0xff]  ;;  %v5968_v7 = vld [vmem:[%s9565_s10 + $0xa0] sm:$0xff] }
 0x1f0   : > { %v1054_v20 = vadd.f32 %v1053_v14, %v1052_v32  ;;  %v5970_v32 = vld [vmem:[%s9565_s10 + $0xb0] sm:$0xff]  ;;  %v7095_v14 = vsub.f32 %v6727_v8, %v6802_v29  ;;  %v7111_v8 = vsub.f32 %v6735_v15, %v6802_v29  ;;  %v1067_v15 = vsel %vm882_vm0, %v1015_v3, 0.0  ;;  %v5967_v3 = vld [vmem:[%s9565_s10 + $0x98] sm:$0xff] }
 0x1f1   : > { %v7091_v37 = vpack.c.b16 %v1439_v5, %v1439_v5  ;;  %1968 = vmatpush.bf16.msra.mxu3 %v5961_v49  ;;  %v1069_v49 = vsel %vm882_vm0, %v1016_v18, 0.0  ;;  %v5958_v5 = vld [vmem:[%s9565_s10 + $0x50] sm:$0xff] }
 0x1f2   : > { %v1056_v35 = vadd.f32 %v1055_v40, %v1054_v20  ;;  %1686 = vmatpush.bf16.msra.mxu1 %v5941_v19  ;;  %v1063_v19 = vsel %vm882_vm0, %v1013_v4, 0.0  ;;  %v5960_v20 = vld [vmem:[%s9565_s10 + $0x60] sm:$0xff]  ;;  %v7106_v40 = vpack.c.b16 %v1440_v1, %v1440_v1  ;;  %1961 = vmatmul.bf16.vlgmr.msra.gmra.mxu2 %v6998_v62  ;;  %v7146_v62 = vsub.f32 %v6752_v24, %v6802_v29  ;;  %v5975_v1 = vld [vmem:[%s9565_s10 + $0xd8] sm:$0xff] }
 0x1f3   : > { %1993 = vmatpush.bf16.msrb.mxu2 %v5978_v33  ;;  %1675 = vmatmul.bf16.vlgmr.msrb.gmra.mxu3 %v7091_v37  ;;  %v7159_v24 = vsub.f32 %v6757_v26, %v6802_v29 }
 0x1f4   : > { %v1058_v63 = vadd.f32 %v1057_v22, %v1056_v35  ;;  %v7121_v22 = vsub.f32 %v6741_v34, %v6802_v29  ;;  %v7136_v34 = vsub.f32 %v6747_v21, %v6802_v29 }
 0x1f5   : > { %1969 = vmatpush.bf16.msra.mxu3 %v5960_v20  ;;  %v1021_v20 = vmul.f32 %v7146_v62, %v7146_v62 }
 0x1f6   : > { %v1060_v2 = vadd.f32 %v1059_v56, %v1058_v63  ;;  %1687 = vmatpush.bf16.msra.mxu1 %v5940_v42  ;;  %v1017_v42 = vmul.f32 %v7095_v14, %v7095_v14  ;;  %v5959_v63 = vld [vmem:[%s9565_s10 + $0x58] sm:$0xff]  ;;  %v1018_v56 = vmul.f32 %v7111_v8, %v7111_v8 }
 0x1f7   : > { %1994 = vmatpush.bf16.msrb.mxu2 %v5977_v23  ;;  %v5957_v23 = vld [vmem:[%s9565_s10 + $0x48] sm:$0xff] }
 0x1f8   : > { %v1062_v13 = vadd.f32 %v1061_v53, %v1060_v2  ;;  %v1019_v2 = vmul.f32 %v7121_v22, %v7121_v22  ;;  %v1071_v21 = vsel %vm882_vm0, %v1017_v42, 0.0  ;;  %v1020_v53 = vmul.f32 %v7136_v34, %v7136_v34  ;;  %v5966_v42 = vld [vmem:[%s9565_s10 + $0x90] sm:$0xff] }
 0x1f9   : > { %1688 = vmatmul.bf16.vlgmr.msra.gmra.mxu1 %v7106_v40  ;;  %1970 = vmatpush.bf16.msra.mxu3 %v5959_v63 }
 0x1fa   : > { %1979 = vmatpush.bf16.msrb.mxu1 %v5971_v54  ;;  %v1064_v60 = vadd.f32 %v1063_v19, %v1062_v13  ;;  %v5976_v54 = vld [vmem:[%s9565_s10 + $0xe0] sm:$0xff]  ;;  %v1073_v13 = vsel %vm882_vm0, %v1018_v56, 0.0  ;;  %v7169_v19 = vsub.f32 %v6762_v55, %v6802_v29  ;;  %v1075_v26 = vsel %vm882_vm0, %v1019_v2, 0.0 }
 0x1fb   : > { %1995 = vmatpush.bf16.msrb.mxu2 %v5976_v54  ;;  %v7182_v55 = vsub.f32 %v6767_v39, %v6802_v29  ;;  %v1079_v39 = vsel %vm882_vm0, %v1021_v20, 0.0  ;;  %v5956_v54 = vld [vmem:[%s9565_s10 + $0x40] sm:$0xff] }
 0x1fc   : > { %v1066_v35 = vadd.f32 %v1065_v30, %v1064_v60  ;;  %v5974_v60 = vld [vmem:[%s9565_s10 + $0xd0] sm:$0xff]  ;;  %v1022_v30 = vmul.f32 %v7159_v24, %v7159_v24  ;;  %v1023_v63 = vmul.f32 %v7169_v19, %v7169_v19 }
 0x1fd   : > { %1971 = vmatpush.bf16.msra.mxu3 %v5958_v5 }
 0x1fe   : > { %1980 = vmatpush.bf16.msrb.mxu1 %v5970_v32  ;;  %v1068_v4 = vadd.f32 %v1067_v15, %v1066_v35  ;;  %v1077_v35 = vsel %vm882_vm0, %v1020_v53, 0.0  ;;  %v7192_v15 = vsub.f32 %v6772_v47, %v6802_v29  ;;  %v1024_v47 = vmul.f32 %v7182_v55, %v7182_v55 }
 0x1ff   : > { %1996 = vmatpush.bf16.msrb.mxu2 %v5975_v1  ;;  %v1081_v29 = vsel %vm882_vm0, %v1022_v30, 0.0  ;;  %v1083_v2 = vsel %vm882_vm0, %v1023_v63, 0.0 }
 0x200   : > { %v1070_v33 = vadd.f32 %v1069_v49, %v1068_v4  ;;  %v5973_v4 = vld [vmem:[%s9565_s10 + $0xc8] sm:$0xff]  ;;  %v1085_v1 = vsel %vm882_vm0, %v1024_v47, 0.0 }
 0x201   : > { %1972 = vmatpush.bf16.msra.mxu3 %v5957_v23 }
 0x202   : > { %1981 = vmatpush.bf16.msrb.mxu1 %v5969_v27  ;;  %v1072_v10 = vadd.f32 %v1071_v21, %v1070_v33  ;;  %v5965_v33 = vld [vmem:[%s9565_s10 + $0x88] sm:$0xff]  ;;  %v5972_v21 = vld [vmem:[%s9565_s10 + $0xc0] sm:$0xff] }
 0x203   : > { %1997 = vmatpush.bf16.msrb.mxu2 %v5974_v60 }
 0x204   : > { %v1074_v32 = vadd.f32 %v1073_v13, %v1072_v10  ;;  %v5964_v13 = vld [vmem:[%s9565_s10 + $0x80] sm:$0xff] }
 0x205   : > { %1973 = vmatpush.bf16.msra.mxu3 %v5956_v54 }
 0x206   : > { %1982 = vmatpush.bf16.msrb.mxu1 %v5968_v7  ;;  %v1076_v18 = vadd.f32 %v1075_v26, %v1074_v32  ;;  %v1025_v7 = vmul.f32 %v7192_v15, %v7192_v15 }
 0x207   : > { %1998 = vmatpush.bf16.msrb.mxu2 %v5973_v4 }
 0x208   : > { %v1078_v27 = vadd.f32 %v1077_v35, %v1076_v18  ;;  %1974 = vmatmul.bf16.vlgmr.msra.gmra.mxu3 %v6996_v59  ;;  %v1087_v53 = vsel %vm882_vm0, %v1025_v7, 0.0 }
 0x20a   : > { %1983 = vmatpush.bf16.msrb.mxu1 %v5967_v3  ;;  %v1080_v56 = vadd.f32 %v1079_v39, %v1078_v27 }
 0x20b   : > { %1999 = vmatpush.bf16.msrb.mxu2 %v5972_v21 }
 0x20c   : > { %v1082_v49 = vadd.f32 %v1081_v29, %v1080_v56  ;;  %v6034_v29 = vld [vmem:[%s9566_s11] ss:$0 sm:$0xff] }
 0x20e   : > { %1984 = vmatpush.bf16.msrb.mxu1 %v5966_v42  ;;  %v1084_v5 = vadd.f32 %v1083_v2, %v1082_v49  ;;  %2000 = vmatmul.bf16.vlgmr.msrb.gmra.mxu2 %v7106_v40 }
 0x210   : > { %v1086_v10 = vadd.f32 %v1085_v1, %v1084_v5 }
 0x212   : > { %1985 = vmatpush.bf16.msrb.mxu1 %v5965_v33  ;;  %v1088_v32 = vadd.f32 %v1087_v53, %v1086_v10 }
 0x214   : > { %1089 = vadd.xlane.f32.xlu0 %v1088_v32 }
 0x216   : > { %1986 = vmatpush.bf16.msrb.mxu1 %v5964_v13 }
 0x219   : > { %1987 = vmatmul.bf16.vlgmr.msrb.gmra.mxu1 %v7091_v37  ;;  %v6033_v37 = vld [vmem:[%s9564_s9] ss:$0 sm:$0xff] }
 0x261   : > { %v1650_v3 = vpop.f32.mrf.mxu1 }
 0x262   : > { %v1651_v33 = vadd.f32 %v6033_v37, %v1650_v3 }
 0x265   : > { %v1663_v20 = vpop.f32.mrf.mxu2 }
 0x266   : > { %v1664_v21 = vadd.f32 %v1663_v20, %v1651_v33  ;;  %v1171_v33 = vld [vmem:[%s9558_s3 + $0xf0] sm:$0xff] }
 0x269   : > { %v1652_v26 = vpop.f32.mrf.mxu1 }
 0x26d   : > { %v1665_v23 = vpop.f32.mrf.mxu2 }
 0x275   : > { %v1962_v42 = vpop.f32.mrf.mxu2 }
 0x276   : > { %v1676_v18 = vpop.f32.mrf.mxu3  ;;  %v1689_v35 = vpop.f32.mrf.mxu1  ;;  %v1963_v7 = vadd.f32 %v6034_v29, %v1962_v42  ;;  %v1205_v29 = vld [vmem:[%s9559_s4] sm:$0xff] }
 0x277   : > { %v1677_v10 = vadd.f32 %v1676_v18, %v1664_v21  ;;  %v5981_v18 = vld [vmem:[%s9569_s14] sm:$0xff] }
 0x278   : > { %2285 = vmatpush.bf16.msra.mxu1 %v5981_v18  ;;  %v1153_v18 = vld [vmem:[%s9558_s3 + $0x60] sm:$0xff] }
 0x279   : > { %v1690_v32 = vadd.f32 %v1689_v35, %v1677_v10 }
 0x27b   : > { %5726 = vmatpush.xpose.msk.msra.mxu2 %vm2399_vm2, %v1690_v32 }
 0x27d   : > { %v1964_v47 = vpop.f32.mrf.mxu2 }
 0x27e   : > { %v1678_v54 = vpop.f32.mrf.mxu3  ;;  %v1691_v56 = vpop.f32.mrf.mxu1 }
 0x27f   : > { %v1141_v56 = vld [vmem:[%s9558_s3] sm:$0xff] }
 0x287   : > { %v1090_v59 = vpop.xlane.xlu0 %1089 }
 0x288   : > { %v1091_v60 = vrot.slane %v1090_v59, 4 }
 0x28a   : > { %v1092_v30 = vadd.f32 %v1091_v60, %v1090_v59  ;;  %v5980_v59 = vld [vmem:[%s9567_s12] sm:$0xff] }
 0x28b   : > { %v1975_v2 = vpop.f32.mrf.mxu3  ;;  %2184 = vmatpush.bf16.msrb.mxu3 %v5980_v59 }
 0x28c   : > { %v1093_v27 = vrot.slane %v1092_v30, 2  ;;  %v1976_v5 = vadd.f32 %v1975_v2, %v1963_v7  ;;  %v1172_v7 = vld [vmem:[%s9558_s3 + $0xf8] sm:$0xff] }
 0x28e   : > { %v1094_v63 = vadd.f32 %v1093_v27, %v1092_v30 }
 0x290   : > { %v1095_v39 = vrot.slane %v1094_v63, 1 }
 0x291   : > { %v2001_v13 = vpop.f32.mrf.mxu2 }
 0x292   : > { %v1096_v4 = vadd.f32 %v1095_v39, %v1094_v63 }
 0x293   : > { %v1977_v3 = vpop.f32.mrf.mxu3 }
 0x294   : > { %v1097_v40 = vmul.f32 %v1096_v4, %v6799_v28 }
 0x296   : > { %v1098_v49 = vadd.f32 1e-05, %v1097_v40  ;;  %v1988_v1 = vpop.f32.mrf.mxu1  ;;  %v1142_v40 = vld [vmem:[%s9558_s3 + $0x8] sm:$0xff] }
 0x297   : > { %v1989_v53 = vadd.f32 %v1988_v1, %v1976_v5  ;;  %v1154_v5 = vld [vmem:[%s9558_s3 + $0x68] sm:$0xff] }
 0x298   : > { %6041 = vrsqrt.f32 %v1098_v49  ;;  %vm1105_vm4 = vweird.f32 %v1098_v49  ;;  %v1170_v1 = vld [vmem:[%s9558_s3 + $0xe8] sm:$0xff] }
 0x299   : > { %v2002_v26 = vadd.f32 %v2001_v13, %v1989_v53  ;;  %v2003_v35 = vpop.f32.mrf.mxu2 }
 0x29a   : > { %v1169_v35 = vld [vmem:[%s9558_s3 + $0xe0] sm:$0xff] }
 0x29b   : > { %3076 = vmatpush.msrb.mxu0 %v2002_v26 }
 0x29e   : > { %v6042_v23 = vpop.eup %6041  ;;  %v1990_v30 = vpop.f32.mrf.mxu1 }
 0x29f   : > { %v1100_v60 = vmul.f32 %v6042_v23, %v1098_v49  ;;  %vm1106_vm3 = vweird.f32 %v6042_v23 }
 0x2a0   : > { %vm1107_vm5 = vmor %vm1105_vm4, %vm1106_vm3 }
 0x2a1   : > { %v1101_v20 = vmul.f32 %v6042_v23, %v1100_v60 }
 0x2a3   : > { %v1102_v27 = vmul.f32 0.5, %v1101_v20 }
 0x2a5   : > { %v1103_v42 = vsub.f32 1.5, %v1102_v27 }
 0x2a7   : > { %v1104_v63 = vmul.f32 %v6042_v23, %v1103_v42 }
 0x2a9   : > { %v7237_v39 = vsel %vm1107_vm5, %v6042_v23, %v1104_v63  ;;  %v1236_v23 = vld [vmem:[%s9559_s4 + $0xf8] sm:$0xff] }
 0x2aa   : > { %v1109_v54 = vmul.f32 %v7237_v39, %v6812_v9  ;;  %v1110_v4 = vmul.f32 %v7237_v39, %v6822_v48  ;;  %v1123_v47 = vmul.f32 %v7237_v39, %v6974_v36  ;;  %v1124_v37 = vmul.f32 %v7237_v39, %v6991_v51  ;;  %v1155_v9 = vld [vmem:[%s9558_s3 + $0x70] sm:$0xff]  ;;  %v1156_v48 = vld [vmem:[%s9558_s3 + $0x78] sm:$0xff]  ;;  %v1206_v51 = vld [vmem:[%s9559_s4 + $0x8] sm:$0xff] }
 0x2ab   : > { %v1139_v49 = vmul.f32 %v7237_v39, %v7182_v55  ;;  %v1140_v36 = vmul.f32 %v7237_v39, %v7192_v15  ;;  %v1122_v2 = vmul.f32 %v7237_v39, %v6967_v57  ;;  %v1138_v55 = vmul.f32 %v7237_v39, %v7169_v19  ;;  %v1220_v57 = vld [vmem:[%s9559_s4 + $0x78] sm:$0xff] }
 0x2ac   : > { %v1173_v21 = vmul.f32 %v1141_v56, %v1109_v54  ;;  %v1174_v15 = vmul.f32 %v1142_v40, %v1110_v4  ;;  %v7287_v10 = vmul.f32 %v7237_v39, %v6826_v46  ;;  %v1187_v53 = vmul.f32 %v1155_v9, %v1123_v47 }
 0x2ad   : > { %v1188_v13 = vmul.f32 %v1156_v48, %v1124_v37  ;;  %v7294_v19 = vmul.f32 %v7237_v39, %v6838_v41  ;;  %v7298_v32 = vmul.f32 %v7237_v39, %v6883_v17  ;;  %v7302_v26 = vmul.f32 %v7237_v39, %v6899_v25  ;;  %v1219_v41 = vld [vmem:[%s9559_s4 + $0x70] sm:$0xff]  ;;  %v1218_v48 = vld [vmem:[%s9559_s4 + $0x68] sm:$0xff] }
 0x2ae   : > { %v1120_v46 = vmul.f32 %v7237_v39, %v6929_v45  ;;  %v1235_v17 = vld [vmem:[%s9559_s4 + $0xf0] sm:$0xff]  ;;  %v1121_v59 = vmul.f32 %v7237_v39, %v6946_v6  ;;  %v1137_v25 = vmul.f32 %v7237_v39, %v7159_v24  ;;  %v1203_v60 = vmul.f32 %v1171_v33, %v1139_v49  ;;  %v1152_v49 = vld [vmem:[%s9558_s3 + $0x58] sm:$0xff] }
 0x2af   : > { %v1204_v45 = vmul.f32 %v1172_v7, %v1140_v36  ;;  %v1186_v3 = vmul.f32 %v1154_v5, %v1122_v2  ;;  %v1202_v20 = vmul.f32 %v1170_v1, %v1138_v55  ;;  %v1237_v30 = vadd.f32 %v1205_v29, %v1173_v21  ;;  %v1234_v29 = vld [vmem:[%s9559_s4 + $0xe8] sm:$0xff]  ;;  %v1168_v1 = vld [vmem:[%s9558_s3 + $0xd8] sm:$0xff] }
 0x2b0   : > { %v1238_v27 = vadd.f32 %v1206_v51, %v1174_v15  ;;  %v1252_v42 = vadd.f32 %v1220_v57, %v1188_v13  ;;  %v1251_v6 = vadd.f32 %v1219_v41, %v1187_v53  ;;  %v1267_v54 = vadd.f32 %v1235_v17, %v1203_v60  ;;  %v1233_v41 = vld [vmem:[%s9559_s4 + $0xe0] sm:$0xff] }
 0x2b1   : > { %v1268_v63 = vadd.f32 %v1236_v23, %v1204_v45  ;;  %vm1269_vm6 = vcmp.ge.f32.partialorder %v1237_v30, 0.0  ;;  %v1301_v24 = vmul.f32 0.1, %v1237_v30  ;;  %v1136_v47 = vmul.f32 %v7237_v39, %v7146_v62  ;;  %v1217_v23 = vld [vmem:[%s9559_s4 + $0x60] sm:$0xff] }
 0x2b2   : > { %vm1270_vm7 = vcmp.ge.f32.partialorder %v1238_v27, 0.0  ;;  %v1302_v4 = vmul.f32 0.1, %v1238_v27  ;;  %vm1284_vm8 = vcmp.ge.f32.partialorder %v1252_v42, 0.0  ;;  %v1316_v56 = vmul.f32 0.1, %v1252_v42 }
 0x2b3   : > { %vm1300_vm9 = vcmp.ge.f32.partialorder %v1268_v63, 0.0  ;;  %v1332_v40 = vmul.f32 0.1, %v1268_v63  ;;  %v7327_v37 = vsel %vm1269_vm6, %v1237_v30, %v1301_v24  ;;  %vm1283_vm10 = vcmp.ge.f32.partialorder %v1251_v6, 0.0 }
 0x2b4   : > { %v1315_v9 = vmul.f32 0.1, %v1251_v6  ;;  %v7338_v36 = vsel %vm1284_vm8, %v1252_v42, %v1316_v56  ;;  %vm1299_vm11 = vcmp.ge.f32.partialorder %v1267_v54, 0.0  ;;  %v1331_v62 = vmul.f32 0.1, %v1267_v54  ;;  %v1215_v56 = vld [vmem:[%s9559_s4 + $0x50] sm:$0xff] }
 0x2b5   : > { %v7340_v51 = vsel %vm1300_vm9, %v1268_v63, %v1332_v40  ;;  %v1185_v33 = vmul.f32 %v1153_v18, %v1121_v59  ;;  %v1201_v7 = vmul.f32 %v1169_v35, %v1137_v25  ;;  %v7343_v2 = vsel %vm1270_vm7, %v1238_v27, %v1302_v4  ;;  %4887 = vmatpush.msrb.mxu2 %v7338_v36  ;;  %v1216_v59 = vld [vmem:[%s9559_s4 + $0x58] sm:$0xff]  ;;  %v1167_v35 = vld [vmem:[%s9558_s3 + $0xd0] sm:$0xff] }
 0x2b6   : > { %9589 = vst [vmem:[#allocation3_spill] sm:$0xff] %v7340_v51  ;;  %5000 = vmatpush.msra.mxu0 %v7340_v51  ;;  %v7347_v55 = vsel %vm1283_vm10, %v1251_v6, %v1315_v9  ;;  %v7349_v21 = vsel %vm1299_vm11, %v1267_v54, %v1331_v62  ;;  %v1250_v15 = vadd.f32 %v1218_v48, %v1186_v3  ;;  %v1232_v54 = vld [vmem:[%s9559_s4 + $0xd8] sm:$0xff] }
 0x2b7   : > { %9590 = vst [vmem:[#allocation4_spill] sm:$0xff] %v7349_v21  ;;  %v1266_v5 = vadd.f32 %v1234_v29, %v1202_v20  ;;  %v1119_v53 = vmul.f32 %v7237_v39, %v6922_v43  ;;  %v1184_v13 = vmul.f32 %v1152_v49, %v1120_v46  ;;  %4888 = vmatpush.msrb.mxu2 %v7347_v55  ;;  %v1151_v43 = vld [vmem:[%s9558_s3 + $0x50] sm:$0xff]  ;;  %v1150_v20 = vld [vmem:[%s9558_s3 + $0x48] sm:$0xff]  ;;  %v1148_v40 = vld [vmem:[%s9558_s3 + $0x38] sm:$0xff] }
 0x2b8   : > { %5001 = vmatpush.msra.mxu0 %v7349_v21  ;;  %v2005_v57 = vpack.c.bf16 %v7327_v37, %v7327_v37  ;;  %v1118_v46 = vmul.f32 %v7237_v39, %v6906_v44  ;;  %vm1282_vm12 = vcmp.ge.f32.partialorder %v1250_v15, 0.0  ;;  %v1314_v17 = vmul.f32 0.1, %v1250_v15  ;;  %v1166_v49 = vld [vmem:[%s9558_s3 + $0xc8] sm:$0xff] }
 0x2b9   : > { %vm1298_vm13 = vcmp.ge.f32.partialorder %v1266_v5, 0.0  ;;  %v1135_v25 = vmul.f32 %v7237_v39, %v7136_v34  ;;  %v1330_v60 = vmul.f32 0.1, %v1266_v5  ;;  %v2006_v45 = vpack.c.bf16 %v7343_v2, %v7343_v2 }
 0x2ba   : > { %v2075_v3 = vunpack.c.l.b16 %v2005_v57  ;;  %v1200_v44 = vmul.f32 %v1168_v1, %v1136_v47  ;;  %v7381_v30 = vsel %vm1282_vm12, %v1250_v15, %v1314_v17  ;;  %v1249_v27 = vadd.f32 %v1217_v23, %v1185_v33  ;;  %v1149_v47 = vld [vmem:[%s9558_s3 + $0x40] sm:$0xff] }
 0x2bb   : > { %v1265_v18 = vadd.f32 %v1233_v41, %v1201_v7  ;;  %v1183_v42 = vmul.f32 %v1151_v43, %v1119_v53  ;;  %4889 = vmatpush.msrb.mxu2 %v7381_v30  ;;  %v7387_v34 = vsel %vm1298_vm13, %v1266_v5, %v1330_v60  ;;  %v2076_v63 = vunpack.c.l.b16 %v2006_v45  ;;  %v1165_v15 = vld [vmem:[%s9558_s3 + $0xc0] sm:$0xff]  ;;  %v1231_v53 = vld [vmem:[%s9559_s4 + $0xd0] sm:$0xff] }
 0x2bc   : > { %9591 = vst [vmem:[#allocation5_spill] sm:$0xff] %v7387_v34  ;;  %v1248_v6 = vadd.f32 %v1216_v59, %v1184_v13  ;;  %v1133_v24 = vmul.f32 %v7237_v39, %v7111_v8  ;;  %5002 = vmatpush.msra.mxu0 %v7387_v34  ;;  %vm1281_vm14 = vcmp.ge.f32.partialorder %v1249_v27, 0.0  ;;  %v1313_v4 = vmul.f32 0.1, %v1249_v27  ;;  %v1214_v13 = vld [vmem:[%s9559_s4 + $0x48] sm:$0xff]  ;;  %v1213_v45 = vld [vmem:[%s9559_s4 + $0x40] sm:$0xff] }
 0x2bd   : > { %vm1297_vm15 = vcmp.ge.f32.partialorder %v1265_v18, 0.0  ;;  %v1134_v8 = vmul.f32 %v7237_v39, %v7121_v22  ;;  %v1182_v9 = vmul.f32 %v1150_v20, %v1118_v46  ;;  %v2107_v48 = vpack.c.b16 %v2076_v63, %v2075_v3  ;;  %v1163_v63 = vld [vmem:[%s9558_s3 + $0xb0] sm:$0xff] }
 0x2be   : > { %v1329_v29 = vmul.f32 0.1, %v1265_v18  ;;  %v1199_v62 = vmul.f32 %v1167_v35, %v1135_v25  ;;  %vm1280_vm1 = vcmp.ge.f32.partialorder %v1248_v6, 0.0  ;;  %v1312_v33 = vmul.f32 0.1, %v1248_v6  ;;  %v1212_v35 = vld [vmem:[%s9559_s4 + $0x38] sm:$0xff] }
 0x2bf   : > { %v1264_v7 = vadd.f32 %v1232_v54, %v1200_v44  ;;  %5690 = vmatmul.msk.bf16.vlgmr.msrb.gmra.mxu3 %vm882_vm0, %v2107_v48  ;;  %5710 = vmatmul.msk.bf16.vlgmr.msra.gmra.mxu1 %vm882_vm0, %v2107_v48  ;;  %v7415_v22 = vsel %vm1281_vm14, %v1249_v27, %v1313_v4  ;;  %v1247_v1 = vadd.f32 %v1215_v56, %v1183_v42  ;;  %v1147_v42 = vld [vmem:[%s9558_s3 + $0x30] sm:$0xff] }
 0x2c0   : > { %v7418_v5 = vsel %vm1297_vm15, %v1265_v18, %v1329_v29  ;;  %v1180_v57 = vmul.f32 %v1148_v40, %v7298_v32  ;;  %v1181_v23 = vmul.f32 %v1149_v47, %v7302_v26  ;;  %4890 = vmatpush.msrb.mxu2 %v7415_v22  ;;  %v1198_v43 = vmul.f32 %v1166_v49, %v1134_v8  ;;  %v1230_v26 = vld [vmem:[%s9559_s4 + $0xc8] sm:$0xff]  ;;  %v1229_v18 = vld [vmem:[%s9559_s4 + $0xc0] sm:$0xff]  ;;  %v1143_v8 = vld [vmem:[%s9558_s3 + $0x10] sm:$0xff] }
 0x2c1   : > { %9592 = vst [vmem:[#allocation6_spill] sm:$0xff] %v7418_v5  ;;  %5003 = vmatpush.msra.mxu0 %v7418_v5  ;;  %vm1296_vm3 = vcmp.ge.f32.partialorder %v1264_v7, 0.0  ;;  %v1328_v41 = vmul.f32 0.1, %v1264_v7  ;;  %v7431_v46 = vsel %vm1280_vm1, %v1248_v6, %v1312_v33  ;;  %vm1279_vm4 = vcmp.ge.f32.partialorder %v1247_v1, 0.0 }
 0x2c2   : > { %v1311_v17 = vmul.f32 0.1, %v1247_v1  ;;  %v1197_v59 = vmul.f32 %v1165_v15, %v1133_v24  ;;  %4891 = vmatpush.msrb.mxu2 %v7431_v46  ;;  %v1263_v32 = vadd.f32 %v1231_v53, %v1199_v62  ;;  %v1246_v60 = vadd.f32 %v1214_v13, %v1182_v9  ;;  %v1144_v9 = vld [vmem:[%s9558_s3 + $0x18] sm:$0xff]  ;;  %v1162_v15 = vld [vmem:[%s9558_s3 + $0xa8] sm:$0xff] }
 0x2c3   : > { %v7434_v25 = vsel %vm1296_vm3, %v1264_v7, %v1328_v41  ;;  %v7444_v3 = vmul.f32 %v7237_v39, %v6847_v58  ;;  %v1115_v20 = vmul.f32 %v7237_v39, %v6873_v12  ;;  %v1132_v44 = vmul.f32 %v7237_v39, %v7095_v14  ;;  %v1164_v58 = vld [vmem:[%s9558_s3 + $0xb8] sm:$0xff] }
 0x2c4   : > { %9593 = vst [vmem:[#allocation7_spill] sm:$0xff] %v7434_v25  ;;  %5004 = vmatpush.msra.mxu0 %v7434_v25  ;;  %v7451_v27 = vsel %vm1279_vm4, %v1247_v1, %v1311_v17  ;;  %v1131_v12 = vmul.f32 %v7237_v39, %v7083_v31  ;;  %vm1295_vm5 = vcmp.ge.f32.partialorder %v1263_v32, 0.0  ;;  %v1327_v14 = vmul.f32 0.1, %v1263_v32  ;;  %v1228_v7 = vld [vmem:[%s9559_s4 + $0xb8] sm:$0xff]  ;;  %v1207_v17 = vld [vmem:[%s9559_s4 + $0x10] sm:$0xff] }
 0x2c5   : > { %4892 = vmatpush.msrb.mxu2 %v7451_v27  ;;  %vm1278_vm6 = vcmp.ge.f32.partialorder %v1246_v60, 0.0  ;;  %v1114_v6 = vmul.f32 %v7237_v39, %v6860_v0  ;;  %v1310_v54 = vmul.f32 0.1, %v1246_v60  ;;  %v1262_v24 = vadd.f32 %v1230_v26, %v1198_v43 }
 0x2c6   : > { %v1245_v4 = vadd.f32 %v1213_v45, %v1181_v23  ;;  %v1130_v31 = vmul.f32 %v7237_v39, %v7069_v61  ;;  %v7475_v56 = vsel %vm1295_vm5, %v1263_v32, %v1327_v14  ;;  %v1261_v40 = vadd.f32 %v1229_v18, %v1197_v59  ;;  %v1146_v61 = vld [vmem:[%s9558_s3 + $0x28] sm:$0xff]  ;;  %v1227_v23 = vld [vmem:[%s9559_s4 + $0xb0] sm:$0xff]  ;;  %v1208_v59 = vld [vmem:[%s9559_s4 + $0x18] sm:$0xff] }
 0x2c7   : > { %v1244_v47 = vadd.f32 %v1212_v35, %v1180_v57  ;;  %v1196_v48 = vmul.f32 %v1164_v58, %v1132_v44  ;;  %5005 = vmatpush.msra.mxu0 %v7475_v56  ;;  %v7484_v0 = vsel %vm1278_vm6, %v1246_v60, %v1310_v54  ;;  %vm1294_vm7 = vcmp.ge.f32.partialorder %v1262_v24, 0.0  ;;  %v1211_v57 = vld [vmem:[%s9559_s4 + $0x30] sm:$0xff]  ;;  %v1210_v18 = vld [vmem:[%s9559_s4 + $0x28] sm:$0xff]  ;;  %v1145_v35 = vld [vmem:[%s9558_s3 + $0x20] sm:$0xff] }
 0x2c8   : > { %v1326_v29 = vmul.f32 0.1, %v1262_v24  ;;  %v1179_v49 = vmul.f32 %v1147_v42, %v1115_v20  ;;  %v1195_v62 = vmul.f32 %v1163_v63, %v1131_v12  ;;  %4893 = vmatpush.msrb.mxu2 %v7484_v0  ;;  %vm1277_vm8 = vcmp.ge.f32.partialorder %v1245_v4, 0.0  ;;  %v1226_v14 = vld [vmem:[%s9559_s4 + $0xa8] sm:$0xff]  ;;  %v1161_v42 = vld [vmem:[%s9558_s3 + $0xa0] sm:$0xff] }
 0x2c9   : > { %v1309_v33 = vmul.f32 0.1, %v1245_v4  ;;  %v7498_v1 = vmul.f32 %v7237_v39, %v7018_v11  ;;  %vm1293_vm9 = vcmp.ge.f32.partialorder %v1261_v40, 0.0  ;;  %v1325_v13 = vmul.f32 0.1, %v1261_v40 }
 0x2ca   : > { %v7500_v53 = vsel %vm1294_vm7, %v1262_v24, %v1326_v29  ;;  %v1175_v41 = vmul.f32 %v1143_v8, %v7287_v10  ;;  %v1176_v43 = vmul.f32 %v1144_v9, %v7294_v19  ;;  %vm1276_vm10 = vcmp.ge.f32.partialorder %v1244_v47, 0.0  ;;  %v1160_v29 = vld [vmem:[%s9558_s3 + $0x98] sm:$0xff] }
 0x2cb   : > { %5006 = vmatpush.msra.mxu0 %v7500_v53  ;;  %v7511_v11 = vsel %vm1277_vm8, %v1245_v4, %v1309_v33  ;;  %v1178_v32 = vmul.f32 %v1146_v61, %v1114_v6  ;;  %v7520_v60 = vsel %vm1293_vm9, %v1261_v40, %v1325_v13  ;;  %v1308_v10 = vmul.f32 0.1, %v1244_v47  ;;  %v1225_v33 = vld [vmem:[%s9559_s4 + $0xa0] sm:$0xff] }
 0x2cc   : > { %4894 = vmatpush.msrb.mxu2 %v7511_v11  ;;  %v1260_v19 = vadd.f32 %v1228_v7, %v1196_v48  ;;  %v1127_v26 = vmul.f32 %v7237_v39, %v7030_v16  ;;  %v1194_v45 = vmul.f32 %v1162_v15, %v1130_v31  ;;  %v1243_v20 = vadd.f32 %v1211_v57, %v1179_v49  ;;  %v1158_v31 = vld [vmem:[%s9558_s3 + $0x88] sm:$0xff]  ;;  %v1159_v48 = vld [vmem:[%s9558_s3 + $0x90] sm:$0xff] }
 0x2cd   : > { %5007 = vmatpush.msra.mxu0 %v7520_v60  ;;  %v1259_v44 = vadd.f32 %v1227_v23, %v1195_v62  ;;  %v1129_v58 = vmul.f32 %v7237_v39, %v7056_v52  ;;  %v7534_v12 = vsel %vm1276_vm10, %v1244_v47, %v1308_v10  ;;  %v1239_v63 = vadd.f32 %v1207_v17, %v1175_v41  ;;  %v1157_v23 = vld [vmem:[%s9558_s3 + $0x80] sm:$0xff] }
 0x2ce   : > { %vm1292_vm11 = vcmp.ge.f32.partialorder %v1260_v19, 0.0  ;;  %v1324_v16 = vmul.f32 0.1, %v1260_v19  ;;  %v1240_v6 = vadd.f32 %v1208_v59, %v1176_v43  ;;  %4895 = vmatpush.msrb.mxu2 %v7534_v12  ;;  %vm1275_vm12 = vcmp.ge.f32.partialorder %v1243_v20, 0.0 }
 0x2cf   : > { %v1307_v54 = vmul.f32 0.1, %v1243_v20  ;;  %vm1291_vm13 = vcmp.ge.f32.partialorder %v1259_v44, 0.0  ;;  %v1323_v24 = vmul.f32 0.1, %v1259_v44  ;;  %v1242_v4 = vadd.f32 %v1210_v18, %v1178_v32 }
 0x2d0   : > { %v7543_v52 = vsel %vm1292_vm11, %v1260_v19, %v1324_v16  ;;  %v1128_v40 = vmul.f32 %v7237_v39, %v7043_v50  ;;  %v1177_v47 = vmul.f32 %v1145_v35, %v7444_v3  ;;  %v1258_v9 = vadd.f32 %v1226_v14, %v1194_v45  ;;  %v1209_v3 = vld [vmem:[%s9559_s4 + $0x20] sm:$0xff]  ;;  %v1224_v19 = vld [vmem:[%s9559_s4 + $0x98] sm:$0xff] }
 0x2d1   : > { %5008 = vmatpush.msra.mxu0 %v7543_v52  ;;  %v7552_v8 = vsel %vm1275_vm12, %v1243_v20, %v1307_v54  ;;  %v1193_v61 = vmul.f32 %v1161_v42, %v1129_v58  ;;  %v7561_v49 = vsel %vm1291_vm13, %v1259_v44, %v1323_v24  ;;  %vm1274_vm14 = vcmp.ge.f32.partialorder %v1242_v4, 0.0  ;;  %v1222_v20 = vld [vmem:[%s9559_s4 + $0x88] sm:$0xff] }
 0x2d2   : > { %4896 = vmatpush.msrb.mxu2 %v7552_v8  ;;  %v1306_v50 = vmul.f32 0.1, %v1242_v4  ;;  %vm1290_vm15 = vcmp.ge.f32.partialorder %v1258_v9, 0.0  ;;  %v1322_v62 = vmul.f32 0.1, %v1258_v9  ;;  %vm1271_vm1 = vcmp.ge.f32.partialorder %v1239_v63, 0.0 }
 0x2d3   : > { %5009 = vmatpush.msra.mxu0 %v7561_v49  ;;  %vm1272_vm3 = vcmp.ge.f32.partialorder %v1240_v6, 0.0  ;;  %v1125_v7 = vmul.f32 %v7237_v39, %v7002_v38  ;;  %v1303_v13 = vmul.f32 0.1, %v1239_v63  ;;  %v1304_v57 = vmul.f32 0.1, %v1240_v6 }
 0x2d4   : > { %v7572_v15 = vsel %vm1274_vm14, %v1242_v4, %v1306_v50  ;;  %v1191_v41 = vmul.f32 %v1159_v48, %v1127_v26  ;;  %v1192_v43 = vmul.f32 %v1160_v29, %v1128_v40  ;;  %v7578_v17 = vsel %vm1290_vm15, %v1258_v9, %v1322_v62  ;;  %v1223_v26 = vld [vmem:[%s9559_s4 + $0x90] sm:$0xff] }
 0x2d5   : > { %4897 = vmatpush.msrb.mxu2 %v7572_v15  ;;  %v1241_v59 = vadd.f32 %v1209_v3, %v1177_v47  ;;  %v1190_v32 = vmul.f32 %v1158_v31, %v7498_v1  ;;  %5010 = vmatpush.msra.mxu0 %v7578_v17  ;;  %v7582_v38 = vsel %vm1271_vm1, %v1239_v63, %v1303_v13  ;;  %v1221_v63 = vld [vmem:[%s9559_s4 + $0x80] sm:$0xff]  ;;  %vm2612_vm10 = vcmask 64512  }
 0x2d6   : > { %v7584_v39 = vsel %vm1272_vm3, %v1240_v6, %v1304_v57  ;;  %v1257_v10 = vadd.f32 %v1225_v33, %v1193_v61  ;;  %v2007_v45 = vpack.c.bf16 %v7582_v38, %v7582_v38  ;;  %v1189_v44 = vmul.f32 %v1157_v23, %v1125_v7 }
 0x2d7   : > { %v2008_v1 = vpack.c.bf16 %v7584_v39, %v7584_v39  ;;  %vm1273_vm4 = vcmp.ge.f32.partialorder %v1241_v59, 0.0  ;;  %v1305_v18 = vmul.f32 0.1, %v1241_v59  ;;  %v1256_v14 = vadd.f32 %v1224_v19, %v1192_v43 }
 0x2d8   : > { %vm1289_vm5 = vcmp.ge.f32.partialorder %v1257_v10, 0.0  ;;  %v1321_v35 = vmul.f32 0.1, %v1257_v10  ;;  %v2077_v58 = vunpack.c.l.b16 %v2007_v45  ;;  %v1255_v42 = vadd.f32 %v1223_v26, %v1191_v41 }
 0x2d9   : > { %v2078_v16 = vunpack.c.l.b16 %v2008_v1  ;;  %v7602_v6 = vsel %vm1273_vm4, %v1241_v59, %v1305_v18  ;;  %v1254_v24 = vadd.f32 %v1222_v20, %v1190_v32  ;;  %vm1288_vm6 = vcmp.ge.f32.partialorder %v1256_v14, 0.0 }
 0x2da   : > { %v7604_v54 = vsel %vm1289_vm5, %v1257_v10, %v1321_v35  ;;  %4898 = vmatpush.msrb.mxu2 %v7602_v6  ;;  %v1320_v31 = vmul.f32 0.1, %v1256_v14  ;;  %v1319_v40 = vmul.f32 0.1, %v1255_v42  ;;  %v1253_v47 = vadd.f32 %v1221_v63, %v1189_v44 }
 0x2db   : > { %v2108_v4 = vpack.c.b16 %v2078_v16, %v2077_v58  ;;  %5011 = vmatpush.msra.mxu0 %v7604_v54  ;;  %vm1287_vm7 = vcmp.ge.f32.partialorder %v1255_v42, 0.0  ;;  %v1318_v48 = vmul.f32 0.1, %v1254_v24  ;;  %vm1286_vm8 = vcmp.ge.f32.partialorder %v1254_v24, 0.0 }
 0x2dc   : > { %4899 = vmatpush.msrb.mxu2 %v7584_v39  ;;  %v7611_v9 = vsel %vm1288_vm6, %v1256_v14, %v1320_v31  ;;  %v7615_v29 = vsel %vm1287_vm7, %v1255_v42, %v1319_v40  ;;  %v1317_v61 = vmul.f32 0.1, %v1253_v47  ;;  %vm1285_vm9 = vcmp.ge.f32.partialorder %v1253_v47, 0.0 }
 0x2dd   : > { %5691 = vmatmul.msk.bf16.gmra.mxu3 %vm882_vm0, %v2108_v4  ;;  %5711 = vmatmul.msk.bf16.gmra.mxu1 %vm882_vm0, %v2108_v4  ;;  %v7619_v50 = vsel %vm1286_vm8, %v1254_v24, %v1318_v48  ;;  %v2010_v3 = vpack.c.bf16 %v7572_v15, %v7572_v15  ;;  %v2009_v62 = vpack.c.bf16 %v7602_v6, %v7602_v6 }
 0x2de   : > { %5012 = vmatpush.msra.mxu0 %v7611_v9  ;;  %4900 = vmatpush.msrb.mxu2 %v7582_v38  ;;  %v7627_v33 = vsel %vm1285_vm9, %v1253_v47, %v1317_v61  ;;  %v2012_v23 = vpack.c.bf16 %v7534_v12, %v7534_v12  ;;  %v2011_v41 = vpack.c.bf16 %v7552_v8, %v7552_v8  ;;  %v7665_v61 = vld [vmem:[%s9568_s13] ss:$0 sm:$0xff] }
 0x2df   : > { %v2080_v7 = vunpack.c.l.b16 %v2010_v3  ;;  %v2079_v13 = vunpack.c.l.b16 %v2009_v62  ;;  %v2014_v10 = vpack.c.bf16 %v7484_v0, %v7484_v0  ;;  %v2013_v19 = vpack.c.bf16 %v7511_v11, %v7511_v11 }
 0x2e0   : > { %5013 = vmatpush.msra.mxu0 %v7615_v29  ;;  %4901 = vmatpush.msrb.mxu2 %v7343_v2  ;;  %v2082_v43 = vunpack.c.l.b16 %v2012_v23  ;;  %v2081_v59 = vunpack.c.l.b16 %v2011_v41  ;;  %v2016_v20 = vpack.c.bf16 %v7431_v46, %v7431_v46  ;;  %v2015_v44 = vpack.c.bf16 %v7451_v27, %v7451_v27 }
 0x2e1   : > { %v2109_v57 = vpack.c.b16 %v2080_v7, %v2079_v13  ;;  %v2084_v26 = vunpack.c.l.b16 %v2014_v10  ;;  %v2083_v45 = vunpack.c.l.b16 %v2013_v19  ;;  %v2018_v16 = vpack.c.bf16 %v7381_v30, %v7381_v30 }
 0x2e2   : > { %5014 = vmatpush.msra.mxu0 %v7619_v50  ;;  %4902 = vmatpush.msrb.mxu2 %v7327_v37  ;;  %v2110_v32 = vpack.c.b16 %v2082_v43, %v2081_v59  ;;  %v2086_v18 = vunpack.c.l.b16 %v2016_v20  ;;  %v2085_v35 = vunpack.c.l.b16 %v2015_v44  ;;  %v2017_v14 = vpack.c.bf16 %v7415_v22, %v7415_v22 }
 0x2e3   : > { %v2111_v1 = vpack.c.b16 %v2084_v26, %v2083_v45  ;;  %v2088_v42 = vunpack.c.l.b16 %v2018_v16  ;;  %v2020_v4 = vpack.c.bf16 %v7338_v36, %v7338_v36  ;;  %v2019_v31 = vpack.c.bf16 %v7347_v55, %v7347_v55 }
 0x2e4   : > { %5015 = vmatpush.msra.mxu0 %v7627_v33  ;;  %v2112_v58 = vpack.c.b16 %v2086_v18, %v2085_v35  ;;  %v2087_v63 = vunpack.c.l.b16 %v2017_v14  ;;  %v2022_v3 = vpack.c.bf16 %v7619_v50, %v7619_v50  ;;  %v2021_v62 = vpack.c.bf16 %v7627_v33, %v7627_v33 }
 0x2e5   : > { %v2090_v40 = vunpack.c.l.b16 %v2020_v4  ;;  %v2089_v47 = vunpack.c.l.b16 %v2019_v31  ;;  %v2024_v45 = vpack.c.bf16 %v7611_v9, %v7611_v9 }
 0x2e6   : > { %v2113_v24 = vpack.c.b16 %v2088_v42, %v2087_v63  ;;  %v2092_v41 = vunpack.c.l.b16 %v2022_v3  ;;  %v2091_v43 = vunpack.c.l.b16 %v2021_v62  ;;  %v2026_v42 = vpack.c.bf16 %v7578_v17, %v7578_v17 }
 0x2e7   : > { %v2114_v48 = vpack.c.b16 %v2090_v40, %v2089_v47  ;;  %v2094_v20 = vunpack.c.l.b16 %v2024_v45  ;;  %v2025_v63 = vpack.c.bf16 %v7604_v54, %v7604_v54 }
 0x2e8   : > { %v2115_v59 = vpack.c.b16 %v2092_v41, %v2091_v43  ;;  %v2096_v4 = vunpack.c.l.b16 %v2026_v42  ;;  %v2028_v41 = vpack.c.bf16 %v7543_v52, %v7543_v52  ;;  %v2027_v43 = vpack.c.bf16 %v7561_v49, %v7561_v49 }
 0x2e9   : > { %v2095_v31 = vunpack.c.l.b16 %v2025_v63  ;;  %v2030_v42 = vpack.c.bf16 %v7500_v53, %v7500_v53  ;;  %v2029_v63 = vpack.c.bf16 %v7520_v60, %v7520_v60 }
 0x2eb   : > { %v2117_v62 = vpack.c.b16 %v2096_v4, %v2095_v31  ;;  %v2100_v4 = vunpack.c.l.b16 %v2030_v42  ;;  %v2099_v31 = vunpack.c.l.b16 %v2029_v63 }
 0x2ed   : > { %5692 = vmatmul.msk.bf16.gmra.mxu3 %vm882_vm0, %v2109_v57  ;;  %5712 = vmatmul.msk.bf16.gmra.mxu1 %vm882_vm0, %v2109_v57 }
 0x2fd   : > { %5693 = vmatmul.msk.bf16.gmra.mxu3 %vm882_vm0, %v2110_v32  ;;  %5713 = vmatmul.msk.bf16.gmra.mxu1 %vm882_vm0, %v2110_v32 }
 0x30d   : > { %5694 = vmatmul.msk.bf16.gmra.mxu3 %vm882_vm0, %v2111_v1  ;;  %5714 = vmatmul.msk.bf16.gmra.mxu1 %vm882_vm0, %v2111_v1  ;;  %v2023_v1 = vpack.c.bf16 %v7615_v29, %v7615_v29 }
 0x30f   : > { %v2093_v44 = vunpack.c.l.b16 %v2023_v1 }
 0x311   : > { %v2116_v35 = vpack.c.b16 %v2094_v20, %v2093_v44 }
 0x31d   : > { %5695 = vmatmul.msk.bf16.gmra.mxu3 %vm882_vm0, %v2112_v58  ;;  %5715 = vmatmul.msk.bf16.gmra.mxu1 %vm882_vm0, %v2112_v58 }
 0x32d   : > { %5696 = vmatmul.msk.bf16.gmra.mxu3 %vm882_vm0, %v2113_v24  ;;  %5716 = vmatmul.msk.bf16.gmra.mxu1 %vm882_vm0, %v2113_v24 }
 0x33c   : > { %v7672_v57 = vpop.f32.mrf.mxu1 }
 0x33d   : > { %5697 = vmatmul.msk.bf16.gmra.mxu3 %vm882_vm0, %v2114_v48  ;;  %5717 = vmatmul.msk.bf16.gmra.mxu1 %vm882_vm0, %v2114_v48 }
 0x342   : > { %v2186_v7 = vpop.f32.mrf.mxu3 }
 0x343   : > { %v2187_v13 = vadd.f32 %v7665_v61, %v2186_v7 }
 0x344   : > { %v7681_v26 = vpop.f32.mrf.mxu1 }
 0x345   : > { %v2367_v23 = vmul.f32 0.5, %v2187_v13 }
 0x347   : > { %5727 = vmatmul.msk.f32.vlgmr.msra.gmra.mxu2 %vm2399_vm2, %v2367_v23 }
 0x348   : > { %6006 = vmatpush.msra.mxu2 %v7340_v51 }
 0x34a   : > { %6007 = vmatpush.msra.mxu2 %v7349_v21  ;;  %v2188_v32 = vpop.f32.mrf.mxu3 }
 0x34b   : > { %v2189_v10 = vadd.f32 %v7665_v61, %v2188_v32  ;;  %v2098_v32 = vunpack.c.l.b16 %v2028_v41 }
 0x34c   : > { %6008 = vmatpush.msra.mxu2 %v7387_v34 }
 0x34d   : > { %5698 = vmatmul.msk.bf16.gmra.mxu3 %vm882_vm0, %v2115_v59  ;;  %5718 = vmatmul.msk.bf16.gmra.mxu1 %vm882_vm0, %v2115_v59  ;;  %v2368_v19 = vmul.f32 0.5, %v2189_v10  ;;  %v2097_v10 = vunpack.c.l.b16 %v2027_v43 }
 0x34e   : > { %6009 = vmatpush.msra.mxu2 %v7418_v5 }
 0x34f   : > { %5728 = vmatmul.msk.f32.gmra.mxu2 %vm2399_vm2, %v2368_v19  ;;  %v2118_v44 = vpack.c.b16 %v2098_v32, %v2097_v10  ;;  %v2031_v32 = vpack.c.bf16 %v7475_v56, %v7475_v56 }
 0x350   : > { %6010 = vmatpush.msra.mxu2 %v7434_v25 }
 0x352   : > { %6011 = vmatpush.msra.mxu2 %v7475_v56 }
 0x354   : > { %6012 = vmatpush.msra.mxu2 %v7500_v53 }
 0x356   : > { %6013 = vmatpush.msra.mxu2 %v7520_v60 }
 0x358   : > { %6014 = vmatpush.msra.mxu2 %v7543_v52 }
 0x35a   : > { %v7693_v18 = vpop.f32.mrf.mxu1  ;;  %6015 = vmatpush.msra.mxu2 %v7561_v49 }
 0x35c   : > { %6016 = vmatpush.msra.mxu2 %v7578_v17 }
 0x35d   : > { %5699 = vmatmul.msk.bf16.gmra.mxu3 %vm882_vm0, %v2116_v35  ;;  %5719 = vmatmul.msk.bf16.gmra.mxu1 %vm882_vm0, %v2116_v35 }
 0x35e   : > { %6017 = vmatpush.msra.mxu2 %v7604_v54 }
 0x360   : > { %v2191_v58 = vpop.f32.mrf.mxu3  ;;  %6018 = vmatpush.msra.mxu2 %v7611_v9 }
 0x361   : > { %v2192_v16 = vadd.f32 %v7665_v61, %v2191_v58 }
 0x362   : > { %v7702_v14 = vpop.f32.mrf.mxu1  ;;  %6019 = vmatpush.msra.mxu2 %v7615_v29 }
 0x363   : > { %v2369_v24 = vmul.f32 0.5, %v2192_v16 }
 0x364   : > { %6020 = vmatpush.msra.mxu2 %v7619_v50 }
 0x365   : > { %5729 = vmatmul.msk.f32.gmra.mxu2 %vm2399_vm2, %v2369_v24 }
 0x366   : > { %6021 = vmatpush.msra.mxu2 %v7627_v33 }
 0x368   : > { %v2193_v40 = vpop.f32.mrf.mxu3 }
 0x369   : > { %v2194_v47 = vadd.f32 %v7665_v61, %v2193_v40 }
 0x36a   : > { %v7714_v48 = vpop.f32.mrf.mxu1 }
 0x36b   : > { %v2370_v3 = vmul.f32 0.5, %v2194_v47 }
 0x36d   : > { %5700 = vmatmul.msk.bf16.gmra.mxu3 %vm882_vm0, %v2117_v62  ;;  %5720 = vmatmul.msk.bf16.gmra.mxu1 %vm882_vm0, %v2117_v62 }
 0x36e   : > { %5730 = vmatmul.msk.f32.gmra.mxu2 %vm2399_vm2, %v2370_v3 }
 0x370   : > { %v2196_v7 = vpop.f32.mrf.mxu3 }
 0x371   : > { %v2197_v13 = vadd.f32 %v7665_v61, %v2196_v7  ;;  %v2119_v7 = vpack.c.b16 %v2100_v4, %v2099_v31  ;;  %v2034_v31 = vpack.c.bf16 %v7387_v34, %v7387_v34 }
 0x372   : > { %v7720_v23 = vpop.f32.mrf.mxu1 }
 0x373   : > { %v2371_v59 = vmul.f32 0.5, %v2197_v13 }
 0x376   : > { %5731 = vmatmul.msk.f32.gmra.mxu2 %vm2399_vm2, %v2371_v59  ;;  %v2032_v59 = vpack.c.bf16 %v7434_v25, %v7434_v25 }
 0x378   : > { %v2198_v19 = vpop.f32.mrf.mxu3 }
 0x379   : > { %v2199_v45 = vadd.f32 %v7665_v61, %v2198_v19  ;;  %v2102_v19 = vunpack.c.l.b16 %v2032_v59 }
 0x37a   : > { %v7728_v1 = vpop.f32.mrf.mxu1 }
 0x37b   : > { %v2372_v20 = vmul.f32 0.5, %v2199_v45  ;;  %v2101_v45 = vunpack.c.l.b16 %v2031_v32 }
 0x37d   : > { %5701 = vmatmul.msk.bf16.gmra.mxu3 %vm882_vm0, %v2118_v44  ;;  %5721 = vmatmul.msk.bf16.gmra.mxu1 %vm882_vm0, %v2118_v44  ;;  %v2120_v42 = vpack.c.b16 %v2102_v19, %v2101_v45 }
 0x37e   : > { %5732 = vmatmul.msk.f32.gmra.mxu2 %vm2399_vm2, %v2372_v20 }
 0x380   : > { %v2201_v35 = vpop.f32.mrf.mxu3 }
 0x381   : > { %v2202_v58 = vadd.f32 %v7665_v61, %v2201_v35 }
 0x382   : > { %v7734_v16 = vpop.f32.mrf.mxu1 }
 0x383   : > { %v2373_v24 = vmul.f32 0.5, %v2202_v58 }
 0x386   : > { %5733 = vmatmul.msk.f32.gmra.mxu2 %vm2399_vm2, %v2373_v24 }
 0x388   : > { %v2203_v40 = vpop.f32.mrf.mxu3 }
 0x389   : > { %v2204_v47 = vadd.f32 %v7665_v61, %v2203_v40  ;;  %v2033_v40 = vpack.c.bf16 %v7418_v5, %v7418_v5 }
 0x38a   : > { %v7742_v3 = vpop.f32.mrf.mxu1 }
 0x38b   : > { %v2374_v62 = vmul.f32 0.5, %v2204_v47 }
 0x38d   : > { %5702 = vmatmul.msk.bf16.gmra.mxu3 %vm882_vm0, %v2119_v7  ;;  %5722 = vmatmul.msk.bf16.gmra.mxu1 %vm882_vm0, %v2119_v7  ;;  %v2103_v7 = vunpack.c.l.b16 %v2033_v40 }
 0x38e   : > { %5734 = vmatmul.msk.f32.gmra.mxu2 %vm2399_vm2, %v2374_v62  ;;  %v2104_v62 = vunpack.c.l.b16 %v2034_v31 }
 0x390   : > { %v2206_v13 = vpop.f32.mrf.mxu3 }
 0x391   : > { %v2207_v41 = vadd.f32 %v7665_v61, %v2206_v13 }
 0x392   : > { %v7748_v43 = vpop.f32.mrf.mxu1 }
 0x393   : > { %v2375_v10 = vmul.f32 0.5, %v2207_v41 }
 0x396   : > { %5735 = vmatmul.msk.f32.gmra.mxu2 %vm2399_vm2, %v2375_v10  ;;  %v2121_v10 = vpack.c.b16 %v2104_v62, %v2103_v7 }
 0x398   : > { %v2208_v20 = vpop.f32.mrf.mxu3 }
 0x399   : > { %v2209_v44 = vadd.f32 %v7665_v61, %v2208_v20 }
 0x39a   : > { %v7756_v35 = vpop.f32.mrf.mxu1 }
 0x39b   : > { %v2376_v58 = vmul.f32 0.5, %v2209_v44  ;;  %v2036_v44 = vpack.c.bf16 %v7340_v51, %v7340_v51 }
 0x39d   : > { %5703 = vmatmul.msk.bf16.gmra.mxu3 %vm882_vm0, %v2120_v42  ;;  %5723 = vmatmul.msk.bf16.gmra.mxu1 %vm882_vm0, %v2120_v42 }
 0x39e   : > { %5736 = vmatmul.msk.f32.gmra.mxu2 %vm2399_vm2, %v2376_v58  ;;  %v2035_v58 = vpack.c.bf16 %v7349_v21, %v7349_v21 }
 0x3a0   : > { %v2211_v63 = vpop.f32.mrf.mxu3 }
 0x3a1   : > { %v2212_v24 = vadd.f32 %v7665_v61, %v2211_v63  ;;  %v2106_v63 = vunpack.c.l.b16 %v2036_v44 }
 0x3a2   : > { %v2314_v4 = vpop.f32.mrf.mxu1 }
 0x3a3   : > { %v2377_v47 = vmul.f32 0.5, %v2212_v24  ;;  %v2105_v24 = vunpack.c.l.b16 %v2035_v58 }
 0x3a5   : > { %v2122_v7 = vpack.c.b16 %v2106_v63, %v2105_v24 }
 0x3a6   : > { %5737 = vmatmul.msk.f32.gmra.mxu2 %vm2399_vm2, %v2377_v47 }
 0x3a8   : > { %v2213_v13 = vpop.f32.mrf.mxu3 }
 0x3a9   : > { %v2214_v41 = vadd.f32 %v7665_v61, %v2213_v13 }
 0x3aa   : > { %v2317_v59 = vpop.f32.mrf.mxu1 }
 0x3ab   : > { %v2378_v32 = vmul.f32 0.5, %v2214_v41  ;;  %v7784_v41 = vld [vmem:[%s9570_s15] ss:$0 sm:$0xff] }
 0x3ad   : > { %5704 = vmatmul.msk.bf16.gmra.mxu3 %vm882_vm0, %v2121_v10  ;;  %5724 = vmatmul.msk.bf16.gmra.mxu1 %vm882_vm0, %v2121_v10 }
 0x3ae   : > { %5738 = vmatmul.msk.f32.gmra.mxu2 %vm2399_vm2, %v2378_v32 }
 0x3b0   : > { %v2216_v19 = vpop.f32.mrf.mxu3 }
 0x3b1   : > { %v2217_v45 = vadd.f32 %v7665_v61, %v2216_v19 }
 0x3b2   : > { %v2319_v20 = vpop.f32.mrf.mxu1 }
 0x3b3   : > { %v2379_v42 = vmul.f32 0.5, %v2217_v45  ;;  %v2320_v24 = vadd.f32 %v7784_v41, %v2319_v20  ;;  %v2315_v20 = vadd.f32 %v7784_v41, %v2314_v4 }
 0x3b6   : > { %5739 = vmatmul.msk.f32.gmra.mxu2 %vm2399_vm2, %v2379_v42 }
 0x3b8   : > { %v2218_v31 = vpop.f32.mrf.mxu3 }
 0x3b9   : > { %v2219_v40 = vadd.f32 %v7665_v61, %v2218_v31 }
 0x3ba   : > { %v2322_v47 = vpop.f32.mrf.mxu1 }
 0x3bb   : > { %v2380_v62 = vmul.f32 0.5, %v2219_v40  ;;  %v2323_v44 = vadd.f32 %v7784_v41, %v2322_v47  ;;  %v2318_v47 = vadd.f32 %v7784_v41, %v2317_v59  ;;  %v2313_v59 = vadd.f32 %v7784_v41, %v7756_v35 }
 0x3bd   : > { %5705 = vmatmul.msk.bf16.gmra.mxu3 %vm882_vm0, %v2122_v7  ;;  %5725 = vmatmul.msk.bf16.gmra.mxu1 %vm882_vm0, %v2122_v7 }
 0x3be   : > { %5740 = vmatmul.msk.f32.gmra.mxu2 %vm2399_vm2, %v2380_v62 }
 0x3c0   : > { %v2221_v13 = vpop.f32.mrf.mxu3 }
 0x3c1   : > { %v2222_v32 = vadd.f32 %v7665_v61, %v2221_v13 }
 0x3c2   : > { %v2324_v10 = vpop.f32.mrf.mxu1 }
 0x3c3   : > { %v2381_v19 = vmul.f32 0.5, %v2222_v32  ;;  %v2325_v45 = vadd.f32 %v7784_v41, %v2324_v10 }
 0x3c5   : > { %5791 = vmatpush.xpose.msk.msra.mxu3 %vm882_vm0, %v2325_v45 }
 0x3c6   : > { %5741 = vmatmul.msk.f32.gmra.mxu2 %vm2399_vm2, %v2381_v19 }
 0x3c8   : > { %v2223_v58 = vpop.f32.mrf.mxu3 }
 0x3c9   : > { %v2224_v42 = vadd.f32 %v7665_v61, %v2223_v58  ;;  %5792 = vmatpush.xpose.msk.msra.mxu3 %vm882_vm0, %v2323_v44 }
 0x3ca   : > { %v7793_v63 = vpop.f32.mrf.mxu1  ;;  %v7796_v40 = vpop.f32.mrf.mxu2 }
 0x3cb   : > { %v2382_v31 = vmul.f32 0.5, %v2224_v42  ;;  %v2613_v62 = vsel %vm2612_vm10, %v7796_v40, -inf  ;;  %v2310_v42 = vadd.f32 %v7784_v41, %v7748_v43  ;;  %v2303_v43 = vadd.f32 %v7784_v41, %v7728_v1 }
 0x3cc   : > { %2614 = vmax.xlane.f32.xlu1 %v2613_v62  ;;  %v2298_v1 = vadd.f32 %v7784_v41, %v7714_v48  ;;  %v2293_v48 = vadd.f32 %v7784_v41, %v7693_v18  ;;  %v2288_v18 = vadd.f32 %v7784_v41, %v7672_v57 }
 0x3cd   : > { %5793 = vmatpush.xpose.msk.msra.mxu3 %vm882_vm0, %v2320_v24 }
 0x3ce   : > { %5742 = vmatmul.msk.f32.gmra.mxu2 %vm2399_vm2, %v2382_v31  ;;  %v2308_v31 = vadd.f32 %v7784_v41, %v7742_v3 }
 0x3d0   : > { %v2226_v7 = vpop.f32.mrf.mxu3 }
 0x3d1   : > { %v2227_v13 = vadd.f32 %v7665_v61, %v2226_v7  ;;  %5794 = vmatpush.xpose.msk.msra.mxu3 %vm882_vm0, %v2318_v47  ;;  %v2305_v7 = vadd.f32 %v7784_v41, %v7734_v16  ;;  %v2300_v16 = vadd.f32 %v7784_v41, %v7720_v23 }
 0x3d2   : > { %v7805_v32 = vpop.f32.mrf.mxu1  ;;  %v7808_v19 = vpop.f32.mrf.mxu2 }
 0x3d3   : > { %v2383_v10 = vmul.f32 0.5, %v2227_v13  ;;  %v2616_v45 = vsel %vm2612_vm10, %v7808_v19, -inf }
 0x3d4   : > { %2617 = vmax.xlane.f32.xlu1 %v2616_v45 }
 0x3d5   : > { %5795 = vmatpush.xpose.msk.msra.mxu3 %vm882_vm0, %v2315_v20 }
 0x3d6   : > { %5743 = vmatmul.msk.f32.gmra.mxu2 %vm2399_vm2, %v2383_v10 }
 0x3d8   : > { %v2228_v44 = vpop.f32.mrf.mxu3 }
 0x3d9   : > { %v2229_v58 = vadd.f32 %v7665_v61, %v2228_v44  ;;  %5796 = vmatpush.xpose.msk.msra.mxu3 %vm882_vm0, %v2313_v59 }
 0x3da   : > { %v7818_v4 = vpop.f32.mrf.mxu1 }
 0x3db   : > { %v2384_v24 = vmul.f32 0.5, %v2229_v58 }
 0x3dd   : > { %5797 = vmatpush.xpose.msk.msra.mxu3 %vm882_vm0, %v2310_v42 }
 0x3de   : > { %5744 = vmatmul.msk.f32.gmra.mxu2 %vm2399_vm2, %v2384_v24 }
 0x3e0   : > { %v2231_v62 = vpop.f32.mrf.mxu3 }
 0x3e1   : > { %v2232_v35 = vadd.f32 %v7665_v61, %v2231_v62  ;;  %5798 = vmatpush.xpose.msk.msra.mxu3 %vm882_vm0, %v2308_v31  ;;  %v2295_v62 = vadd.f32 %v7784_v41, %v7702_v14 }
 0x3e2   : > { %v7828_v47 = vpop.f32.mrf.mxu1 }
 0x3e3   : > { %v2385_v13 = vmul.f32 0.5, %v2232_v35 }
 0x3e5   : > { %5799 = vmatpush.xpose.msk.msra.mxu3 %vm882_vm0, %v2305_v7 }
 0x3e6   : > { %5745 = vmatmul.msk.f32.gmra.mxu2 %vm2399_vm2, %v2385_v13 }
 0x3e8   : > { %v2233_v20 = vpop.f32.mrf.mxu3  ;;  %v7836_v3 = vpop.f32.mrf.mxu2 }
 0x3e9   : > { %v2234_v10 = vadd.f32 %v7665_v61, %v2233_v20  ;;  %5800 = vmatpush.xpose.msk.msra.mxu3 %vm882_vm0, %v2303_v43  ;;  %v2619_v45 = vsel %vm2612_vm10, %v7836_v3, -inf }
 0x3ea   : > { %v7842_v59 = vpop.f32.mrf.mxu1  ;;  %2620 = vmax.xlane.f32.xlu2 %v2619_v45 }
 0x3eb   : > { %v2386_v44 = vmul.f32 0.5, %v2234_v10  ;;  %v2290_v10 = vadd.f32 %v7784_v41, %v7681_v26 }
 0x3ed   : > { %5801 = vmatpush.xpose.msk.msra.mxu3 %vm882_vm0, %v2300_v16 }
 0x3ee   : > { %5746 = vmatmul.msk.f32.gmra.mxu2 %vm2399_vm2, %v2386_v44 }
 0x3f0   : > { %v2236_v58 = vpop.f32.mrf.mxu3 }
 0x3f1   : > { %v2237_v42 = vadd.f32 %v7665_v61, %v2236_v58  ;;  %v7851_v24 = vpop.f32.mrf.mxu2  ;;  %5802 = vmatpush.xpose.msk.msra.mxu3 %vm882_vm0, %v2298_v1 }
 0x3f2   : > { %v7854_v31 = vpop.f32.mrf.mxu1  ;;  %v2622_v23 = vsel %vm2612_vm10, %v7851_v24, -inf }
 0x3f3   : > { %v2387_v35 = vmul.f32 0.5, %v2237_v42  ;;  %2623 = vmax.xlane.f32.xlu2 %v2622_v23 }
 0x3f5   : > { %5803 = vmatpush.xpose.msk.msra.mxu3 %vm882_vm0, %v2295_v62 }
 0x3f6   : > { %5747 = vmatmul.msk.f32.gmra.mxu2 %vm2399_vm2, %v2387_v35 }
 0x3f8   : > { %v2238_v7 = vpop.f32.mrf.mxu3 }
 0x3f9   : > { %v2239_v13 = vadd.f32 %v7665_v61, %v2238_v7  ;;  %v7865_v43 = vpop.f32.mrf.mxu2  ;;  %5804 = vmatpush.xpose.msk.msra.mxu3 %vm882_vm0, %v2293_v48 }
 0x3fa   : > { %v7868_v20 = vpop.f32.mrf.mxu1  ;;  %v2625_v14 = vsel %vm2612_vm10, %v7865_v43, -inf }
 0x3fb   : > { %v2388_v45 = vmul.f32 0.5, %v2239_v13  ;;  %2626 = vmax.xlane.f32.xlu0 %v2625_v14 }
 0x3fd   : > { %5805 = vmatpush.xpose.msk.msra.mxu3 %vm882_vm0, %v2290_v10 }
 0x3fe   : > { %5748 = vmatmul.msk.f32.gmra.mxu2 %vm2399_vm2, %v2388_v45 }
 0x400   : > { %v2241_v16 = vpop.f32.mrf.mxu3 }
 0x401   : > { %v2242_v44 = vadd.f32 %v7665_v61, %v2241_v16  ;;  %v7879_v1 = vpop.f32.mrf.mxu2  ;;  %5806 = vmatpush.xpose.msk.msra.mxu3 %vm882_vm0, %v2288_v18 }
 0x402   : > { %v7882_v58 = vpop.f32.mrf.mxu1  ;;  %v2628_v26 = vsel %vm2612_vm10, %v7879_v1, -inf }
 0x403   : > { %v2389_v42 = vmul.f32 0.5, %v2242_v44  ;;  %2629 = vmax.xlane.f32.xlu1 %v2628_v26 }
 0x406   : > { %5749 = vmatmul.msk.f32.gmra.mxu2 %vm2399_vm2, %v2389_v42 }
 0x408   : > { %v2243_v23 = vpop.f32.mrf.mxu3 }
 0x409   : > { %v2244_v62 = vadd.f32 %v7665_v61, %v2243_v23  ;;  %v7888_v57 = vpop.f32.mrf.mxu2 }
 0x40a   : > { %v7890_v35 = vpop.f32.mrf.mxu1  ;;  %v2631_v48 = vsel %vm2612_vm10, %v7888_v57, -inf }
 0x40b   : > { %v2390_v7 = vmul.f32 0.5, %v2244_v62  ;;  %2632 = vmax.xlane.f32.xlu2 %v2631_v48 }
 0x40e   : > { %5750 = vmatmul.msk.f32.gmra.mxu2 %vm2399_vm2, %v2390_v7 }
 0x410   : > { %v2246_v13 = vpop.f32.mrf.mxu3 }
 0x411   : > { %v2247_v14 = vadd.f32 %v7665_v61, %v2246_v13  ;;  %v7896_v10 = vpop.f32.mrf.mxu2 }
 0x412   : > { %v7898_v45 = vpop.f32.mrf.mxu1  ;;  %v2634_v18 = vsel %vm2612_vm10, %v7896_v10, -inf }
 0x413   : > { %v2391_v16 = vmul.f32 0.5, %v2247_v14  ;;  %2635 = vmax.xlane.f32.xlu1 %v2634_v18 }
 0x416   : > { %5751 = vmatmul.msk.f32.gmra.mxu2 %vm2399_vm2, %v2391_v16 }
 0x418   : > { %v2248_v44 = vpop.f32.mrf.mxu3 }
 0x419   : > { %v2249_v26 = vadd.f32 %v7665_v61, %v2248_v44 }
 0x41a   : > { %v2352_v42 = vpop.f32.mrf.mxu1 }
 0x41b   : > { %v2392_v23 = vmul.f32 0.5, %v2249_v26 }
 0x41e   : > { %5752 = vmatmul.msk.f32.gmra.mxu2 %vm2399_vm2, %v2392_v23 }
 0x420   : > { %v2251_v62 = vpop.f32.mrf.mxu3 }
 0x421   : > { %v2252_v48 = vadd.f32 %v7665_v61, %v2251_v62 }
 0x422   : > { %v2354_v7 = vpop.f32.mrf.mxu1 }
 0x423   : > { %v2393_v13 = vmul.f32 0.5, %v2252_v48 }
 0x426   : > { %5753 = vmatmul.msk.f32.gmra.mxu2 %vm2399_vm2, %v2393_v13 }
 0x428   : > { %v2253_v28 = vpop.f32.mrf.mxu3 }
 0x429   : > { %v2254_v14 = vadd.f32 %v7665_v61, %v2253_v28 }
 0x42a   : > { %v2357_v18 = vpop.f32.mrf.mxu1 }
 0x42b   : > { %v2394_v51 = vmul.f32 0.5, %v2254_v14 }
 0x42e   : > { %5754 = vmatmul.msk.f32.gmra.mxu2 %vm2399_vm2, %v2394_v51 }
 0x430   : > { %v2256_v16 = vpop.f32.mrf.mxu3 }
 0x431   : > { %v2257_v44 = vadd.f32 %v7665_v61, %v2256_v16 }
 0x432   : > { %v2359_v26 = vpop.f32.mrf.mxu1 }
 0x433   : > { %v2395_v21 = vmul.f32 0.5, %v2257_v44 }
 0x436   : > { %5755 = vmatmul.msk.f32.gmra.mxu2 %vm2399_vm2, %v2395_v21 }
 0x438   : > { %v2258_v23 = vpop.f32.mrf.mxu3 }
 0x439   : > { %v2259_v62 = vadd.f32 %v7665_v61, %v2258_v23 }
 0x43a   : > { %v2362_v48 = vpop.f32.mrf.mxu1 }
 0x43b   : > { %v2396_v34 = vmul.f32 0.5, %v2259_v62  ;;  %v2363_v21 = vadd.f32 %v7784_v41, %v2362_v48 }
 0x43e   : > { %5756 = vmatmul.msk.f32.gmra.mxu2 %vm2399_vm2, %v2396_v34 }
 0x43f   : > { %v2615_v28 = vpop.xlane.xlu1 %2614 }
 0x440   : > { %v2261_v13 = vpop.f32.mrf.mxu3  ;;  %v2709_v51 = vsub.f32 %v7796_v40, %v2615_v28 }
 0x441   : > { %v2262_v14 = vadd.f32 %v7665_v61, %v2261_v13 }
 0x442   : > { %v2364_v5 = vpop.f32.mrf.mxu1  ;;  %v2741_v44 = vmul.f32 1.442695, %v2709_v51 }
 0x443   : > { %v2397_v25 = vmul.f32 0.5, %v2262_v14  ;;  %v2365_v16 = vadd.f32 %v7784_v41, %v2364_v5  ;;  %v2360_v5 = vadd.f32 %v7784_v41, %v2359_v26 }
 0x444   : > { %6043 = vpow2.f32 %v2741_v44 }
 0x445   : > { %5839 = vmatpush.xpose.msk.msrb.mxu1 %vm882_vm0, %v2365_v16 }
 0x446   : > { %5757 = vmatmul.msk.f32.gmra.mxu2 %vm2399_vm2, %v2397_v25  ;;  %v2358_v25 = vadd.f32 %v7784_v41, %v2357_v18  ;;  %v2353_v18 = vadd.f32 %v7784_v41, %v2352_v42 }
 0x447   : > { %v2618_v62 = vpop.xlane.xlu1 %2617 }
 0x448   : > { %v2263_v23 = vpop.f32.mrf.mxu3  ;;  %v2710_v40 = vsub.f32 %v7808_v19, %v2618_v62  ;;  %v2355_v19 = vadd.f32 %v7784_v41, %v2354_v7  ;;  %v2350_v7 = vadd.f32 %v7784_v41, %v7898_v45  ;;  %v2348_v62 = vadd.f32 %v7784_v41, %v7890_v35 }
 0x449   : > { %v2264_v34 = vadd.f32 %v7665_v61, %v2263_v23  ;;  %5840 = vmatpush.xpose.msk.msrb.mxu1 %vm882_vm0, %v2363_v21  ;;  %v7930_v61 = vpop.f32.mrf.mxu2 }
 0x44a   : > { %v7922_v13 = vpop.eup %6043  ;;  %v2743_v14 = vmul.f32 1.442695, %v2710_v40  ;;  %v2637_v48 = vsel %vm2612_vm10, %v7930_v61, -inf  ;;  %v2345_v40 = vadd.f32 %v7784_v41, %v7882_v58  ;;  %v2340_v58 = vadd.f32 %v7784_v41, %v7854_v31 }
 0x44b   : > { %v2398_v28 = vmul.f32 0.5, %v2264_v34  ;;  %v2805_v51 = vsel %vm2612_vm10, %v7922_v13, 0.0 }
 0x44c   : > { %2806 = vadd.xlane.f32.xlu0 %v2805_v51  ;;  %6045 = vpow2.f32 %v2743_v14 }
 0x44d   : > { %5841 = vmatpush.xpose.msk.msrb.mxu1 %vm882_vm0, %v2360_v5 }
 0x44e   : > { %5758 = vmatmul.msk.f32.gmra.mxu2 %vm2399_vm2, %v2398_v28  ;;  %v2343_v28 = vadd.f32 %v7784_v41, %v7868_v20  ;;  %v2338_v20 = vadd.f32 %v7784_v41, %v7842_v59 }
 0x451   : > { %5842 = vmatpush.xpose.msk.msrb.mxu1 %vm882_vm0, %v2358_v25  ;;  %v7943_v44 = vpop.f32.mrf.mxu2 }
 0x452   : > { %v7934_v26 = vpop.eup %6045  ;;  %v2640_v23 = vsel %vm2612_vm10, %v7943_v44, -inf }
 0x453   : > { %v2808_v16 = vsel %vm2612_vm10, %v7934_v26, 0.0 }
 0x454   : > { %2638 = vmax.xlane.f32.xlu0 %v2637_v48  ;;  %2809 = vadd.xlane.f32.xlu2 %v2808_v16 }
 0x455   : > { %5843 = vmatpush.xpose.msk.msrb.mxu1 %vm882_vm0, %v2355_v19 }
 0x459   : > { %5844 = vmatpush.xpose.msk.msrb.mxu1 %vm882_vm0, %v2353_v18  ;;  %v7956_v45 = vpop.f32.mrf.mxu2 }
 0x45a   : > { %v2643_v18 = vsel %vm2612_vm10, %v7956_v45, -inf }
 0x45c   : > { %2641 = vmax.xlane.f32.xlu2 %v2640_v23 }
 0x45d   : > { %5845 = vmatpush.xpose.msk.msrb.mxu1 %vm882_vm0, %v2350_v7  ;;  %v2621_v21 = vpop.xlane.xlu2 %2620  ;;  %v2335_v7 = vadd.f32 %v7784_v41, %v7828_v47 }
 0x45e   : > { %v2711_v34 = vsub.f32 %v7836_v3, %v2621_v21 }
 0x460   : > { %v2745_v42 = vmul.f32 1.442695, %v2711_v34 }
 0x461   : > { %5846 = vmatpush.xpose.msk.msrb.mxu1 %vm882_vm0, %v2348_v62 }
 0x462   : > { %6047 = vpow2.f32 %v2745_v42 }
 0x465   : > { %5847 = vmatpush.xpose.msk.msrb.mxu1 %vm882_vm0, %v2345_v40  ;;  %v2330_v40 = vadd.f32 %v7784_v41, %v7805_v32 }
 0x466   : > { %v2624_v5 = vpop.xlane.xlu2 %2623 }
 0x467   : > { %v2712_v3 = vsub.f32 %v7851_v24, %v2624_v5  ;;  %v7972_v24 = vpop.f32.mrf.mxu2 }
 0x468   : > { %v7962_v14 = vpop.eup %6047  ;;  %v2646_v42 = vsel %vm2612_vm10, %v7972_v24, -inf }
 0x469   : > { %v2747_v35 = vmul.f32 1.442695, %v2712_v3  ;;  %5848 = vmatpush.xpose.msk.msrb.mxu1 %vm882_vm0, %v2343_v28  ;;  %v2811_v51 = vsel %vm2612_vm10, %v7962_v14, 0.0 }
 0x46a   : > { %2812 = vadd.xlane.f32.xlu1 %v2811_v51 }
 0x46b   : > { %6049 = vpow2.f32 %v2747_v35 }
 0x46d   : > { %5849 = vmatpush.xpose.msk.msrb.mxu1 %vm882_vm0, %v2340_v58 }
 0x46e   : > { %v2627_v25 = vpop.xlane.xlu0 %2626 }
 0x46f   : > { %v2713_v19 = vsub.f32 %v7865_v43, %v2627_v25  ;;  %v2333_v43 = vadd.f32 %v7784_v41, %v7818_v4  ;;  %v7990_v34 = vpop.f32.mrf.mxu2 }
 0x470   : > { %v2649_v32 = vsel %vm2612_vm10, %v7990_v34, -inf }
 0x471   : > { %v7975_v48 = vpop.eup %6049  ;;  %v2749_v16 = vmul.f32 1.442695, %v2713_v19  ;;  %5850 = vmatpush.xpose.msk.msrb.mxu1 %vm882_vm0, %v2338_v20 }
 0x472   : > { %v2814_v31 = vsel %vm2612_vm10, %v7975_v48, 0.0  ;;  %2644 = vmax.xlane.f32.xlu1 %v2643_v18 }
 0x473   : > { %6051 = vpow2.f32 %v2749_v16  ;;  %2815 = vadd.xlane.f32.xlu0 %v2814_v31 }
 0x475   : > { %5851 = vmatpush.xpose.msk.msrb.mxu1 %vm882_vm0, %v2335_v7 }
 0x476   : > { %v2630_v59 = vpop.xlane.xlu1 %2629 }
 0x477   : > { %v2714_v21 = vsub.f32 %v7879_v1, %v2630_v59  ;;  %v2328_v1 = vadd.f32 %v7784_v41, %v7793_v63  ;;  %v8010_v51 = vpop.f32.mrf.mxu2 }
 0x478   : > { %v2652_v20 = vsel %vm2612_vm10, %v8010_v51, -inf }
 0x479   : > { %v7988_v23 = vpop.eup %6051  ;;  %v2751_v62 = vmul.f32 1.442695, %v2714_v21  ;;  %5852 = vmatpush.xpose.msk.msrb.mxu1 %vm882_vm0, %v2333_v43 }
 0x47a   : > { %v2817_v47 = vsel %vm2612_vm10, %v7988_v23, 0.0 }
 0x47b   : > { %6053 = vpow2.f32 %v2751_v62  ;;  %2818 = vadd.xlane.f32.xlu2 %v2817_v47  ;;  %2647 = vmax.xlane.f32.xlu0 %v2646_v42 }
 0x47d   : > { %5853 = vmatpush.xpose.msk.msrb.mxu1 %vm882_vm0, %v2330_v40 }
 0x47e   : > { %v2633_v4 = vpop.xlane.xlu2 %2632 }
 0x47f   : > { %v2715_v5 = vsub.f32 %v7888_v57, %v2633_v4  ;;  %v8019_v19 = vpop.f32.mrf.mxu2 }
 0x481   : > { %v8003_v28 = vpop.eup %6053  ;;  %v2753_v3 = vmul.f32 1.442695, %v2715_v5  ;;  %5854 = vmatpush.xpose.msk.msrb.mxu1 %vm882_vm0, %v2328_v1 }
 0x482   : > { %v2820_v35 = vsel %vm2612_vm10, %v8003_v28, 0.0 }
 0x483   : > { %6055 = vpow2.f32 %v2753_v3  ;;  %2821 = vadd.xlane.f32.xlu1 %v2820_v35  ;;  %2650 = vmax.xlane.f32.xlu2 %v2649_v32 }
 0x486   : > { %v2636_v58 = vpop.xlane.xlu1 %2635 }
 0x487   : > { %v2716_v41 = vsub.f32 %v7896_v10, %v2636_v58  ;;  %v2655_v10 = vsel %vm2612_vm10, %v8019_v19, -inf  ;;  %v8027_v31 = vpop.f32.mrf.mxu2 }
 0x488   : > { %v2658_v7 = vsel %vm2612_vm10, %v8027_v31, -inf }
 0x489   : > { %v8013_v63 = vpop.eup %6055  ;;  %v2755_v57 = vmul.f32 1.442695, %v2716_v41 }
 0x48a   : > { %v2823_v25 = vsel %vm2612_vm10, %v8013_v63, 0.0 }
 0x48b   : > { %6057 = vpow2.f32 %v2755_v57  ;;  %2824 = vadd.xlane.f32.xlu0 %v2823_v25  ;;  %2653 = vmax.xlane.f32.xlu1 %v2652_v20 }
 0x491   : > { %v8021_v16 = vpop.eup %6057 }
 0x492   : > { %v2826_v18 = vsel %vm2612_vm10, %v8021_v16, 0.0 }
 0x493   : > { %2827 = vadd.xlane.f32.xlu2 %v2826_v18  ;;  %2656 = vmax.xlane.f32.xlu0 %v2655_v10 }
 0x49b   : > { %2659 = vmax.xlane.f32.xlu2 %v2658_v7 }
 0x4bf   : > { %v2807_v59 = vpop.xlane.xlu0 %2806 }
 0x4c0   : > { %6059 = vrcp.f32 %v2807_v59 }
 0x4c6   : > { %v6060_v43 = vpop.eup %6059 }
 0x4c7   : > { %v2639_v21 = vpop.xlane.xlu0 %2638  ;;  %v2933_v62 = vmul.f32 %v6060_v43, %v7922_v13  ;;  %v2810_v47 = vpop.xlane.xlu2 %2809 }
 0x4c8   : > { %v2717_v42 = vsub.f32 %v7930_v61, %v2639_v21  ;;  %6061 = vrcp.f32 %v2810_v47  ;;  %v8041_v61 = vpop.f32.mrf.mxu2 }
 0x4c9   : > { %5759 = vmatmul.msk.f32.vlgmr.msrb.gmra.mxu0 %vm2612_vm10, %v2933_v62  ;;  %v2661_v41 = vsel %vm2612_vm10, %v8041_v61, -inf }
 0x4ca   : > { %v2757_v40 = vmul.f32 1.442695, %v2717_v42 }
 0x4cc   : > { %6063 = vpow2.f32 %v2757_v40 }
 0x4ce   : > { %v6062_v4 = vpop.eup %6061 }
 0x4cf   : > { %v2642_v1 = vpop.xlane.xlu2 %2641  ;;  %v2934_v5 = vmul.f32 %v6062_v4, %v7934_v26 }
 0x4d0   : > { %v2718_v3 = vsub.f32 %v7943_v44, %v2642_v1  ;;  %v8049_v57 = vpop.f32.mrf.mxu2 }
 0x4d1   : > { %5760 = vmatmul.msk.f32.gmra.mxu0 %vm2612_vm10, %v2934_v5  ;;  %v2664_v10 = vsel %vm2612_vm10, %v8049_v57, -inf }
 0x4d2   : > { %v8036_v35 = vpop.eup %6063  ;;  %v2759_v32 = vmul.f32 1.442695, %v2718_v3 }
 0x4d3   : > { %v2829_v13 = vsel %vm2612_vm10, %v8036_v35, 0.0 }
 0x4d4   : > { %2830 = vadd.xlane.f32.xlu1 %v2829_v13  ;;  %6065 = vpow2.f32 %v2759_v32 }
 0x4d8   : > { %v8056_v62 = vpop.f32.mrf.mxu2 }
 0x4da   : > { %v8043_v58 = vpop.eup %6065 }
 0x4db   : > { %v2832_v44 = vsel %vm2612_vm10, %v8043_v58, 0.0 }
 0x4dc   : > { %2662 = vmax.xlane.f32.xlu1 %v2661_v41  ;;  %2833 = vadd.xlane.f32.xlu0 %v2832_v44  ;;  %v2667_v44 = vsel %vm2612_vm10, %v8056_v62, -inf }
 0x4dd   : > { %v2813_v26 = vpop.xlane.xlu1 %2812 }
 0x4de   : > { %6067 = vrcp.f32 %v2813_v26 }
 0x4e0   : > { %v8066_v41 = vpop.f32.mrf.mxu2 }
 0x4e4   : > { %v6068_v25 = vpop.eup %6067  ;;  %2665 = vmax.xlane.f32.xlu0 %v2664_v10 }
 0x4e5   : > { %v2645_v20 = vpop.xlane.xlu1 %2644  ;;  %v2935_v18 = vmul.f32 %v6068_v25, %v7962_v14 }
 0x4e6   : > { %v2816_v7 = vpop.xlane.xlu0 %2815  ;;  %v2719_v59 = vsub.f32 %v7956_v45, %v2645_v20 }
 0x4e7   : > { %6069 = vrcp.f32 %v2816_v7  ;;  %5761 = vmatmul.msk.f32.gmra.mxu0 %vm2612_vm10, %v2935_v18 }
 0x4e8   : > { %v2761_v43 = vmul.f32 1.442695, %v2719_v59  ;;  %v8081_v59 = vpop.f32.mrf.mxu2 }
 0x4ea   : > { %6071 = vpow2.f32 %v2761_v43 }
 0x4ed   : > { %v6070_v21 = vpop.eup %6069 }
 0x4ee   : > { %v2819_v47 = vpop.xlane.xlu2 %2818  ;;  %v2648_v42 = vpop.xlane.xlu0 %2647  ;;  %v2936_v40 = vmul.f32 %v6070_v21, %v7975_v48 }
 0x4ef   : > { %6073 = vrcp.f32 %v2819_v47  ;;  %v2720_v14 = vsub.f32 %v7972_v24, %v2648_v42  ;;  %v2670_v47 = vsel %vm2612_vm10, %v8066_v41, -inf }
 0x4f0   : > { %v8060_v4 = vpop.eup %6071  ;;  %5762 = vmatmul.msk.f32.gmra.mxu0 %vm2612_vm10, %v2936_v40 }
 0x4f1   : > { %v2763_v45 = vmul.f32 1.442695, %v2720_v14  ;;  %v2835_v1 = vsel %vm2612_vm10, %v8060_v4, 0.0 }
 0x4f2   : > { %2836 = vadd.xlane.f32.xlu2 %v2835_v1 }
 0x4f3   : > { %6075 = vpow2.f32 %v2763_v45 }
 0x4f5   : > { %v6074_v5 = vpop.eup %6073 }
 0x4f6   : > { %v2822_v3 = vpop.xlane.xlu1 %2821  ;;  %v2651_v32 = vpop.xlane.xlu2 %2650  ;;  %v2937_v13 = vmul.f32 %v6074_v5, %v7988_v23 }
 0x4f7   : > { %6077 = vrcp.f32 %v2822_v3  ;;  %v2721_v24 = vsub.f32 %v7990_v34, %v2651_v32  ;;  %v2673_v3 = vsel %vm2612_vm10, %v8081_v59, -inf  ;;  %v8096_v32 = vpop.f32.mrf.mxu2 }
 0x4f8   : > { %5763 = vmatmul.msk.f32.gmra.mxu0 %vm2612_vm10, %v2937_v13 }
 0x4f9   : > { %v8070_v48 = vpop.eup %6075  ;;  %v2765_v26 = vmul.f32 1.442695, %v2721_v24 }
 0x4fa   : > { %v2838_v25 = vsel %vm2612_vm10, %v8070_v48, 0.0  ;;  %2668 = vmax.xlane.f32.xlu2 %v2667_v44 }
 0x4fb   : > { %6079 = vpow2.f32 %v2765_v26  ;;  %2839 = vadd.xlane.f32.xlu1 %v2838_v25 }
 0x4fd   : > { %v6078_v23 = vpop.eup %6077 }
 0x4fe   : > { %v2825_v20 = vpop.xlane.xlu0 %2824  ;;  %v2654_v18 = vpop.xlane.xlu1 %2653  ;;  %v2938_v10 = vmul.f32 %v6078_v23, %v8003_v28  ;;  %v2676_v23 = vsel %vm2612_vm10, %v8096_v32, -inf }
 0x4ff   : > { %6081 = vrcp.f32 %v2825_v20  ;;  %v2722_v34 = vsub.f32 %v8010_v51, %v2654_v18  ;;  %v8107_v20 = vpop.f32.mrf.mxu2 }
 0x500   : > { %5764 = vmatmul.msk.f32.gmra.mxu0 %vm2612_vm10, %v2938_v10 }
 0x501   : > { %v8079_v7 = vpop.eup %6079  ;;  %v2767_v43 = vmul.f32 1.442695, %v2722_v34 }
 0x502   : > { %v2841_v21 = vsel %vm2612_vm10, %v8079_v7, 0.0 }
 0x503   : > { %6083 = vpow2.f32 %v2767_v43  ;;  %2842 = vadd.xlane.f32.xlu0 %v2841_v21  ;;  %2671 = vmax.xlane.f32.xlu1 %v2670_v47 }
 0x505   : > { %v6082_v28 = vpop.eup %6081 }
 0x506   : > { %v2828_v42 = vpop.xlane.xlu2 %2827  ;;  %v2657_v40 = vpop.xlane.xlu0 %2656  ;;  %v2939_v51 = vmul.f32 %v6082_v28, %v8013_v63 }
 0x507   : > { %6085 = vrcp.f32 %v2828_v42  ;;  %v2723_v14 = vsub.f32 %v8019_v19, %v2657_v40  ;;  %v8115_v10 = vpop.f32.mrf.mxu2 }
 0x508   : > { %5765 = vmatmul.msk.f32.gmra.mxu0 %vm2612_vm10, %v2939_v51  ;;  %v2682_v34 = vsel %vm2612_vm10, %v8115_v10, -inf }
 0x509   : > { %v8090_v45 = vpop.eup %6083  ;;  %v2769_v1 = vmul.f32 1.442695, %v2723_v14 }
 0x50a   : > { %v2844_v5 = vsel %vm2612_vm10, %v8090_v45, 0.0 }
 0x50b   : > { %6087 = vpow2.f32 %v2769_v1  ;;  %2845 = vadd.xlane.f32.xlu2 %v2844_v5  ;;  %2674 = vmax.xlane.f32.xlu0 %v2673_v3 }
 0x50d   : > { %v6086_v63 = vpop.eup %6085 }
 0x50e   : > { %v2660_v13 = vpop.xlane.xlu2 %2659  ;;  %v2940_v19 = vmul.f32 %v6086_v63, %v8021_v16 }
 0x50f   : > { %v2724_v24 = vsub.f32 %v8027_v31, %v2660_v13  ;;  %v2679_v31 = vsel %vm2612_vm10, %v8107_v20, -inf }
 0x510   : > { %5766 = vmatmul.msk.f32.gmra.mxu0 %vm2612_vm10, %v2940_v19 }
 0x511   : > { %v8101_v26 = vpop.eup %6087  ;;  %v2771_v44 = vmul.f32 1.442695, %v2724_v24 }
 0x512   : > { %v2847_v25 = vsel %vm2612_vm10, %v8101_v26, 0.0 }
 0x513   : > { %6089 = vpow2.f32 %v2771_v44  ;;  %2848 = vadd.xlane.f32.xlu1 %v2847_v25  ;;  %2677 = vmax.xlane.f32.xlu2 %v2676_v23 }
 0x519   : > { %v8109_v18 = vpop.eup %6089 }
 0x51a   : > { %v2850_v16 = vsel %vm2612_vm10, %v8109_v18, 0.0 }
 0x51b   : > { %2851 = vadd.xlane.f32.xlu0 %v2850_v16  ;;  %2680 = vmax.xlane.f32.xlu1 %v2679_v31 }
 0x523   : > { %2683 = vmax.xlane.f32.xlu0 %v2682_v34 }
 0x547   : > { %v2831_v43 = vpop.xlane.xlu1 %2830 }
 0x548   : > { %6091 = vrcp.f32 %v2831_v43 }
 0x54e   : > { %v6092_v21 = vpop.eup %6091 }
 0x54f   : > { %v2663_v47 = vpop.xlane.xlu1 %2662  ;;  %v2941_v28 = vmul.f32 %v6092_v21, %v8036_v35  ;;  %v2834_v42 = vpop.xlane.xlu0 %2833 }
 0x550   : > { %v2725_v40 = vsub.f32 %v8041_v61, %v2663_v47  ;;  %6093 = vrcp.f32 %v2834_v42  ;;  %v8129_v61 = vpop.f32.mrf.mxu2 }
 0x551   : > { %5767 = vmatmul.msk.f32.gmra.mxu0 %vm2612_vm10, %v2941_v28  ;;  %v2685_v24 = vsel %vm2612_vm10, %v8129_v61, -inf }
 0x552   : > { %v2773_v51 = vmul.f32 1.442695, %v2725_v40 }
 0x554   : > { %6095 = vpow2.f32 %v2773_v51 }
 0x556   : > { %v6094_v14 = vpop.eup %6093 }
 0x557   : > { %v2666_v1 = vpop.xlane.xlu0 %2665  ;;  %v2942_v5 = vmul.f32 %v6094_v14, %v8043_v58 }
 0x558   : > { %v2726_v3 = vsub.f32 %v8049_v57, %v2666_v1  ;;  %v8137_v44 = vpop.f32.mrf.mxu2 }
 0x559   : > { %5768 = vmatmul.msk.f32.gmra.mxu0 %vm2612_vm10, %v2942_v5  ;;  %v2688_v31 = vsel %vm2612_vm10, %v8137_v44, -inf }
 0x55a   : > { %v8124_v63 = vpop.eup %6095  ;;  %v2775_v13 = vmul.f32 1.442695, %v2726_v3 }
 0x55b   : > { %v2853_v35 = vsel %vm2612_vm10, %v8124_v63, 0.0 }
 0x55c   : > { %2854 = vadd.xlane.f32.xlu2 %v2853_v35  ;;  %6097 = vpow2.f32 %v2775_v13 }
 0x560   : > { %v8144_v28 = vpop.f32.mrf.mxu2 }
 0x562   : > { %v8131_v19 = vpop.eup %6097 }
 0x563   : > { %v2856_v57 = vsel %vm2612_vm10, %v8131_v19, 0.0 }
 0x564   : > { %2686 = vmax.xlane.f32.xlu2 %v2685_v24  ;;  %2857 = vadd.xlane.f32.xlu1 %v2856_v57  ;;  %v2691_v57 = vsel %vm2612_vm10, %v8144_v28, -inf }
 0x565   : > { %v2837_v58 = vpop.xlane.xlu2 %2836 }
 0x566   : > { %6099 = vrcp.f32 %v2837_v58 }
 0x568   : > { %v8155_v24 = vpop.f32.mrf.mxu2 }
 0x56c   : > { %v6100_v25 = vpop.eup %6099  ;;  %2689 = vmax.xlane.f32.xlu1 %v2688_v31 }
 0x56d   : > { %v2669_v23 = vpop.xlane.xlu2 %2668  ;;  %v2943_v16 = vmul.f32 %v6100_v25, %v8060_v4 }
 0x56e   : > { %v2840_v34 = vpop.xlane.xlu1 %2839  ;;  %v2727_v43 = vsub.f32 %v8056_v62, %v2669_v23 }
 0x56f   : > { %6101 = vrcp.f32 %v2840_v34  ;;  %5769 = vmatmul.msk.f32.gmra.mxu0 %vm2612_vm10, %v2943_v16 }
 0x570   : > { %v2777_v21 = vmul.f32 1.442695, %v2727_v43 }
 0x572   : > { %6103 = vpow2.f32 %v2777_v21  ;;  %v8169_v21 = vpop.f32.mrf.mxu2 }
 0x575   : > { %v6102_v47 = vpop.eup %6101 }
 0x576   : > { %v2843_v42 = vpop.xlane.xlu0 %2842  ;;  %v2672_v40 = vpop.xlane.xlu1 %2671  ;;  %v2944_v51 = vmul.f32 %v6102_v47, %v8070_v48 }
 0x577   : > { %6105 = vrcp.f32 %v2843_v42  ;;  %v2728_v4 = vsub.f32 %v8066_v41, %v2672_v40  ;;  %v2694_v42 = vsel %vm2612_vm10, %v8155_v24, -inf  ;;  %v3078_v40 = vpop.f32.mrf.mxu0 }
 0x578   : > { %v8148_v14 = vpop.eup %6103  ;;  %5770 = vmatmul.msk.f32.gmra.mxu0 %vm2612_vm10, %v2944_v51 }
 0x579   : > { %v2779_v62 = vmul.f32 1.442695, %v2728_v4  ;;  %v2859_v1 = vsel %vm2612_vm10, %v8148_v14, 0.0 }
 0x57a   : > { %2860 = vadd.xlane.f32.xlu0 %v2859_v1 }
 0x57b   : > { %6107 = vpow2.f32 %v2779_v62 }
 0x57d   : > { %v6106_v5 = vpop.eup %6105 }
 0x57e   : > { %v2846_v3 = vpop.xlane.xlu2 %2845  ;;  %v2675_v13 = vpop.xlane.xlu0 %2674  ;;  %v2945_v35 = vmul.f32 %v6106_v5, %v8079_v7 }
 0x57f   : > { %6109 = vrcp.f32 %v2846_v3  ;;  %v2729_v48 = vsub.f32 %v8081_v59, %v2675_v13  ;;  %v2697_v13 = vsel %vm2612_vm10, %v8169_v21, -inf }
 0x580   : > { %5771 = vmatmul.msk.f32.gmra.mxu0 %vm2612_vm10, %v2945_v35  ;;  %v8184_v35 = vpop.f32.mrf.mxu2 }
 0x581   : > { %v8158_v41 = vpop.eup %6107  ;;  %v2781_v58 = vmul.f32 1.442695, %v2729_v48  ;;  %v8187_v48 = vadd.f32 %v3078_v40, %v7327_v37  ;;  %v2700_v37 = vsel %vm2612_vm10, %v8184_v35, -inf }
 0x582   : > { %v2862_v25 = vsel %vm2612_vm10, %v8158_v41, 0.0  ;;  %2692 = vmax.xlane.f32.xlu0 %v2691_v57  ;;  %v3081_v57 = vpop.f32.mrf.mxu0 }
 0x583   : > { %6111 = vpow2.f32 %v2781_v58  ;;  %2863 = vadd.xlane.f32.xlu2 %v2862_v25 }
 0x585   : > { %v6110_v7 = vpop.eup %6109 }
 0x586   : > { %v2849_v23 = vpop.xlane.xlu1 %2848  ;;  %v2678_v16 = vpop.xlane.xlu2 %2677  ;;  %v2946_v59 = vmul.f32 %v6110_v7, %v8090_v45 }
 0x587   : > { %6113 = vrcp.f32 %v2849_v23  ;;  %v2730_v31 = vsub.f32 %v8096_v32, %v2678_v16  ;;  %v3174_v16 = vsel %vm882_vm0, %v8187_v48, 0.0 }
 0x588   : > { %5772 = vmatmul.msk.f32.gmra.mxu0 %vm2612_vm10, %v2946_v59 }
 0x589   : > { %v8167_v34 = vpop.eup %6111  ;;  %v2783_v43 = vmul.f32 1.442695, %v2730_v31 }
 0x58a   : > { %v2865_v47 = vsel %vm2612_vm10, %v8167_v34, 0.0 }
 0x58b   : > { %6115 = vpow2.f32 %v2783_v43  ;;  %2866 = vadd.xlane.f32.xlu1 %v2865_v47  ;;  %2695 = vmax.xlane.f32.xlu2 %v2694_v42  ;;  %v3084_v43 = vpop.f32.mrf.mxu0 }
 0x58c   : > { %v8214_v40 = vadd.f32 %v3084_v43, %v7582_v38 }
 0x58d   : > { %v6114_v45 = vpop.eup %6113 }
 0x58e   : > { %v2852_v51 = vpop.xlane.xlu0 %2851  ;;  %v2681_v32 = vpop.xlane.xlu1 %2680  ;;  %v2947_v4 = vmul.f32 %v6114_v45, %v8101_v26 }
 0x58f   : > { %6117 = vrcp.f32 %v2852_v51  ;;  %v2731_v62 = vsub.f32 %v8107_v20, %v2681_v32  ;;  %v3180_v51 = vsel %vm882_vm0, %v8214_v40, 0.0 }
 0x590   : > { %5773 = vmatmul.msk.f32.gmra.mxu0 %vm2612_vm10, %v2947_v4 }
 0x591   : > { %v8178_v1 = vpop.eup %6115  ;;  %v2785_v5 = vmul.f32 1.442695, %v2731_v62 }
 0x592   : > { %v2868_v3 = vsel %vm2612_vm10, %v8178_v1, 0.0 }
 0x593   : > { %6119 = vpow2.f32 %v2785_v5  ;;  %2869 = vadd.xlane.f32.xlu0 %v2868_v3  ;;  %2698 = vmax.xlane.f32.xlu1 %v2697_v13  ;;  %v3087_v32 = vpop.f32.mrf.mxu0 }
 0x594   : > { %v8223_v62 = vadd.f32 %v3087_v32, %v7584_v39 }
 0x595   : > { %v6118_v26 = vpop.eup %6117 }
 0x596   : > { %v2684_v20 = vpop.xlane.xlu0 %2683  ;;  %v2948_v58 = vmul.f32 %v6118_v26, %v8109_v18  ;;  %v8200_v18 = vpop.f32.mrf.mxu2  ;;  %v3183_v5 = vsel %vm882_vm0, %v8223_v62, 0.0 }
 0x597   : > { %v2732_v25 = vsub.f32 %v8115_v10, %v2684_v20  ;;  %v8203_v10 = vadd.f32 %v3081_v57, %v7343_v2  ;;  %v2703_v45 = vsel %vm2612_vm10, %v8200_v18, -inf }
 0x598   : > { %5774 = vmatmul.msk.f32.gmra.mxu0 %vm2612_vm10, %v2948_v58 }
 0x599   : > { %v8192_v7 = vpop.eup %6119  ;;  %v2787_v23 = vmul.f32 1.442695, %v2732_v25  ;;  %v3177_v47 = vsel %vm882_vm0, %v8203_v10, 0.0 }
 0x59a   : > { %v2871_v59 = vsel %vm2612_vm10, %v8192_v7, 0.0 }
 0x59b   : > { %6121 = vpow2.f32 %v2787_v23  ;;  %3175 = vadd.xlane.f32.xlu0 %v3174_v16  ;;  %2872 = vadd.xlane.f32.xlu2 %v2871_v59 }
 0x59c   : > { %2701 = vmax.xlane.f32.xlu1 %v2700_v37 }
 0x59e   : > { %v8216_v2 = vpop.f32.mrf.mxu2 }
 0x59f   : > { %v2706_v4 = vsel %vm2612_vm10, %v8216_v2, -inf }
 0x5a1   : > { %v8205_v31 = vpop.eup %6121 }
 0x5a2   : > { %v2874_v42 = vsel %vm2612_vm10, %v8205_v31, 0.0 }
 0x5a3   : > { %3178 = vadd.xlane.f32.xlu0 %v3177_v47  ;;  %2875 = vadd.xlane.f32.xlu2 %v2874_v42  ;;  %v3090_v42 = vpop.f32.mrf.mxu0 }
 0x5a4   : > { %2704 = vmax.xlane.f32.xlu1 %v2703_v45 }
 0x5ab   : > { %3181 = vadd.xlane.f32.xlu0 %v3180_v51 }
 0x5ac   : > { %2707 = vmax.xlane.f32.xlu1 %v2706_v4 }
 0x5b3   : > { %3184 = vadd.xlane.f32.xlu0 %v3183_v5 }
 0x5cf   : > { %v2855_v38 = vpop.xlane.xlu2 %2854 }
 0x5d0   : > { %6123 = vrcp.f32 %v2855_v38 }
 0x5d6   : > { %v6124_v3 = vpop.eup %6123 }
 0x5d7   : > { %v2687_v13 = vpop.xlane.xlu2 %2686  ;;  %v2949_v26 = vmul.f32 %v6124_v3, %v8124_v63  ;;  %v2858_v20 = vpop.xlane.xlu1 %2857 }
 0x5d8   : > { %v2733_v58 = vsub.f32 %v8129_v61, %v2687_v13  ;;  %6125 = vrcp.f32 %v2858_v20 }
 0x5d9   : > { %5775 = vmatmul.msk.f32.gmra.mxu0 %vm2612_vm10, %v2949_v26 }
 0x5da   : > { %v2789_v57 = vmul.f32 1.442695, %v2733_v58 }
 0x5dc   : > { %6127 = vpow2.f32 %v2789_v57 }
 0x5de   : > { %v6126_v39 = vpop.eup %6125 }
 0x5df   : > { %v2690_v25 = vpop.xlane.xlu1 %2689  ;;  %v2950_v23 = vmul.f32 %v6126_v39, %v8131_v19  ;;  %v8242_v19 = vadd.f32 %v3090_v42, %v7602_v6  ;;  %v3093_v6 = vpop.f32.mrf.mxu0 }
 0x5e0   : > { %v2734_v16 = vsub.f32 %v8137_v44, %v2690_v25  ;;  %v6442_v44 = vmov 16.0  }
 0x5e1   : > { %5776 = vmatmul.msk.f32.gmra.mxu0 %vm2612_vm10, %v2950_v23  ;;  %v3186_v4 = vsel %vm882_vm0, %v8242_v19, 0.0 }
 0x5e2   : > { %v8232_v59 = vpop.eup %6127  ;;  %v2791_v37 = vmul.f32 1.442695, %v2734_v16 }
 0x5e3   : > { %v2877_v63 = vsel %vm2612_vm10, %v8232_v59, 0.0 }
 0x5e4   : > { %2878 = vadd.xlane.f32.xlu2 %v2877_v63  ;;  %6129 = vpow2.f32 %v2791_v37 }
 0x5ea   : > { %v8237_v61 = vpop.eup %6129 }
 0x5eb   : > { %v2880_v47 = vsel %vm2612_vm10, %v8237_v61, 0.0 }
 0x5ec   : > { %2881 = vadd.xlane.f32.xlu2 %v2880_v47 }
 0x5ed   : > { %v2861_v43 = vpop.xlane.xlu0 %2860 }
 0x5ee   : > { %6131 = vrcp.f32 %v2861_v43  ;;  %v8257_v43 = vadd.f32 %v3093_v6, %v7572_v15 }
 0x5ef   : > { %6133 = vrcp.f32 %v6442_v44 }
 0x5f4   : > { %v6132_v45 = vpop.eup %6131  ;;  %3187 = vadd.xlane.f32.xlu2 %v3186_v4  ;;  %v3189_v4 = vsel %vm882_vm0, %v8257_v43, 0.0 }
 0x5f5   : > { %v2693_v51 = vpop.xlane.xlu0 %2692  ;;  %v2951_v32 = vmul.f32 %v6132_v45, %v8148_v14  ;;  %v6134_v13 = vpop.eup %6133 }
 0x5f6   : > { %v2864_v5 = vpop.xlane.xlu2 %2863  ;;  %v2735_v38 = vsub.f32 %v8144_v28, %v2693_v51  ;;  %v3271_v26 = vmul.f32 16.0, %v6134_v13  ;;  %vm3275_vm2 = vweird.f32 %v6134_v13 }
 0x5f7   : > { %6135 = vrcp.f32 %v2864_v5  ;;  %5777 = vmatmul.msk.f32.gmra.mxu0 %vm2612_vm10, %v2951_v32 }
 0x5f8   : > { %v2793_v3 = vmul.f32 1.442695, %v2735_v38  ;;  %v3272_v28 = vsub.f32 1.0, %v3271_v26 }
 0x5fa   : > { %6137 = vpow2.f32 %v2793_v3  ;;  %v3273_v37 = vmul.f32 %v6134_v13, %v3272_v28 }
 0x5fc   : > { %v3274_v45 = vadd.f32 %v6134_v13, %v3273_v37 }
 0x5fd   : > { %v6136_v20 = vpop.eup %6135 }
 0x5fe   : > { %v2867_v58 = vpop.xlane.xlu1 %2866  ;;  %v2696_v57 = vpop.xlane.xlu2 %2695  ;;  %v2952_v14 = vmul.f32 %v6136_v20, %v8158_v41 }
 0x5ff   : > { %6139 = vrcp.f32 %v2867_v58  ;;  %v2736_v39 = vsub.f32 %v8155_v24, %v2696_v57  ;;  %v3096_v41 = vpop.f32.mrf.mxu0 }
 0x600   : > { %v8251_v25 = vpop.eup %6137  ;;  %5778 = vmatmul.msk.f32.gmra.mxu0 %vm2612_vm10, %v2952_v14 }
 0x601   : > { %v2795_v23 = vmul.f32 1.442695, %v2736_v39  ;;  %v2883_v16 = vsel %vm2612_vm10, %v8251_v25, 0.0 }
 0x602   : > { %2884 = vadd.xlane.f32.xlu1 %v2883_v16 }
 0x603   : > { %6141 = vpow2.f32 %v2795_v23 }
 0x605   : > { %v6140_v63 = vpop.eup %6139 }
 0x606   : > { %v2870_v47 = vpop.xlane.xlu0 %2869  ;;  %v2699_v42 = vpop.xlane.xlu1 %2698  ;;  %v2953_v24 = vmul.f32 %v6140_v63, %v8167_v34  ;;  %v8268_v34 = vsel %vm3275_vm2, %v6134_v13, %v3274_v45 }
 0x607   : > { %6143 = vrcp.f32 %v2870_v47  ;;  %v2737_v44 = vsub.f32 %v8169_v21, %v2699_v42  ;;  %v8271_v21 = vadd.f32 %v3096_v41, %v7552_v8  ;;  %v3099_v58 = vpop.f32.mrf.mxu0 }
 0x608   : > { %5779 = vmatmul.msk.f32.gmra.mxu0 %vm2612_vm10, %v2953_v24  ;;  %v8289_v23 = vadd.f32 %v3099_v58, %v7534_v12 }
 0x609   : > { %v8262_v51 = vpop.eup %6141  ;;  %v2797_v32 = vmul.f32 1.442695, %v2737_v44  ;;  %v3192_v8 = vsel %vm882_vm0, %v8271_v21, 0.0 }
 0x60a   : > { %v2886_v15 = vsel %vm2612_vm10, %v8262_v51, 0.0  ;;  %3190 = vadd.xlane.f32.xlu1 %v3189_v4  ;;  %v3195_v12 = vsel %vm882_vm0, %v8289_v23, 0.0 }
 0x60b   : > { %6145 = vpow2.f32 %v2797_v32  ;;  %2887 = vadd.xlane.f32.xlu0 %v2886_v15 }
 0x60d   : > { %v6144_v5 = vpop.eup %6143 }
 0x60e   : > { %v3176_v38 = vpop.xlane.xlu0 %3175  ;;  %v2873_v3 = vpop.xlane.xlu2 %2872  ;;  %v2954_v6 = vmul.f32 %v6144_v5, %v8178_v1 }
 0x60f   : > { %v3277_v26 = vmul.f32 %v8268_v34, %v3176_v38  ;;  %6147 = vrcp.f32 %v2873_v3  ;;  %v2702_v20 = vpop.xlane.xlu1 %2701  ;;  %v3102_v42 = vpop.f32.mrf.mxu0 }
 0x610   : > { %v2738_v57 = vsub.f32 %v8184_v35, %v2702_v20  ;;  %5780 = vmatmul.msk.f32.gmra.mxu0 %vm2612_vm10, %v2954_v6  ;;  %v8308_v15 = vadd.f32 %v3102_v42, %v7511_v11 }
 0x611   : > { %v8277_v14 = vpop.eup %6145  ;;  %v8280_v13 = vsub.f32 %v8187_v48, %v3277_v26 }
 0x612   : > { %v2799_v39 = vmul.f32 1.442695, %v2738_v57  ;;  %v2889_v1 = vsel %vm2612_vm10, %v8277_v14, 0.0  ;;  %3193 = vadd.xlane.f32.xlu1 %v3192_v8  ;;  %v3198_v11 = vsel %vm882_vm0, %v8308_v15, 0.0 }
 0x613   : > { %2890 = vadd.xlane.f32.xlu2 %v2889_v1  ;;  %v3341_v28 = vmul.f32 %v8280_v13, %v8280_v13 }
 0x614   : > { %6149 = vpow2.f32 %v2799_v39 }
 0x615   : > { %v6148_v35 = vpop.eup %6147  ;;  %v3373_v48 = vsel %vm882_vm0, %v3341_v28, 0.0 }
 0x616   : > { %v3179_v16 = vpop.xlane.xlu0 %3178  ;;  %3374 = vadd.xlane.f32.xlu0 %v3373_v48  ;;  %v2876_v37 = vpop.xlane.xlu2 %2875  ;;  %v2955_v63 = vmul.f32 %v6148_v35, %v8192_v7 }
 0x617   : > { %v3278_v41 = vmul.f32 %v8268_v34, %v3179_v16  ;;  %6151 = vrcp.f32 %v2876_v37  ;;  %v2705_v47 = vpop.xlane.xlu1 %2704  ;;  %v3105_v57 = vpop.f32.mrf.mxu0 }
 0x618   : > { %v2739_v24 = vsub.f32 %v8200_v18, %v2705_v47  ;;  %5781 = vmatmul.msk.f32.gmra.mxu0 %vm2612_vm10, %v2955_v63 }
 0x619   : > { %v8297_v44 = vsub.f32 %v8203_v10, %v3278_v41 }
 0x61a   : > { %v8301_v45 = vpop.eup %6149  ;;  %v2801_v32 = vmul.f32 1.442695, %v2739_v24  ;;  %3196 = vadd.xlane.f32.xlu1 %v3195_v12 }
 0x61b   : > { %v2892_v7 = vsel %vm2612_vm10, %v8301_v45, 0.0  ;;  %v3342_v4 = vmul.f32 %v8297_v44, %v8297_v44 }
 0x61c   : > { %6153 = vpow2.f32 %v2801_v32  ;;  %2893 = vadd.xlane.f32.xlu2 %v2892_v7 }
 0x61d   : > { %v6152_v18 = vpop.eup %6151  ;;  %v3376_v10 = vsel %vm882_vm0, %v3342_v4, 0.0 }
 0x61e   : > { %v3182_v5 = vpop.xlane.xlu0 %3181  ;;  %3377 = vadd.xlane.f32.xlu0 %v3376_v10  ;;  %v2956_v38 = vmul.f32 %v6152_v18, %v8205_v31 }
 0x61f   : > { %v3279_v3 = vmul.f32 %v8268_v34, %v3182_v5  ;;  %v2708_v6 = vpop.xlane.xlu1 %2707  ;;  %v3108_v41 = vpop.f32.mrf.mxu0 }
 0x620   : > { %v2740_v26 = vsub.f32 %v8216_v2, %v2708_v6  ;;  %5782 = vmatmul.msk.f32.gmra.mxu0 %vm2612_vm10, %v2956_v38  ;;  %v8327_v2 = vadd.f32 %v3105_v57, %v7484_v0 }
 0x621   : > { %v8316_v20 = vsub.f32 %v8214_v40, %v3279_v3 }
 0x622   : > { %v8320_v58 = vpop.eup %6153  ;;  %v2803_v8 = vmul.f32 1.442695, %v2740_v26  ;;  %3199 = vadd.xlane.f32.xlu1 %v3198_v11  ;;  %v3201_v48 = vsel %vm882_vm0, %v8327_v2, 0.0 }
 0x623   : > { %v2895_v31 = vsel %vm2612_vm10, %v8320_v58, 0.0  ;;  %v3343_v39 = vmul.f32 %v8316_v20, %v8316_v20 }
 0x624   : > { %6155 = vpow2.f32 %v2803_v8  ;;  %2896 = vadd.xlane.f32.xlu2 %v2895_v31 }
 0x625   : > { %v3379_v40 = vsel %vm882_vm0, %v3343_v39, 0.0 }
 0x626   : > { %v3185_v1 = vpop.xlane.xlu0 %3184  ;;  %3380 = vadd.xlane.f32.xlu0 %v3379_v40 }
 0x627   : > { %v3280_v28 = vmul.f32 %v8268_v34, %v3185_v1  ;;  %v3111_v38 = vpop.f32.mrf.mxu0 }
 0x628   : > { %v8360_v3 = vadd.f32 %v3111_v38, %v7431_v46 }
 0x629   : > { %v8332_v35 = vsub.f32 %v8223_v62, %v3280_v28  ;;  %v8344_v62 = vadd.f32 %v3108_v41, %v7451_v27 }
 0x62a   : > { %v8336_v16 = vpop.eup %6155  ;;  %3202 = vadd.xlane.f32.xlu1 %v3201_v48 }
 0x62b   : > { %v2898_v37 = vsel %vm2612_vm10, %v8336_v16, 0.0  ;;  %v3344_v0 = vmul.f32 %v8332_v35, %v8332_v35  ;;  %v3204_v47 = vsel %vm882_vm0, %v8344_v62, 0.0 }
 0x62c   : > { %2899 = vadd.xlane.f32.xlu2 %v2898_v37 }
 0x62d   : > { %v3382_v63 = vsel %vm882_vm0, %v3344_v0, 0.0 }
 0x62e   : > { %3383 = vadd.xlane.f32.xlu0 %v3382_v63 }
 0x62f   : > { %v3114_v31 = vpop.f32.mrf.mxu0 }
 0x630   : > { %v8376_v0 = vadd.f32 %v3114_v31, %v7415_v22 }
 0x636   : > { %3205 = vadd.xlane.f32.xlu0 %v3204_v47 }
 0x637   : > { %v3117_v63 = vpop.f32.mrf.mxu0 }
 0x657   : > { %v2879_v42 = vpop.xlane.xlu2 %2878 }
 0x658   : > { %6157 = vrcp.f32 %v2879_v42 }
 0x65e   : > { %v6158_v24 = vpop.eup %6157 }
 0x65f   : > { %v2957_v12 = vmul.f32 %v6158_v24, %v8232_v59  ;;  %v2882_v32 = vpop.xlane.xlu2 %2881 }
 0x660   : > { %6159 = vrcp.f32 %v2882_v32 }
 0x661   : > { %5783 = vmatmul.msk.f32.gmra.mxu0 %vm2612_vm10, %v2957_v12 }
 0x666   : > { %v6160_v7 = vpop.eup %6159 }
 0x667   : > { %v3188_v4 = vpop.xlane.xlu2 %3187  ;;  %v2958_v18 = vmul.f32 %v6160_v7, %v8237_v61  ;;  %v3207_v61 = vsel %vm882_vm0, %v8360_v3, 0.0 }
 0x668   : > { %v3281_v27 = vmul.f32 %v8268_v34, %v3188_v4 }
 0x669   : > { %5784 = vmatmul.msk.f32.gmra.mxu0 %vm2612_vm10, %v2958_v18  ;;  %v8391_v18 = vadd.f32 %v3117_v63, %v7381_v30 }
 0x66a   : > { %v8354_v10 = vsub.f32 %v8242_v19, %v3281_v27 }
 0x66b   : > { %v3213_v30 = vsel %vm882_vm0, %v8391_v18, 0.0 }
 0x66c   : > { %v3345_v5 = vmul.f32 %v8354_v10, %v8354_v10 }
 0x66e   : > { %v3385_v59 = vsel %vm882_vm0, %v3345_v5, 0.0 }
 0x66f   : > { %3386 = vadd.xlane.f32.xlu2 %v3385_v59 }
 0x675   : > { %v2885_v6 = vpop.xlane.xlu1 %2884 }
 0x676   : > { %6161 = vrcp.f32 %v2885_v6  ;;  %v3120_v6 = vpop.f32.mrf.mxu0 }
 0x677   : > { %3208 = vadd.xlane.f32.xlu2 %v3207_v61 }
 0x67c   : > { %v6162_v26 = vpop.eup %6161 }
 0x67d   : > { %v3191_v11 = vpop.xlane.xlu1 %3190  ;;  %v2959_v19 = vmul.f32 %v6162_v26, %v8251_v25 }
 0x67e   : > { %v2888_v57 = vpop.xlane.xlu0 %2887  ;;  %v3282_v8 = vmul.f32 %v8268_v34, %v3191_v11 }
 0x67f   : > { %6163 = vrcp.f32 %v2888_v57  ;;  %5785 = vmatmul.msk.f32.gmra.mxu0 %vm2612_vm10, %v2959_v19 }
 0x680   : > { %v8368_v46 = vsub.f32 %v8257_v43, %v3282_v8 }
 0x682   : > { %v3346_v39 = vmul.f32 %v8368_v46, %v8368_v46 }
 0x684   : > { %v3388_v40 = vsel %vm882_vm0, %v3346_v39, 0.0 }
 0x685   : > { %v6164_v1 = vpop.eup %6163  ;;  %3389 = vadd.xlane.f32.xlu1 %v3388_v40  ;;  %v3194_v28 = vpop.xlane.xlu1 %3193  ;;  %v8409_v40 = vadd.f32 %v3120_v6, %v7347_v55 }
 0x686   : > { %v2891_v48 = vpop.xlane.xlu2 %2890  ;;  %v3283_v25 = vmul.f32 %v8268_v34, %v3194_v28  ;;  %v2960_v37 = vmul.f32 %v6164_v1, %v8262_v51  ;;  %v3210_v51 = vsel %vm882_vm0, %v8376_v0, 0.0 }
 0x687   : > { %6165 = vrcp.f32 %v2891_v48  ;;  %v3216_v55 = vsel %vm882_vm0, %v8409_v40, 0.0 }
 0x688   : > { %v8379_v43 = vsub.f32 %v8271_v21, %v3283_v25  ;;  %5786 = vmatmul.msk.f32.gmra.mxu0 %vm2612_vm10, %v2960_v37 }
 0x689   : > { %v3375_v41 = vpop.xlane.xlu0 %3374 }
 0x68a   : > { %v3469_v47 = vmul.f32 %v3375_v41, %v8268_v34  ;;  %v3347_v42 = vmul.f32 %v8379_v43, %v8379_v43 }
 0x68c   : > { %v3501_v24 = vadd.f32 1e-05, %v3469_v47  ;;  %v3391_v12 = vsel %vm882_vm0, %v3347_v42, 0.0  ;;  %v3123_v47 = vpop.f32.mrf.mxu0 }
 0x68d   : > { %v6166_v22 = vpop.eup %6165  ;;  %3211 = vadd.xlane.f32.xlu1 %v3210_v51  ;;  %3392 = vadd.xlane.f32.xlu0 %v3391_v12  ;;  %v3197_v21 = vpop.xlane.xlu1 %3196 }
 0x68e   : > { %6167 = vrsqrt.f32 %v3501_v24  ;;  %v3284_v32 = vmul.f32 %v8268_v34, %v3197_v21  ;;  %v2961_v4 = vmul.f32 %v6166_v22, %v8277_v14  ;;  %vm3539_vm12 = vweird.f32 %v3501_v24  ;;  %v8427_v21 = vld [vmem:[%s9571_s16] ss:$0 sm:$0xff] }
 0x68f   : > { %v2894_v7 = vpop.xlane.xlu2 %2893 }
 0x690   : > { %6169 = vrcp.f32 %v2894_v7  ;;  %v8394_v27 = vsub.f32 %v8289_v23, %v3284_v32  ;;  %5787 = vmatmul.msk.f32.gmra.mxu0 %vm2612_vm10, %v2961_v4 }
 0x691   : > { %v3378_v5 = vpop.xlane.xlu0 %3377 }
 0x692   : > { %v3470_v59 = vmul.f32 %v3378_v5, %v8268_v34  ;;  %v3348_v38 = vmul.f32 %v8394_v27, %v8394_v27 }
 0x694   : > { %v6168_v61 = vpop.eup %6167  ;;  %v8400_v26 = vadd.f32 1e-05, %v3470_v59  ;;  %v3394_v14 = vsel %vm882_vm0, %v3348_v38, 0.0  ;;  %v8433_v59 = vadd.f32 %v3123_v47, %v7338_v36  ;;  %v8438_v38 = vld [vmem:[%s9572_s17] ss:$0 sm:$0xff] }
 0x695   : > { %v3534_v11 = vmul.f32 %v6168_v61, %v3501_v24  ;;  %3214 = vadd.xlane.f32.xlu0 %v3213_v30  ;;  %3395 = vadd.xlane.f32.xlu2 %v3394_v14  ;;  %v3200_v23 = vpop.xlane.xlu1 %3199  ;;  %vm3540_vm11 = vweird.f32 %v6168_v61 }
 0x696   : > { %v6170_v19 = vpop.eup %6169  ;;  %6171 = vrsqrt.f32 %v8400_v26  ;;  %v3285_v57 = vmul.f32 %v8268_v34, %v3200_v23  ;;  %vm3541_vm13 = vmor %vm3539_vm12, %vm3540_vm11  ;;  %vm3549_vm15 = vweird.f32 %v8400_v26 }
 0x697   : > { %v3535_v8 = vmul.f32 %v6168_v61, %v3534_v11  ;;  %v2897_v31 = vpop.xlane.xlu2 %2896  ;;  %v2962_v39 = vmul.f32 %v6170_v19, %v8301_v45 }
 0x698   : > { %6173 = vrcp.f32 %v2897_v31  ;;  %v8412_v1 = vsub.f32 %v8308_v15, %v3285_v57  ;;  %v3126_v31 = vpop.f32.mrf.mxu0 }
 0x699   : > { %v3536_v28 = vmul.f32 0.5, %v3535_v8  ;;  %5788 = vmatmul.msk.f32.gmra.mxu0 %vm2612_vm10, %v2962_v39  ;;  %v3381_v48 = vpop.xlane.xlu0 %3380 }
 0x69a   : > { %v3471_v25 = vmul.f32 %v3381_v48, %v8268_v34  ;;  %v3349_v37 = vmul.f32 %v8412_v1, %v8412_v1 }
 0x69b   : > { %v3537_v63 = vsub.f32 1.5, %v3536_v28 }
 0x69c   : > { %v6172_v41 = vpop.eup %6171  ;;  %v8418_v45 = vadd.f32 1e-05, %v3471_v25  ;;  %v3397_v15 = vsel %vm882_vm0, %v3349_v37, 0.0 }
 0x69d   : > { %v3538_v42 = vmul.f32 %v6168_v61, %v3537_v63  ;;  %v3544_v51 = vmul.f32 %v6172_v41, %v8400_v26  ;;  %3217 = vadd.xlane.f32.xlu2 %v3216_v55  ;;  %3398 = vadd.xlane.f32.xlu1 %v3397_v15  ;;  %v3203_v12 = vpop.xlane.xlu1 %3202  ;;  %vm3550_vm14 = vweird.f32 %v6172_v41  ;;  %v8457_v15 = vadd.f32 %v3126_v31, %v7627_v33 }
 0x69e   : > { %v6174_v22 = vpop.eup %6173  ;;  %6175 = vrsqrt.f32 %v8418_v45  ;;  %v3286_v32 = vmul.f32 %v8268_v34, %v3203_v12  ;;  %vm3551_vm1 = vmor %vm3549_vm15, %vm3550_vm14  ;;  %vm3559_vm4 = vweird.f32 %v8418_v45 }
 0x69f   : > { %v3542_v7 = vsel %vm3541_vm13, %v6168_v61, %v3538_v42  ;;  %v3545_v4 = vmul.f32 %v6172_v41, %v3544_v51  ;;  %v2900_v5 = vpop.xlane.xlu2 %2899  ;;  %v2963_v24 = vmul.f32 %v6174_v22, %v8320_v58 }
 0x6a0   : > { %v3853_v6 = vmul.f32 %v3542_v7, %v8280_v13  ;;  %6177 = vrcp.f32 %v2900_v5  ;;  %v8442_v30 = vsub.f32 %v8327_v2, %v3286_v32  ;;  %v3219_v2 = vsel %vm882_vm0, %v8433_v59, 0.0 }
 0x6a1   : > { %v3546_v14 = vmul.f32 0.5, %v3545_v4  ;;  %5789 = vmatmul.msk.f32.gmra.mxu0 %vm2612_vm10, %v2963_v24  ;;  %v3384_v61 = vpop.xlane.xlu0 %3383 }
 0x6a2   : > { %v3889_v58 = vmul.f32 %v8427_v21, %v3853_v6  ;;  %v3472_v36 = vmul.f32 %v3384_v61, %v8268_v34  ;;  %v3350_v11 = vmul.f32 %v8442_v30, %v8442_v30  ;;  %v3129_v61 = vpop.f32.mrf.mxu0 }
 0x6a3   : > { %v3547_v23 = vsub.f32 1.5, %v3546_v14 }
 0x6a4   : > { %v6176_v19 = vpop.eup %6175  ;;  %v3925_v13 = vadd.f32 %v8438_v38, %v3889_v58  ;;  %v3504_v57 = vadd.f32 1e-05, %v3472_v36  ;;  %v3400_v8 = vsel %vm882_vm0, %v3350_v11, 0.0  ;;  %v8480_v11 = vadd.f32 %v3129_v61, %v7619_v50 }
 0x6a5   : > { %v3548_v39 = vmul.f32 %v6172_v41, %v3547_v23  ;;  %v3554_v28 = vmul.f32 %v6176_v19, %v8418_v45  ;;  %3220 = vadd.xlane.f32.xlu1 %v3219_v2  ;;  %3401 = vadd.xlane.f32.xlu0 %v3400_v8  ;;  %vm3560_vm3 = vweird.f32 %v6176_v19 }
 0x6a6   : > { %v6178_v48 = vpop.eup %6177  ;;  %v3957_v25 = vmul.f32 0.25, %v3925_v13  ;;  %6179 = vrsqrt.f32 %v3504_v57  ;;  %vm3561_vm5 = vmor %vm3559_vm4, %vm3560_vm3  ;;  %vm3569_vm7 = vweird.f32 %v3504_v57  ;;  %v3225_v8 = vsel %vm882_vm0, %v8480_v11, 0.0 }
 0x6a7   : > { %v3552_v37 = vsel %vm3551_vm1, %v6172_v41, %v3548_v39  ;;  %v3555_v63 = vmul.f32 %v6176_v19, %v3554_v28  ;;  %v2964_v55 = vmul.f32 %v6178_v48, %v8336_v16 }
 0x6a8   : > { %v3854_v47 = vmul.f32 %v3552_v37, %v8297_v44  ;;  %5807 = vmatmul.msk.f32.vlgmr.msra.gmra.mxu3 %vm882_vm0, %v3957_v25  ;;  %5855 = vmatmul.msk.f32.vlgmr.msrb.gmra.mxu1 %vm882_vm0, %v3957_v25  ;;  %v3222_v44 = vsel %vm882_vm0, %v8457_v15, 0.0 }
 0x6a9   : > { %v3556_v26 = vmul.f32 0.5, %v3555_v63  ;;  %5790 = vmatmul.msk.f32.gmra.mxu0 %vm2612_vm10, %v2964_v55  ;;  %v3206_v42 = vpop.xlane.xlu0 %3205 }
 0x6aa   : > { %v3287_v51 = vmul.f32 %v8268_v34, %v3206_v42  ;;  %v3890_v41 = vmul.f32 %v8427_v21, %v3854_v47  ;;  %v3132_v42 = vpop.f32.mrf.mxu0 }
 0x6ab   : > { %v3557_v12 = vsub.f32 1.5, %v3556_v26 }
 0x6ac   : > { %v6180_v16 = vpop.eup %6179  ;;  %v8466_v33 = vsub.f32 %v8344_v62, %v3287_v51  ;;  %v3926_v22 = vadd.f32 %v8438_v38, %v3890_v41 }
 0x6ad   : > { %v3558_v32 = vmul.f32 %v6176_v19, %v3557_v12  ;;  %v3564_v7 = vmul.f32 %v6180_v16, %v3504_v57  ;;  %3223 = vadd.xlane.f32.xlu0 %v3222_v44  ;;  %vm3570_vm6 = vweird.f32 %v6180_v16 }
 0x6ae   : > { %v3958_v4 = vmul.f32 0.25, %v3926_v22  ;;  %v3351_v5 = vmul.f32 %v8466_v33, %v8466_v33  ;;  %vm3571_vm8 = vmor %vm3569_vm7, %vm3570_vm6 }
 0x6af   : > { %v3562_v24 = vsel %vm3561_vm5, %v6176_v19, %v3558_v32  ;;  %v3565_v6 = vmul.f32 %v6180_v16, %v3564_v7 }
 0x6b0   : > { %v3855_v62 = vmul.f32 %v3562_v24, %v8316_v20  ;;  %5808 = vmatmul.msk.f32.gmra.mxu3 %vm882_vm0, %v3958_v4  ;;  %5856 = vmatmul.msk.f32.gmra.mxu1 %vm882_vm0, %v3958_v4  ;;  %v3403_v14 = vsel %vm882_vm0, %v3351_v5, 0.0  ;;  %v8503_v4 = vadd.f32 %v3132_v42, %v7615_v29 }
 0x6b1   : > { %v3566_v58 = vmul.f32 0.5, %v3565_v6  ;;  %3404 = vadd.xlane.f32.xlu2 %v3403_v14 }
 0x6b2   : > { %v3891_v45 = vmul.f32 %v8427_v21, %v3855_v62  ;;  %v3135_v5 = vpop.f32.mrf.mxu0 }
 0x6b3   : > { %v3567_v36 = vsub.f32 1.5, %v3566_v58  ;;  %v3228_v58 = vsel %vm882_vm0, %v8503_v4, 0.0 }
 0x6b4   : > { %v3927_v23 = vadd.f32 %v8438_v38, %v3891_v45 }
 0x6b5   : > { %v3568_v19 = vmul.f32 %v6180_v16, %v3567_v36 }
 0x6b6   : > { %v3959_v20 = vmul.f32 0.25, %v3927_v23 }
 0x6b7   : > { %v3572_v13 = vsel %vm3571_vm8, %v6180_v16, %v3568_v19 }
 0x6b8   : > { %v3856_v2 = vmul.f32 %v3572_v13, %v8332_v35  ;;  %5809 = vmatmul.msk.f32.gmra.mxu3 %vm882_vm0, %v3959_v20  ;;  %5857 = vmatmul.msk.f32.gmra.mxu1 %vm882_vm0, %v3959_v20 }
 0x6b9   : > { %3226 = vadd.xlane.f32.xlu2 %v3225_v8 }
 0x6ba   : > { %v3892_v50 = vmul.f32 %v8427_v21, %v3856_v2 }
 0x6bc   : > { %v3928_v31 = vadd.f32 %v8438_v38, %v3892_v50 }
 0x6be   : > { %v3960_v39 = vmul.f32 0.25, %v3928_v31 }
 0x6c0   : > { %5810 = vmatmul.msk.f32.gmra.mxu3 %vm882_vm0, %v3960_v39  ;;  %5858 = vmatmul.msk.f32.gmra.mxu1 %vm882_vm0, %v3960_v39 }
 0x6e2   : > { %v3387_v57 = vpop.xlane.xlu2 %3386 }
 0x6e3   : > { %v3473_v35 = vmul.f32 %v3387_v57, %v8268_v34  ;;  %v3138_v57 = vpop.f32.mrf.mxu0 }
 0x6e5   : > { %v3505_v28 = vadd.f32 1e-05, %v3473_v35 }
 0x6e7   : > { %6181 = vrsqrt.f32 %v3505_v28  ;;  %vm3579_vm10 = vweird.f32 %v3505_v28 }
 0x6ea   : > { %v3209_v48 = vpop.xlane.xlu2 %3208 }
 0x6eb   : > { %v3288_v37 = vmul.f32 %v8268_v34, %v3209_v48  ;;  %v8522_v48 = vadd.f32 %v3135_v5, %v7611_v9 }
 0x6ed   : > { %v6182_v25 = vpop.eup %6181  ;;  %v8495_v47 = vsub.f32 %v8360_v3, %v3288_v37  ;;  %v3231_v9 = vsel %vm882_vm0, %v8522_v48, 0.0 }
 0x6ee   : > { %v3574_v63 = vmul.f32 %v6182_v25, %v3505_v28  ;;  %vm3580_vm9 = vweird.f32 %v6182_v25 }
 0x6ef   : > { %v3352_v41 = vmul.f32 %v8495_v47, %v8495_v47  ;;  %vm3581_vm2 = vmor %vm3579_vm10, %vm3580_vm9 }
 0x6f0   : > { %v3575_v55 = vmul.f32 %v6182_v25, %v3574_v63 }
 0x6f1   : > { %v3406_v22 = vsel %vm882_vm0, %v3352_v41, 0.0 }
 0x6f2   : > { %v3576_v26 = vmul.f32 0.5, %v3575_v55  ;;  %3407 = vadd.xlane.f32.xlu1 %v3406_v22 }
 0x6f4   : > { %v3577_v51 = vsub.f32 1.5, %v3576_v26 }
 0x6f6   : > { %v3578_v12 = vmul.f32 %v6182_v25, %v3577_v51 }
 0x6f8   : > { %v3390_v16 = vpop.xlane.xlu1 %3389  ;;  %v3582_v32 = vsel %vm3581_vm2, %v6182_v25, %v3578_v12 }
 0x6f9   : > { %v3474_v44 = vmul.f32 %v3390_v16, %v8268_v34  ;;  %v3857_v3 = vmul.f32 %v3582_v32, %v8354_v10 }
 0x6fa   : > { %3229 = vadd.xlane.f32.xlu1 %v3228_v58 }
 0x6fb   : > { %v3506_v7 = vadd.f32 1e-05, %v3474_v44  ;;  %v3893_v24 = vmul.f32 %v8427_v21, %v3857_v3 }
 0x6fd   : > { %6183 = vrsqrt.f32 %v3506_v7  ;;  %v3929_v45 = vadd.f32 %v8438_v38, %v3893_v24  ;;  %vm3589_vm12 = vweird.f32 %v3506_v7 }
 0x6ff   : > { %v3961_v23 = vmul.f32 0.25, %v3929_v45 }
 0x700   : > { %v3393_v6 = vpop.xlane.xlu0 %3392  ;;  %v3212_v62 = vpop.xlane.xlu1 %3211 }
 0x701   : > { %v3475_v14 = vmul.f32 %v3393_v6, %v8268_v34  ;;  %v3289_v61 = vmul.f32 %v8268_v34, %v3212_v62  ;;  %5811 = vmatmul.msk.f32.gmra.mxu3 %vm882_vm0, %v3961_v23  ;;  %5859 = vmatmul.msk.f32.gmra.mxu1 %vm882_vm0, %v3961_v23 }
 0x703   : > { %v6184_v10 = vpop.eup %6183  ;;  %v3507_v36 = vadd.f32 1e-05, %v3475_v14  ;;  %v8512_v29 = vsub.f32 %v8376_v0, %v3289_v61  ;;  %v3141_v14 = vpop.f32.mrf.mxu0 }
 0x704   : > { %v3584_v19 = vmul.f32 %v6184_v10, %v3506_v7  ;;  %vm3590_vm11 = vweird.f32 %v6184_v10 }
 0x705   : > { %6185 = vrsqrt.f32 %v3507_v36  ;;  %v3353_v20 = vmul.f32 %v8512_v29, %v8512_v29  ;;  %vm3591_vm13 = vmor %vm3589_vm12, %vm3590_vm11  ;;  %vm3599_vm15 = vweird.f32 %v3507_v36 }
 0x706   : > { %v3585_v13 = vmul.f32 %v6184_v10, %v3584_v19 }
 0x707   : > { %v3409_v2 = vsel %vm882_vm0, %v3353_v20, 0.0 }
 0x708   : > { %v3586_v8 = vmul.f32 0.5, %v3585_v13  ;;  %v3215_v50 = vpop.xlane.xlu0 %3214  ;;  %v3396_v31 = vpop.xlane.xlu2 %3395  ;;  %3410 = vadd.xlane.f32.xlu0 %v3409_v2 }
 0x709   : > { %v3290_v0 = vmul.f32 %v8268_v34, %v3215_v50  ;;  %v3476_v39 = vmul.f32 %v3396_v31, %v8268_v34 }
 0x70a   : > { %v3587_v35 = vsub.f32 1.5, %v3586_v8 }
 0x70b   : > { %v6186_v28 = vpop.eup %6185  ;;  %v8525_v25 = vsub.f32 %v8391_v18, %v3290_v0  ;;  %v3508_v37 = vadd.f32 1e-05, %v3476_v39  ;;  %v8558_v39 = vadd.f32 %v3141_v14, %v7578_v17 }
 0x70c   : > { %v3588_v63 = vmul.f32 %v6184_v10, %v3587_v35  ;;  %v3594_v55 = vmul.f32 %v6186_v28, %v3507_v36  ;;  %vm3600_vm14 = vweird.f32 %v6186_v28 }
 0x70d   : > { %6187 = vrsqrt.f32 %v3508_v37  ;;  %v3354_v26 = vmul.f32 %v8525_v25, %v8525_v25  ;;  %vm3601_vm1 = vmor %vm3599_vm15, %vm3600_vm14  ;;  %vm3609_vm4 = vweird.f32 %v3508_v37 }
 0x70e   : > { %v3592_v42 = vsel %vm3591_vm13, %v6184_v10, %v3588_v63  ;;  %v3595_v51 = vmul.f32 %v6186_v28, %v3594_v55 }
 0x70f   : > { %v3858_v41 = vmul.f32 %v3592_v42, %v8368_v46  ;;  %v3412_v12 = vsel %vm882_vm0, %v3354_v26, 0.0  ;;  %v8537_v46 = vadd.f32 %v3138_v57, %v7604_v54 }
 0x710   : > { %v3596_v18 = vmul.f32 0.5, %v3595_v51  ;;  %3413 = vadd.xlane.f32.xlu2 %v3412_v12  ;;  %v3218_v16 = vpop.xlane.xlu2 %3217  ;;  %3232 = vadd.xlane.f32.xlu0 %v3231_v9  ;;  %v3399_v44 = vpop.xlane.xlu1 %3398 }
 0x711   : > { %v3291_v22 = vmul.f32 %v8268_v34, %v3218_v16  ;;  %v3477_v32 = vmul.f32 %v3399_v44, %v8268_v34  ;;  %v3894_v3 = vmul.f32 %v8427_v21, %v3858_v41  ;;  %v3234_v19 = vsel %vm882_vm0, %v8537_v46, 0.0  ;;  %v3144_v51 = vpop.f32.mrf.mxu0 }
 0x712   : > { %v3597_v7 = vsub.f32 1.5, %v3596_v18 }
 0x713   : > { %v6188_v5 = vpop.eup %6187  ;;  %v8540_v24 = vsub.f32 %v8409_v40, %v3291_v22  ;;  %v8542_v6 = vadd.f32 1e-05, %v3477_v32  ;;  %v3930_v62 = vadd.f32 %v8438_v38, %v3894_v3  ;;  %v8576_v32 = vadd.f32 %v3144_v51, %v7561_v49 }
 0x714   : > { %v3598_v61 = vmul.f32 %v6186_v28, %v3597_v7  ;;  %v3604_v58 = vmul.f32 %v6188_v5, %v3508_v37  ;;  %vm3610_vm3 = vweird.f32 %v6188_v5 }
 0x715   : > { %6189 = vrsqrt.f32 %v8542_v6  ;;  %v3962_v45 = vmul.f32 0.25, %v3930_v62  ;;  %v3355_v10 = vmul.f32 %v8540_v24, %v8540_v24  ;;  %vm3611_vm5 = vmor %vm3609_vm4, %vm3610_vm3  ;;  %vm3619_vm7 = vweird.f32 %v8542_v6 }
 0x716   : > { %v3602_v54 = vsel %vm3601_vm1, %v6186_v28, %v3598_v61  ;;  %v3605_v23 = vmul.f32 %v6188_v5, %v3604_v58 }
 0x717   : > { %v3859_v40 = vmul.f32 %v3602_v54, %v8379_v43  ;;  %5812 = vmatmul.msk.f32.gmra.mxu3 %vm882_vm0, %v3962_v45  ;;  %5860 = vmatmul.msk.f32.gmra.mxu1 %vm882_vm0, %v3962_v45  ;;  %v3415_v36 = vsel %vm882_vm0, %v3355_v10, 0.0 }
 0x718   : > { %v3606_v20 = vmul.f32 0.5, %v3605_v23  ;;  %3235 = vadd.xlane.f32.xlu2 %v3234_v19  ;;  %3416 = vadd.xlane.f32.xlu1 %v3415_v36  ;;  %v3402_v13 = vpop.xlane.xlu0 %3401  ;;  %v3221_v2 = vpop.xlane.xlu1 %3220  ;;  %v3240_v23 = vsel %vm882_vm0, %v8576_v32, 0.0 }
 0x719   : > { %v3478_v8 = vmul.f32 %v3402_v13, %v8268_v34  ;;  %v3292_v50 = vmul.f32 %v8268_v34, %v3221_v2  ;;  %v3895_v43 = vmul.f32 %v8427_v21, %v3859_v40  ;;  %v3147_v40 = vpop.f32.mrf.mxu0 }
 0x71a   : > { %v3607_v31 = vsub.f32 1.5, %v3606_v20 }
 0x71b   : > { %v6190_v0 = vpop.eup %6189  ;;  %v3510_v57 = vadd.f32 1e-05, %v3478_v8  ;;  %v8561_v35 = vsub.f32 %v8433_v59, %v3292_v50  ;;  %v3931_v28 = vadd.f32 %v8438_v38, %v3895_v43  ;;  %v3237_v59 = vsel %vm882_vm0, %v8558_v39, 0.0 }
 0x71c   : > { %v3608_v63 = vmul.f32 %v6188_v5, %v3607_v31  ;;  %v3614_v55 = vmul.f32 %v6190_v0, %v8542_v6  ;;  %vm3620_vm6 = vweird.f32 %v6190_v0 }
 0x71d   : > { %6191 = vrsqrt.f32 %v3510_v57  ;;  %v3963_v26 = vmul.f32 0.25, %v3931_v28  ;;  %v3356_v42 = vmul.f32 %v8561_v35, %v8561_v35  ;;  %vm3621_vm8 = vmor %vm3619_vm7, %vm3620_vm6  ;;  %vm3629_vm10 = vweird.f32 %v3510_v57 }
 0x71e   : > { %v3612_v41 = vsel %vm3611_vm5, %v6188_v5, %v3608_v63  ;;  %v3615_v17 = vmul.f32 %v6190_v0, %v3614_v55 }
 0x71f   : > { %v3860_v12 = vmul.f32 %v3612_v41, %v8394_v27  ;;  %5813 = vmatmul.msk.f32.gmra.mxu3 %vm882_vm0, %v3963_v26  ;;  %5861 = vmatmul.msk.f32.gmra.mxu1 %vm882_vm0, %v3963_v26  ;;  %v3418_v37 = vsel %vm882_vm0, %v3356_v42, 0.0 }
 0x720   : > { %v3616_v9 = vmul.f32 0.5, %v3615_v17  ;;  %3238 = vadd.xlane.f32.xlu1 %v3237_v59  ;;  %v3224_v18 = vpop.xlane.xlu0 %3223  ;;  %3419 = vadd.xlane.f32.xlu0 %v3418_v37 }
 0x721   : > { %v3293_v16 = vmul.f32 %v8268_v34, %v3224_v18  ;;  %v3896_v44 = vmul.f32 %v8427_v21, %v3860_v12  ;;  %v3150_v51 = vpop.f32.mrf.mxu0 }
 0x722   : > { %v3617_v22 = vsub.f32 1.5, %v3616_v9  ;;  %v8612_v59 = vadd.f32 %v3150_v51, %v7520_v60 }
 0x723   : > { %v6192_v27 = vpop.eup %6191  ;;  %v8579_v3 = vsub.f32 %v8457_v15, %v3293_v16  ;;  %v3932_v7 = vadd.f32 %v8438_v38, %v3896_v44 }
 0x724   : > { %v3618_v5 = vmul.f32 %v6190_v0, %v3617_v22  ;;  %v3624_v62 = vmul.f32 %v6192_v27, %v3510_v57  ;;  %v3405_v14 = vpop.xlane.xlu2 %3404  ;;  %vm3630_vm9 = vweird.f32 %v6192_v27  ;;  %v3246_v16 = vsel %vm882_vm0, %v8612_v59, 0.0 }
 0x725   : > { %v3479_v61 = vmul.f32 %v3405_v14, %v8268_v34  ;;  %v3964_v58 = vmul.f32 0.25, %v3932_v7  ;;  %v3357_v45 = vmul.f32 %v8579_v3, %v8579_v3  ;;  %vm3631_vm2 = vmor %vm3629_vm10, %vm3630_vm9 }
 0x726   : > { %v3622_v10 = vsel %vm3621_vm8, %v6190_v0, %v3618_v5  ;;  %v3625_v49 = vmul.f32 %v6192_v27, %v3624_v62 }
 0x727   : > { %v3861_v54 = vmul.f32 %v3622_v10, %v8412_v1  ;;  %v3511_v15 = vadd.f32 1e-05, %v3479_v61  ;;  %5814 = vmatmul.msk.f32.gmra.mxu3 %vm882_vm0, %v3964_v58  ;;  %5862 = vmatmul.msk.f32.gmra.mxu1 %vm882_vm0, %v3964_v58  ;;  %v3421_v6 = vsel %vm882_vm0, %v3357_v45, 0.0  ;;  %v8594_v1 = vadd.f32 %v3147_v40, %v7543_v52 }
 0x728   : > { %v3626_v19 = vmul.f32 0.5, %v3625_v49  ;;  %3422 = vadd.xlane.f32.xlu2 %v3421_v6  ;;  %3241 = vadd.xlane.f32.xlu0 %v3240_v23 }
 0x729   : > { %6193 = vrsqrt.f32 %v3511_v15  ;;  %v3897_v36 = vmul.f32 %v8427_v21, %v3861_v54  ;;  %v3243_v52 = vsel %vm882_vm0, %v8594_v1, 0.0  ;;  %vm3639_vm12 = vweird.f32 %v3511_v15  ;;  %v3153_v61 = vpop.f32.mrf.mxu0 }
 0x72a   : > { %v3627_v20 = vsub.f32 1.5, %v3626_v19 }
 0x72b   : > { %v3933_v13 = vadd.f32 %v8438_v38, %v3897_v36  ;;  %v8633_v36 = vadd.f32 %v3153_v61, %v7500_v53 }
 0x72c   : > { %v3628_v2 = vmul.f32 %v6192_v27, %v3627_v20  ;;  %v3227_v8 = vpop.xlane.xlu2 %3226 }
 0x72d   : > { %v3294_v50 = vmul.f32 %v8268_v34, %v3227_v8  ;;  %v3965_v43 = vmul.f32 0.25, %v3933_v13 }
 0x72e   : > { %v3632_v31 = vsel %vm3631_vm2, %v6192_v27, %v3628_v2 }
 0x72f   : > { %v6194_v0 = vpop.eup %6193  ;;  %v3862_v28 = vmul.f32 %v3632_v31, %v8442_v30  ;;  %v8600_v63 = vsub.f32 %v8480_v11, %v3294_v50  ;;  %5815 = vmatmul.msk.f32.gmra.mxu3 %vm882_vm0, %v3965_v43  ;;  %5863 = vmatmul.msk.f32.gmra.mxu1 %vm882_vm0, %v3965_v43 }
 0x730   : > { %v3634_v57 = vmul.f32 %v6194_v0, %v3511_v15  ;;  %3244 = vadd.xlane.f32.xlu2 %v3243_v52  ;;  %vm3640_vm11 = vweird.f32 %v6194_v0 }
 0x731   : > { %v3358_v55 = vmul.f32 %v8600_v63, %v8600_v63  ;;  %v3898_v26 = vmul.f32 %v8427_v21, %v3862_v28  ;;  %vm3641_vm13 = vmor %vm3639_vm12, %vm3640_vm11  ;;  %v3156_v20 = vpop.f32.mrf.mxu0 }
 0x732   : > { %v3635_v42 = vmul.f32 %v6194_v0, %v3634_v57 }
 0x733   : > { %v3424_v30 = vsel %vm882_vm0, %v3358_v55, 0.0  ;;  %v3934_v11 = vadd.f32 %v8438_v38, %v3898_v26 }
 0x734   : > { %v3636_v41 = vmul.f32 0.5, %v3635_v42  ;;  %3425 = vadd.xlane.f32.xlu1 %v3424_v30 }
 0x735   : > { %v3966_v17 = vmul.f32 0.25, %v3934_v11 }
 0x736   : > { %v3637_v12 = vsub.f32 1.5, %v3636_v41 }
 0x737   : > { %5816 = vmatmul.msk.f32.gmra.mxu3 %vm882_vm0, %v3966_v17  ;;  %5864 = vmatmul.msk.f32.gmra.mxu1 %vm882_vm0, %v3966_v17 }
 0x738   : > { %v3638_v37 = vmul.f32 %v6194_v0, %v3637_v12 }
 0x73a   : > { %v3642_v9 = vsel %vm3641_vm13, %v6194_v0, %v3638_v37  ;;  %v3249_v0 = vsel %vm882_vm0, %v8633_v36, 0.0  ;;  %v3159_v37 = vpop.f32.mrf.mxu0 }
 0x73b   : > { %v3863_v18 = vmul.f32 %v3642_v9, %v8466_v33 }
 0x73c   : > { %3247 = vadd.xlane.f32.xlu1 %v3246_v16  ;;  %v8653_v16 = vadd.f32 %v3156_v20, %v7475_v56 }
 0x73d   : > { %v3899_v44 = vmul.f32 %v8427_v21, %v3863_v18 }
 0x73e   : > { %v3252_v56 = vsel %vm882_vm0, %v8653_v16, 0.0 }
 0x73f   : > { %v3935_v22 = vadd.f32 %v8438_v38, %v3899_v44 }
 0x741   : > { %v3967_v60 = vmul.f32 0.25, %v3935_v22 }
 0x742   : > { %v3162_v20 = vpop.f32.mrf.mxu0 }
 0x743   : > { %5817 = vmatmul.msk.f32.gmra.mxu3 %vm882_vm0, %v3967_v60  ;;  %5865 = vmatmul.msk.f32.gmra.mxu1 %vm882_vm0, %v3967_v60 }
 0x765   : > { %v3408_v27 = vpop.xlane.xlu1 %3407 }
 0x766   : > { %v3480_v7 = vmul.f32 %v3408_v27, %v8268_v34 }
 0x768   : > { %v3512_v5 = vadd.f32 1e-05, %v3480_v7 }
 0x76a   : > { %6195 = vrsqrt.f32 %v3512_v5  ;;  %vm3649_vm15 = vweird.f32 %v3512_v5 }
 0x76d   : > { %v3230_v62 = vpop.xlane.xlu1 %3229 }
 0x76e   : > { %v3295_v33 = vmul.f32 %v8268_v34, %v3230_v62 }
 0x770   : > { %v6196_v14 = vpop.eup %6195  ;;  %v8626_v58 = vsub.f32 %v8503_v4, %v3295_v33 }
 0x771   : > { %v3644_v45 = vmul.f32 %v6196_v14, %v3512_v5  ;;  %vm3650_vm14 = vweird.f32 %v6196_v14 }
 0x772   : > { %v3359_v10 = vmul.f32 %v8626_v58, %v8626_v58  ;;  %vm3651_vm1 = vmor %vm3649_vm15, %vm3650_vm14 }
 0x773   : > { %v3645_v49 = vmul.f32 %v6196_v14, %v3644_v45 }
 0x774   : > { %v3427_v6 = vsel %vm882_vm0, %v3359_v10, 0.0 }
 0x775   : > { %v3646_v23 = vmul.f32 0.5, %v3645_v49  ;;  %3428 = vadd.xlane.f32.xlu0 %v3427_v6 }
 0x777   : > { %v3647_v19 = vsub.f32 1.5, %v3646_v23 }
 0x779   : > { %v3648_v4 = vmul.f32 %v6196_v14, %v3647_v19 }
 0x77b   : > { %v3411_v54 = vpop.xlane.xlu0 %3410  ;;  %v3652_v13 = vsel %vm3651_vm1, %v6196_v14, %v3648_v4 }
 0x77c   : > { %v3481_v15 = vmul.f32 %v3411_v54, %v8268_v34  ;;  %v3864_v50 = vmul.f32 %v3652_v13, %v8495_v47 }
 0x77d   : > { %3250 = vadd.xlane.f32.xlu0 %v3249_v0 }
 0x77e   : > { %v3513_v40 = vadd.f32 1e-05, %v3481_v15  ;;  %v3900_v57 = vmul.f32 %v8427_v21, %v3864_v50 }
 0x780   : > { %6197 = vrsqrt.f32 %v3513_v40  ;;  %v3936_v26 = vadd.f32 %v8438_v38, %v3900_v57  ;;  %vm3659_vm4 = vweird.f32 %v3513_v40 }
 0x782   : > { %v3968_v11 = vmul.f32 0.25, %v3936_v26 }
 0x783   : > { %v3414_v2 = vpop.xlane.xlu2 %3413  ;;  %v3233_v8 = vpop.xlane.xlu0 %3232 }
 0x784   : > { %v3482_v43 = vmul.f32 %v3414_v2, %v8268_v34  ;;  %v3296_v31 = vmul.f32 %v8268_v34, %v3233_v8  ;;  %5818 = vmatmul.msk.f32.gmra.mxu3 %vm882_vm0, %v3968_v11  ;;  %5866 = vmatmul.msk.f32.gmra.mxu1 %vm882_vm0, %v3968_v11  ;;  %v9595_v11 = vld [vmem:[#allocation6_spill] sm:$0xff] }
 0x786   : > { %v6198_v53 = vpop.eup %6197  ;;  %v3514_v28 = vadd.f32 1e-05, %v3482_v43  ;;  %v8641_v52 = vsub.f32 %v8522_v48, %v3296_v31 }
 0x787   : > { %v3654_v55 = vmul.f32 %v6198_v53, %v3513_v40  ;;  %vm3660_vm3 = vweird.f32 %v6198_v53 }
 0x788   : > { %6199 = vrsqrt.f32 %v3514_v28  ;;  %v3360_v47 = vmul.f32 %v8641_v52, %v8641_v52  ;;  %vm3661_vm5 = vmor %vm3659_vm4, %vm3660_vm3  ;;  %vm3669_vm7 = vweird.f32 %v3514_v28 }
 0x789   : > { %v3655_v42 = vmul.f32 %v6198_v53, %v3654_v55 }
 0x78a   : > { %v3430_v30 = vsel %vm882_vm0, %v3360_v47, 0.0 }
 0x78b   : > { %v3656_v51 = vmul.f32 0.5, %v3655_v42  ;;  %v3236_v41 = vpop.xlane.xlu2 %3235  ;;  %3431 = vadd.xlane.f32.xlu2 %v3430_v30  ;;  %v3417_v17 = vpop.xlane.xlu1 %3416 }
 0x78c   : > { %v3297_v48 = vmul.f32 %v8268_v34, %v3236_v41  ;;  %v3483_v12 = vmul.f32 %v3417_v17, %v8268_v34 }
 0x78d   : > { %v3657_v9 = vsub.f32 1.5, %v3656_v51  ;;  %v8689_v51 = vadd.f32 %v3162_v20, %v9595_v11 }
 0x78e   : > { %v6200_v18 = vpop.eup %6199  ;;  %v8656_v44 = vsub.f32 %v8537_v46, %v3297_v48  ;;  %v3515_v22 = vadd.f32 1e-05, %v3483_v12 }
 0x78f   : > { %v3658_v60 = vmul.f32 %v6198_v53, %v3657_v9  ;;  %v3664_v27 = vmul.f32 %v6200_v18, %v3514_v28  ;;  %vm3670_vm6 = vweird.f32 %v6200_v18 }
 0x790   : > { %6201 = vrsqrt.f32 %v3515_v22  ;;  %v3361_v7 = vmul.f32 %v8656_v44, %v8656_v44  ;;  %vm3671_vm8 = vmor %vm3669_vm7, %vm3670_vm6  ;;  %vm3679_vm10 = vweird.f32 %v3515_v22 }
 0x791   : > { %v3662_v5 = vsel %vm3661_vm5, %v6198_v53, %v3658_v60  ;;  %v3665_v62 = vmul.f32 %v6200_v18, %v3664_v27  ;;  %v3165_v60 = vpop.f32.mrf.mxu0 }
 0x792   : > { %v3865_v33 = vmul.f32 %v3662_v5, %v8512_v29  ;;  %v3433_v14 = vsel %vm882_vm0, %v3361_v7, 0.0  ;;  %v9594_v29 = vld [vmem:[#allocation7_spill] sm:$0xff] }
 0x793   : > { %v3666_v46 = vmul.f32 0.5, %v3665_v62  ;;  %3434 = vadd.xlane.f32.xlu1 %v3433_v14  ;;  %3253 = vadd.xlane.f32.xlu2 %v3252_v56  ;;  %v3420_v61 = vpop.xlane.xlu0 %3419  ;;  %v3239_v45 = vpop.xlane.xlu1 %3238  ;;  %v8668_v23 = vadd.f32 %v3159_v37, %v9594_v29 }
 0x794   : > { %v3484_v10 = vmul.f32 %v3420_v61, %v8268_v34  ;;  %v3298_v49 = vmul.f32 %v8268_v34, %v3239_v45  ;;  %v3901_v54 = vmul.f32 %v8427_v21, %v3865_v33  ;;  %v9596_v61 = vld [vmem:[#allocation5_spill] sm:$0xff] }
 0x795   : > { %v3667_v15 = vsub.f32 1.5, %v3666_v46  ;;  %v8707_v45 = vadd.f32 %v3165_v60, %v9596_v61 }
 0x796   : > { %v6202_v6 = vpop.eup %6201  ;;  %v8670_v40 = vadd.f32 1e-05, %v3484_v10  ;;  %v8673_v19 = vsub.f32 %v8558_v39, %v3298_v49  ;;  %v3937_v4 = vadd.f32 %v8438_v38, %v3901_v54  ;;  %v3255_v39 = vsel %vm882_vm0, %v8668_v23, 0.0 }
 0x797   : > { %v3668_v13 = vmul.f32 %v6200_v18, %v3667_v15  ;;  %v3674_v2 = vmul.f32 %v6202_v6, %v3515_v22  ;;  %vm3680_vm9 = vweird.f32 %v6202_v6  ;;  %v3258_v22 = vsel %vm882_vm0, %v8689_v51, 0.0 }
 0x798   : > { %6203 = vrsqrt.f32 %v8670_v40  ;;  %v3969_v8 = vmul.f32 0.25, %v3937_v4  ;;  %v3362_v50 = vmul.f32 %v8673_v19, %v8673_v19  ;;  %vm3681_vm2 = vmor %vm3679_vm10, %vm3680_vm9  ;;  %vm3689_vm12 = vweird.f32 %v8670_v40 }
 0x799   : > { %v3672_v43 = vsel %vm3671_vm8, %v6200_v18, %v3668_v13  ;;  %v3675_v31 = vmul.f32 %v6202_v6, %v3674_v2 }
 0x79a   : > { %v3866_v0 = vmul.f32 %v3672_v43, %v8525_v25  ;;  %5819 = vmatmul.msk.f32.gmra.mxu3 %vm882_vm0, %v3969_v8  ;;  %5867 = vmatmul.msk.f32.gmra.mxu1 %vm882_vm0, %v3969_v8  ;;  %v3436_v53 = vsel %vm882_vm0, %v3362_v50, 0.0  ;;  %v3261_v50 = vsel %vm882_vm0, %v8707_v45, 0.0  ;;  %v3168_v43 = vpop.f32.mrf.mxu0 }
 0x79b   : > { %v3676_v28 = vmul.f32 0.5, %v3675_v31  ;;  %3256 = vadd.xlane.f32.xlu1 %v3255_v39  ;;  %v3423_v57 = vpop.xlane.xlu2 %3422  ;;  %v3242_v55 = vpop.xlane.xlu0 %3241  ;;  %3437 = vadd.xlane.f32.xlu0 %v3436_v53 }
 0x79c   : > { %v3485_v47 = vmul.f32 %v3423_v57, %v8268_v34  ;;  %v3299_v26 = vmul.f32 %v8268_v34, %v3242_v55  ;;  %v3902_v25 = vmul.f32 %v8427_v21, %v3866_v0 }
 0x79d   : > { %v3677_v42 = vsub.f32 1.5, %v3676_v28 }
 0x79e   : > { %v6204_v30 = vpop.eup %6203  ;;  %v3517_v41 = vadd.f32 1e-05, %v3485_v47  ;;  %v8692_v17 = vsub.f32 %v8576_v32, %v3299_v26  ;;  %v3938_v48 = vadd.f32 %v8438_v38, %v3902_v25 }
 0x79f   : > { %v3678_v12 = vmul.f32 %v6202_v6, %v3677_v42  ;;  %v3684_v37 = vmul.f32 %v6204_v30, %v8670_v40  ;;  %vm3690_vm11 = vweird.f32 %v6204_v30 }
 0x7a0   : > { %6205 = vrsqrt.f32 %v3517_v41  ;;  %v3970_v9 = vmul.f32 0.25, %v3938_v48  ;;  %v3363_v18 = vmul.f32 %v8692_v17, %v8692_v17  ;;  %vm3691_vm13 = vmor %vm3689_vm12, %vm3690_vm11  ;;  %vm3699_vm15 = vweird.f32 %v3517_v41 }
 0x7a1   : > { %v3682_v27 = vsel %vm3681_vm2, %v6202_v6, %v3678_v12  ;;  %v3685_v7 = vmul.f32 %v6204_v30, %v3684_v37 }
 0x7a2   : > { %v3867_v5 = vmul.f32 %v3682_v27, %v8540_v24  ;;  %5820 = vmatmul.msk.f32.gmra.mxu3 %vm882_vm0, %v3970_v9  ;;  %5868 = vmatmul.msk.f32.gmra.mxu1 %vm882_vm0, %v3970_v9  ;;  %v3439_v32 = vsel %vm882_vm0, %v3363_v18, 0.0  ;;  %v8740_v18 = vpop.f32.mrf.mxu3  ;;  %v3171_v60 = vpop.f32.mrf.mxu0 }
 0x7a3   : > { %v3686_v62 = vmul.f32 0.5, %v3685_v7  ;;  %v3245_v33 = vpop.xlane.xlu2 %3244  ;;  %3440 = vadd.xlane.f32.xlu2 %v3439_v32  ;;  %3259 = vadd.xlane.f32.xlu0 %v3258_v22  ;;  %v8744_v7 = vpop.f32.mrf.mxu1 }
 0x7a4   : > { %v3300_v14 = vmul.f32 %v8268_v34, %v3245_v33  ;;  %v3903_v56 = vmul.f32 %v8427_v21, %v3867_v5  ;;  %v4407_v22 = vmax.f32 %v8740_v18, %v8744_v7 }
 0x7a5   : > { %v3687_v46 = vsub.f32 1.5, %v3686_v62  ;;  %v9598_v62 = vld [vmem:[#allocation3_spill] sm:$0xff] }
 0x7a6   : > { %v6206_v24 = vpop.eup %6205  ;;  %v8710_v10 = vsub.f32 %v8594_v1, %v3300_v14  ;;  %v3939_v49 = vadd.f32 %v8438_v38, %v3903_v56  ;;  %v8749_v33 = vadd.f32 %v3171_v60, %v9598_v62 }
 0x7a7   : > { %v3688_v54 = vmul.f32 %v6204_v30, %v3687_v46  ;;  %v3694_v15 = vmul.f32 %v6206_v24, %v3517_v41  ;;  %v3426_v6 = vpop.xlane.xlu1 %3425  ;;  %vm3700_vm14 = vweird.f32 %v6206_v24 }
 0x7a8   : > { %v3486_v29 = vmul.f32 %v3426_v6, %v8268_v34  ;;  %v3971_v4 = vmul.f32 0.25, %v3939_v49  ;;  %v3364_v20 = vmul.f32 %v8710_v10, %v8710_v10  ;;  %vm3701_vm1 = vmor %vm3699_vm15, %vm3700_vm14 }
 0x7a9   : > { %v3692_v13 = vsel %vm3691_vm13, %v6204_v30, %v3688_v54  ;;  %v3695_v2 = vmul.f32 %v6206_v24, %v3694_v15 }
 0x7aa   : > { %v3868_v8 = vmul.f32 %v3692_v13, %v8561_v35  ;;  %v3518_v1 = vadd.f32 1e-05, %v3486_v29  ;;  %5821 = vmatmul.msk.f32.gmra.mxu3 %vm882_vm0, %v3971_v4  ;;  %5869 = vmatmul.msk.f32.gmra.mxu1 %vm882_vm0, %v3971_v4  ;;  %v3442_v40 = vsel %vm882_vm0, %v3364_v20, 0.0  ;;  %v9597_v35 = vld [vmem:[#allocation4_spill] sm:$0xff]  ;;  %v8757_v49 = vpop.f32.mrf.mxu3 }
 0x7ab   : > { %v3696_v31 = vmul.f32 0.5, %v3695_v2  ;;  %3443 = vadd.xlane.f32.xlu1 %v3442_v40  ;;  %3262 = vadd.xlane.f32.xlu2 %v3261_v50  ;;  %v8725_v53 = vadd.f32 %v3168_v43, %v9597_v35  ;;  %v8760_v15 = vpop.f32.mrf.mxu1 }
 0x7ac   : > { %6207 = vrsqrt.f32 %v3518_v1  ;;  %v3904_v0 = vmul.f32 %v8427_v21, %v3868_v8  ;;  %vm3709_vm4 = vweird.f32 %v3518_v1  ;;  %v4410_v29 = vmax.f32 %v8757_v49, %v8760_v15 }
 0x7ad   : > { %v3697_v39 = vsub.f32 1.5, %v3696_v31  ;;  %v3264_v48 = vsel %vm882_vm0, %v8725_v53, 0.0 }
 0x7ae   : > { %v3940_v28 = vadd.f32 %v8438_v38, %v3904_v0 }
 0x7af   : > { %v3698_v57 = vmul.f32 %v6206_v24, %v3697_v39  ;;  %v3248_v55 = vpop.xlane.xlu1 %3247 }
 0x7b0   : > { %v3301_v47 = vmul.f32 %v8268_v34, %v3248_v55  ;;  %v3972_v26 = vmul.f32 0.25, %v3940_v28 }
 0x7b1   : > { %v3702_v25 = vsel %vm3701_vm1, %v6206_v24, %v3698_v57  ;;  %v3267_v24 = vsel %vm882_vm0, %v8749_v33, 0.0 }
 0x7b2   : > { %v6208_v42 = vpop.eup %6207  ;;  %v3869_v30 = vmul.f32 %v3702_v25, %v8579_v3  ;;  %v8731_v11 = vsub.f32 %v8612_v59, %v3301_v47  ;;  %5822 = vmatmul.msk.f32.gmra.mxu3 %vm882_vm0, %v3972_v26  ;;  %5870 = vmatmul.msk.f32.gmra.mxu1 %vm882_vm0, %v3972_v26 }
 0x7b3   : > { %v3704_v41 = vmul.f32 %v6208_v42, %v3518_v1  ;;  %3265 = vadd.xlane.f32.xlu1 %v3264_v48  ;;  %vm3710_vm3 = vweird.f32 %v6208_v42 }
 0x7b4   : > { %v3365_v12 = vmul.f32 %v8731_v11, %v8731_v11  ;;  %v3905_v37 = vmul.f32 %v8427_v21, %v3869_v30  ;;  %vm3711_vm5 = vmor %vm3709_vm4, %vm3710_vm3  ;;  %v8780_v30 = vpop.f32.mrf.mxu1 }
 0x7b5   : > { %v3705_v9 = vmul.f32 %v6208_v42, %v3704_v41 }
 0x7b6   : > { %v3445_v3 = vsel %vm882_vm0, %v3365_v12, 0.0  ;;  %v3941_v59 = vadd.f32 %v8438_v38, %v3905_v37  ;;  %v8788_v37 = vld [vmem:[%s9571_s16] ss:$0 sm:$0xff] }
 0x7b7   : > { %v3706_v27 = vmul.f32 0.5, %v3705_v9  ;;  %3446 = vadd.xlane.f32.xlu0 %v3445_v3 }
 0x7b8   : > { %v3973_v5 = vmul.f32 0.25, %v3941_v59  ;;  %v8796_v59 = vld [vmem:[%s9572_s17] ss:$0 sm:$0xff] }
 0x7b9   : > { %v3707_v32 = vsub.f32 1.5, %v3706_v27 }
 0x7ba   : > { %5823 = vmatmul.msk.f32.gmra.mxu3 %vm882_vm0, %v3973_v5  ;;  %5871 = vmatmul.msk.f32.gmra.mxu1 %vm882_vm0, %v3973_v5 }
 0x7bb   : > { %v3708_v14 = vmul.f32 %v6208_v42, %v3707_v32  ;;  %4408 = vmax.xlane.f32.xlu1 %v4407_v22 }
 0x7bd   : > { %v3712_v56 = vsel %vm3711_vm5, %v6208_v42, %v3708_v14 }
 0x7be   : > { %v3870_v46 = vmul.f32 %v3712_v56, %v8600_v63 }
 0x7bf   : > { %3268 = vadd.xlane.f32.xlu0 %v3267_v24 }
 0x7c0   : > { %v3906_v61 = vmul.f32 %v8427_v21, %v3870_v46 }
 0x7c2   : > { %v3942_v54 = vadd.f32 %v8438_v38, %v3906_v61 }
 0x7c4   : > { %v3974_v6 = vmul.f32 0.25, %v3942_v54 }
 0x7c6   : > { %5824 = vmatmul.msk.f32.gmra.mxu3 %vm882_vm0, %v3974_v6  ;;  %5872 = vmatmul.msk.f32.gmra.mxu1 %vm882_vm0, %v3974_v6 }
 0x7c7   : > { %4411 = vmax.xlane.f32.xlu0 %v4410_v29  ;;  %v8809_v29 = vpop.f32.mrf.mxu1 }
 0x7e8   : > { %v3429_v63 = vpop.xlane.xlu0 %3428 }
 0x7e9   : > { %v3487_v4 = vmul.f32 %v3429_v63, %v8268_v34 }
 0x7eb   : > { %v3519_v20 = vadd.f32 1e-05, %v3487_v4 }
 0x7ed   : > { %6209 = vrsqrt.f32 %v3519_v20  ;;  %vm3719_vm7 = vweird.f32 %v3519_v20 }
 0x7f0   : > { %v3251_v21 = vpop.xlane.xlu0 %3250 }
 0x7f1   : > { %v3302_v13 = vmul.f32 %v8268_v34, %v3251_v21 }
 0x7f3   : > { %v6210_v38 = vpop.eup %6209  ;;  %v8769_v2 = vsub.f32 %v8633_v36, %v3302_v13  ;;  %v8775_v36 = vpop.f32.mrf.mxu3 }
 0x7f4   : > { %v3714_v8 = vmul.f32 %v6210_v38, %v3519_v20  ;;  %vm3720_vm6 = vweird.f32 %v6210_v38 }
 0x7f5   : > { %v3366_v1 = vmul.f32 %v8769_v2, %v8769_v2  ;;  %vm3721_vm8 = vmor %vm3719_vm7, %vm3720_vm6 }
 0x7f6   : > { %v3715_v40 = vmul.f32 %v6210_v38, %v3714_v8 }
 0x7f7   : > { %v3448_v31 = vsel %vm882_vm0, %v3366_v1, 0.0 }
 0x7f8   : > { %v3716_v0 = vmul.f32 0.5, %v3715_v40  ;;  %3449 = vadd.xlane.f32.xlu2 %v3448_v31 }
 0x7fa   : > { %v3717_v35 = vsub.f32 1.5, %v3716_v0 }
 0x7fb   : > { %v8804_v46 = vpop.f32.mrf.mxu3 }
 0x7fc   : > { %v3718_v28 = vmul.f32 %v6210_v38, %v3717_v35 }
 0x7fe   : > { %v3432_v50 = vpop.xlane.xlu2 %3431  ;;  %v3722_v57 = vsel %vm3721_vm8, %v6210_v38, %v3718_v28  ;;  %v4413_v38 = vmax.f32 %v8775_v36, %v8780_v30 }
 0x7ff   : > { %v3488_v43 = vmul.f32 %v3432_v50, %v8268_v34  ;;  %v3871_v26 = vmul.f32 %v3722_v57, %v8626_v58 }
 0x801   : > { %v3520_v39 = vadd.f32 1e-05, %v3488_v43  ;;  %v3907_v9 = vmul.f32 %v8788_v37, %v3871_v26 }
 0x803   : > { %6211 = vrsqrt.f32 %v3520_v39  ;;  %vm3729_vm10 = vweird.f32 %v3520_v39 }
 0x806   : > { %v3254_v55 = vpop.xlane.xlu2 %3253  ;;  %v3435_v47 = vpop.xlane.xlu1 %3434 }
 0x807   : > { %v3303_v25 = vmul.f32 %v8268_v34, %v3254_v55  ;;  %v3489_v42 = vmul.f32 %v3435_v47, %v8268_v34  ;;  %v8828_v47 = vpop.f32.mrf.mxu1 }
 0x809   : > { %v6212_v48 = vpop.eup %6211  ;;  %v8783_v41 = vsub.f32 %v8653_v16, %v3303_v25  ;;  %v3521_v12 = vadd.f32 1e-05, %v3489_v42  ;;  %v3943_v16 = vadd.f32 %v8796_v59, %v3907_v9 }
 0x80a   : > { %v3724_v3 = vmul.f32 %v6212_v48, %v3520_v39  ;;  %vm3730_vm9 = vweird.f32 %v6212_v48  ;;  %v8820_v39 = vpop.f32.mrf.mxu3 }
 0x80b   : > { %6213 = vrsqrt.f32 %v3521_v12  ;;  %v3367_v58 = vmul.f32 %v8783_v41, %v8783_v41  ;;  %v3975_v5 = vmul.f32 0.25, %v3943_v16  ;;  %vm3731_vm2 = vmor %vm3729_vm10, %vm3730_vm9  ;;  %vm3739_vm12 = vweird.f32 %v3521_v12 }
 0x80c   : > { %v3725_v60 = vmul.f32 %v6212_v48, %v3724_v3 }
 0x80d   : > { %v3451_v27 = vsel %vm882_vm0, %v3367_v58, 0.0  ;;  %5825 = vmatmul.msk.f32.gmra.mxu3 %vm882_vm0, %v3975_v5  ;;  %5873 = vmatmul.msk.f32.gmra.mxu1 %vm882_vm0, %v3975_v5 }
 0x80e   : > { %v3726_v32 = vmul.f32 0.5, %v3725_v60  ;;  %3452 = vadd.xlane.f32.xlu2 %v3451_v27  ;;  %v3438_v22 = vpop.xlane.xlu0 %3437  ;;  %v3257_v62 = vpop.xlane.xlu1 %3256 }
 0x80f   : > { %v3490_v14 = vmul.f32 %v3438_v22, %v8268_v34  ;;  %v3304_v56 = vmul.f32 %v8268_v34, %v3257_v62 }
 0x810   : > { %v3727_v24 = vsub.f32 1.5, %v3726_v32 }
 0x811   : > { %v6214_v61 = vpop.eup %6213  ;;  %v3522_v54 = vadd.f32 1e-05, %v3490_v14  ;;  %v8807_v6 = vsub.f32 %v8668_v23, %v3304_v56 }
 0x812   : > { %v3728_v63 = vmul.f32 %v6212_v48, %v3727_v24  ;;  %v3734_v4 = vmul.f32 %v6214_v61, %v3521_v12  ;;  %vm3740_vm11 = vweird.f32 %v6214_v61 }
 0x813   : > { %6215 = vrsqrt.f32 %v3522_v54  ;;  %v3368_v20 = vmul.f32 %v8807_v6, %v8807_v6  ;;  %vm3741_vm13 = vmor %vm3739_vm12, %vm3740_vm11  ;;  %vm3749_vm15 = vweird.f32 %v3522_v54 }
 0x814   : > { %v3732_v21 = vsel %vm3731_vm2, %v6212_v48, %v3728_v63  ;;  %v3735_v13 = vmul.f32 %v6214_v61, %v3734_v4 }
 0x815   : > { %v3872_v8 = vmul.f32 %v3732_v21, %v8641_v52  ;;  %v3454_v23 = vsel %vm882_vm0, %v3368_v20, 0.0 }
 0x816   : > { %v3736_v1 = vmul.f32 0.5, %v3735_v13  ;;  %v3441_v40 = vpop.xlane.xlu2 %3440  ;;  %4414 = vmax.xlane.f32.xlu2 %v4413_v38  ;;  %v3260_v50 = vpop.xlane.xlu0 %3259  ;;  %3455 = vadd.xlane.f32.xlu1 %v3454_v23 }
 0x817   : > { %v3491_v43 = vmul.f32 %v3441_v40, %v8268_v34  ;;  %v3305_v31 = vmul.f32 %v8268_v34, %v3260_v50  ;;  %v3908_v0 = vmul.f32 %v8788_v37, %v3872_v8  ;;  %v8854_v13 = vpop.f32.mrf.mxu1  ;;  %v4419_v8 = vmax.f32 %v8820_v39, %v8828_v47 }
 0x818   : > { %v3737_v35 = vsub.f32 1.5, %v3736_v1 }
 0x819   : > { %v6216_v28 = vpop.eup %6215  ;;  %v8822_v57 = vadd.f32 1e-05, %v3491_v43  ;;  %v8825_v52 = vsub.f32 %v8689_v51, %v3305_v31  ;;  %v3944_v55 = vadd.f32 %v8796_v59, %v3908_v0  ;;  %v4416_v51 = vmax.f32 %v8804_v46, %v8809_v29 }
 0x81a   : > { %v3738_v26 = vmul.f32 %v6214_v61, %v3737_v35  ;;  %v3744_v25 = vmul.f32 %v6216_v28, %v3522_v54  ;;  %vm3750_vm14 = vweird.f32 %v6216_v28 }
 0x81b   : > { %6217 = vrsqrt.f32 %v8822_v57  ;;  %v3976_v42 = vmul.f32 0.25, %v3944_v55  ;;  %v3369_v48 = vmul.f32 %v8825_v52, %v8825_v52  ;;  %vm3751_vm1 = vmor %vm3749_vm15, %vm3750_vm14  ;;  %vm3759_vm4 = vweird.f32 %v8822_v57 }
 0x81c   : > { %v3742_v9 = vsel %vm3741_vm13, %v6214_v61, %v3738_v26  ;;  %v3745_v3 = vmul.f32 %v6216_v28, %v3744_v25  ;;  %v8848_v61 = vpop.f32.mrf.mxu3 }
 0x81d   : > { %v3873_v58 = vmul.f32 %v3742_v9, %v8656_v44  ;;  %5826 = vmatmul.msk.f32.gmra.mxu3 %vm882_vm0, %v3976_v42  ;;  %5874 = vmatmul.msk.f32.gmra.mxu1 %vm882_vm0, %v3976_v42  ;;  %v3457_v12 = vsel %vm882_vm0, %v3369_v48, 0.0 }
 0x81e   : > { %v3746_v16 = vmul.f32 0.5, %v3745_v3  ;;  %v3263_v60 = vpop.xlane.xlu2 %3262  ;;  %3458 = vadd.xlane.f32.xlu0 %v3457_v12  ;;  %4417 = vmax.xlane.f32.xlu1 %v4416_v51  ;;  %v3444_v27 = vpop.xlane.xlu1 %3443  ;;  %v4422_v51 = vmax.f32 %v8848_v61, %v8854_v13 }
 0x81f   : > { %v3306_v5 = vmul.f32 %v8268_v34, %v3263_v60  ;;  %v3492_v32 = vmul.f32 %v3444_v27, %v8268_v34  ;;  %v3909_v22 = vmul.f32 %v8788_v37, %v3873_v58 }
 0x820   : > { %v3747_v62 = vsub.f32 1.5, %v3746_v16  ;;  %v8881_v16 = vpop.f32.mrf.mxu1 }
 0x821   : > { %v6218_v44 = vpop.eup %6217  ;;  %v8843_v14 = vsub.f32 %v8707_v45, %v3306_v5  ;;  %v8845_v56 = vadd.f32 1e-05, %v3492_v32  ;;  %v3945_v24 = vadd.f32 %v8796_v59, %v3909_v22 }
 0x822   : > { %v3748_v63 = vmul.f32 %v6216_v28, %v3747_v62  ;;  %v3754_v4 = vmul.f32 %v6218_v44, %v8822_v57  ;;  %vm3760_vm3 = vweird.f32 %v6218_v44 }
 0x823   : > { %6219 = vrsqrt.f32 %v8845_v56  ;;  %v3977_v20 = vmul.f32 0.25, %v3945_v24  ;;  %v3370_v21 = vmul.f32 %v8843_v14, %v8843_v14  ;;  %vm3761_vm5 = vmor %vm3759_vm4, %vm3760_vm3  ;;  %vm3769_vm7 = vweird.f32 %v8845_v56 }
 0x824   : > { %v3752_v45 = vsel %vm3751_vm1, %v6216_v28, %v3748_v63  ;;  %v3755_v38 = vmul.f32 %v6218_v44, %v3754_v4  ;;  %v8873_v9 = vpop.f32.mrf.mxu3 }
 0x825   : > { %v3874_v23 = vmul.f32 %v3752_v45, %v8673_v19  ;;  %5827 = vmatmul.msk.f32.gmra.mxu3 %vm882_vm0, %v3977_v20  ;;  %5875 = vmatmul.msk.f32.gmra.mxu1 %vm882_vm0, %v3977_v20  ;;  %v3460_v54 = vsel %vm882_vm0, %v3370_v21, 0.0 }
 0x826   : > { %v3756_v1 = vmul.f32 0.5, %v3755_v38  ;;  %3461 = vadd.xlane.f32.xlu2 %v3460_v54  ;;  %4420 = vmax.xlane.f32.xlu0 %v4419_v8  ;;  %v3266_v40 = vpop.xlane.xlu1 %3265  ;;  %v4425_v8 = vmax.f32 %v8873_v9, %v8881_v16 }
 0x827   : > { %v3307_v50 = vmul.f32 %v8268_v34, %v3266_v40  ;;  %v3910_v43 = vmul.f32 %v8788_v37, %v3874_v23 }
 0x828   : > { %v3757_v31 = vsub.f32 1.5, %v3756_v1 }
 0x829   : > { %v6220_v0 = vpop.eup %6219  ;;  %v8865_v35 = vsub.f32 %v8725_v53, %v3307_v50  ;;  %v3946_v19 = vadd.f32 %v8796_v59, %v3910_v43 }
 0x82a   : > { %v3758_v28 = vmul.f32 %v6218_v44, %v3757_v31  ;;  %v3764_v55 = vmul.f32 %v6220_v0, %v8845_v56  ;;  %v3447_v26 = vpop.xlane.xlu0 %3446  ;;  %vm3770_vm6 = vweird.f32 %v6220_v0 }
 0x82b   : > { %v3493_v25 = vmul.f32 %v3447_v26, %v8268_v34  ;;  %v3978_v42 = vmul.f32 0.25, %v3946_v19  ;;  %v3371_v48 = vmul.f32 %v8865_v35, %v8865_v35  ;;  %vm3771_vm8 = vmor %vm3769_vm7, %vm3770_vm6 }
 0x82c   : > { %v3762_v3 = vsel %vm3761_vm5, %v6218_v44, %v3758_v28  ;;  %v3765_v53 = vmul.f32 %v6220_v0, %v3764_v55  ;;  %v8895_v56 = vpop.f32.mrf.mxu3 }
 0x82d   : > { %v3875_v58 = vmul.f32 %v3762_v3, %v8692_v17  ;;  %v3525_v57 = vadd.f32 1e-05, %v3493_v25  ;;  %5828 = vmatmul.msk.f32.gmra.mxu3 %vm882_vm0, %v3978_v42  ;;  %5876 = vmatmul.msk.f32.gmra.mxu1 %vm882_vm0, %v3978_v42  ;;  %v3463_v12 = vsel %vm882_vm0, %v3371_v48, 0.0 }
 0x82e   : > { %v3766_v60 = vmul.f32 0.5, %v3765_v53  ;;  %4423 = vmax.xlane.f32.xlu2 %v4422_v51  ;;  %3464 = vadd.xlane.f32.xlu1 %v3463_v12  ;;  %v4409_v27 = vpop.xlane.xlu1 %4408 }
 0x82f   : > { %6221 = vrsqrt.f32 %v3525_v57  ;;  %v4503_v5 = vsub.f32 %v8740_v18, %v4409_v27  ;;  %v4504_v32 = vsub.f32 %v8744_v7, %v4409_v27  ;;  %v3911_v17 = vmul.f32 %v8788_v37, %v3875_v58 }
 0x830   : > { %v3767_v22 = vsub.f32 1.5, %v3766_v60  ;;  %vm3779_vm10 = vweird.f32 %v3525_v57 }
 0x831   : > { %v4567_v62 = vmul.f32 1.442695, %v4503_v5  ;;  %v4569_v44 = vmul.f32 1.442695, %v4504_v32  ;;  %v3947_v4 = vadd.f32 %v8796_v59, %v3911_v17 }
 0x832   : > { %v3768_v24 = vmul.f32 %v6220_v0, %v3767_v22  ;;  %v3269_v63 = vpop.xlane.xlu0 %3268 }
 0x833   : > { %6223 = vpow2.f32 %v4567_v62  ;;  %v3308_v20 = vmul.f32 %v8268_v34, %v3269_v63  ;;  %v3979_v18 = vmul.f32 0.25, %v3947_v4 }
 0x834   : > { %v3772_v21 = vsel %vm3771_vm8, %v6220_v0, %v3768_v24  ;;  %6225 = vpow2.f32 %v4569_v44 }
 0x835   : > { %v6222_v7 = vpop.eup %6221  ;;  %v3876_v45 = vmul.f32 %v3772_v21, %v8710_v10  ;;  %v8891_v38 = vsub.f32 %v8749_v33, %v3308_v20  ;;  %5829 = vmatmul.msk.f32.gmra.mxu3 %vm882_vm0, %v3979_v18  ;;  %5877 = vmatmul.msk.f32.gmra.mxu1 %vm882_vm0, %v3979_v18  ;;  %v8902_v10 = vpop.f32.mrf.mxu1 }
 0x836   : > { %v3774_v23 = vmul.f32 %v6222_v7, %v3525_v57  ;;  %4426 = vmax.xlane.f32.xlu1 %v4425_v8  ;;  %vm3780_vm9 = vweird.f32 %v6222_v7  ;;  %v4428_v51 = vmax.f32 %v8895_v56, %v8902_v10 }
 0x837   : > { %v3372_v54 = vmul.f32 %v8891_v38, %v8891_v38  ;;  %v3912_v1 = vmul.f32 %v8788_v37, %v3876_v45  ;;  %vm3781_vm2 = vmor %vm3779_vm10, %vm3780_vm9 }
 0x838   : > { %v3775_v33 = vmul.f32 %v6222_v7, %v3774_v23 }
 0x839   : > { %v8904_v40 = vpop.eup %6223  ;;  %v3466_v50 = vsel %vm882_vm0, %v3372_v54, 0.0  ;;  %v3948_v43 = vadd.f32 %v8796_v59, %v3912_v1 }
 0x83a   : > { %v8908_v31 = vpop.eup %6225  ;;  %v3776_v0 = vmul.f32 0.5, %v3775_v33  ;;  %3467 = vadd.xlane.f32.xlu0 %v3466_v50  ;;  %v4412_v19 = vpop.xlane.xlu0 %4411 }
 0x83b   : > { %v4505_v28 = vsub.f32 %v8757_v49, %v4412_v19  ;;  %v4506_v55 = vsub.f32 %v8760_v15, %v4412_v19  ;;  %v4695_v26 = vadd.f32 %v8908_v31, %v8904_v40  ;;  %v3980_v25 = vmul.f32 0.25, %v3948_v43  ;;  %v8916_v49 = vpop.f32.mrf.mxu3 }
 0x83c   : > { %v3777_v42 = vsub.f32 1.5, %v3776_v0 }
 0x83d   : > { %v4571_v48 = vmul.f32 1.442695, %v4505_v28  ;;  %v4573_v3 = vmul.f32 1.442695, %v4506_v55  ;;  %4696 = vadd.xlane.f32.xlu2 %v4695_v26  ;;  %5830 = vmatmul.msk.f32.gmra.mxu3 %vm882_vm0, %v3980_v25  ;;  %v8921_v12 = vpop.f32.mrf.mxu1 }
 0x83e   : > { %v3778_v53 = vmul.f32 %v6222_v7, %v3777_v42  ;;  %5878 = vmatmul.msk.f32.gmra.mxu1 %vm882_vm0, %v3980_v25  ;;  %v4431_v57 = vmax.f32 %v8916_v49, %v8921_v12 }
 0x83f   : > { %6227 = vpow2.f32 %v4571_v48 }
 0x840   : > { %v3782_v15 = vsel %vm3781_vm2, %v6222_v7, %v3778_v53  ;;  %6229 = vpow2.f32 %v4573_v3 }
 0x841   : > { %v3877_v58 = vmul.f32 %v3782_v15, %v8731_v11 }
 0x842   : > { %4429 = vmax.xlane.f32.xlu0 %v4428_v51 }
 0x843   : > { %v3913_v60 = vmul.f32 %v8788_v37, %v3877_v58  ;;  %v8935_v11 = vpop.f32.mrf.mxu3 }
 0x845   : > { %v8926_v27 = vpop.eup %6227  ;;  %4432 = vmax.xlane.f32.xlu2 %v4431_v57  ;;  %v3949_v5 = vadd.f32 %v8796_v59, %v3913_v60  ;;  %v8937_v62 = vpop.f32.mrf.mxu1 }
 0x846   : > { %v8929_v32 = vpop.eup %6229  ;;  %v4434_v44 = vmax.f32 %v8935_v11, %v8937_v62 }
 0x847   : > { %v4698_v22 = vadd.f32 %v8929_v32, %v8926_v27  ;;  %v3981_v17 = vmul.f32 0.25, %v3949_v5 }
 0x849   : > { %4699 = vadd.xlane.f32.xlu1 %v4698_v22  ;;  %5831 = vmatmul.msk.f32.gmra.mxu3 %vm882_vm0, %v3981_v17 }
 0x84a   : > { %5879 = vmatmul.msk.f32.gmra.mxu1 %vm882_vm0, %v3981_v17 }
 0x84d   : > { %v8954_v60 = vpop.f32.mrf.mxu1 }
 0x851   : > { %4435 = vmax.xlane.f32.xlu1 %v4434_v44 }
 0x86b   : > { %v3450_v24 = vpop.xlane.xlu2 %3449 }
 0x86c   : > { %v3494_v63 = vmul.f32 %v3450_v24, %v8268_v34 }
 0x86e   : > { %v3526_v4 = vadd.f32 1e-05, %v3494_v63 }
 0x870   : > { %6231 = vrsqrt.f32 %v3526_v4  ;;  %vm3789_vm12 = vweird.f32 %v3526_v4 }
 0x876   : > { %v6232_v20 = vpop.eup %6231 }
 0x877   : > { %v3784_v21 = vmul.f32 %v6232_v20, %v3526_v4  ;;  %vm3790_vm11 = vweird.f32 %v6232_v20 }
 0x878   : > { %vm3791_vm13 = vmor %vm3789_vm12, %vm3790_vm11 }
 0x879   : > { %v3785_v18 = vmul.f32 %v6232_v20, %v3784_v21 }
 0x87b   : > { %v3786_v8 = vmul.f32 0.5, %v3785_v18 }
 0x87d   : > { %v3787_v54 = vsub.f32 1.5, %v3786_v8 }
 0x87f   : > { %v3788_v1 = vmul.f32 %v6232_v20, %v3787_v54 }
 0x881   : > { %v3453_v7 = vpop.xlane.xlu2 %3452  ;;  %v3792_v33 = vsel %vm3791_vm13, %v6232_v20, %v3788_v1 }
 0x882   : > { %v3495_v45 = vmul.f32 %v3453_v7, %v8268_v34  ;;  %v3878_v0 = vmul.f32 %v3792_v33, %v8769_v2  ;;  %v8951_v2 = vpop.f32.mrf.mxu3 }
 0x884   : > { %v3527_v23 = vadd.f32 1e-05, %v3495_v45  ;;  %v3914_v3 = vmul.f32 %v8788_v37, %v3878_v0 }
 0x886   : > { %6233 = vrsqrt.f32 %v3527_v23  ;;  %v3950_v15 = vadd.f32 %v8796_v59, %v3914_v3  ;;  %vm3799_vm15 = vweird.f32 %v3527_v23 }
 0x889   : > { %v4415_v50 = vpop.xlane.xlu2 %4414  ;;  %v3456_v43 = vpop.xlane.xlu1 %3455 }
 0x88a   : > { %v4507_v19 = vsub.f32 %v8775_v36, %v4415_v50  ;;  %v4508_v28 = vsub.f32 %v8780_v30, %v4415_v50  ;;  %v3496_v55 = vmul.f32 %v3456_v43, %v8268_v34  ;;  %v3982_v36 = vmul.f32 0.25, %v3950_v15  ;;  %v8971_v8 = vpop.f32.mrf.mxu3  ;;  %v8974_v50 = vpop.f32.mrf.mxu1 }
 0x88c   : > { %v6234_v26 = vpop.eup %6233  ;;  %v4575_v25 = vmul.f32 1.442695, %v4507_v19  ;;  %v4577_v42 = vmul.f32 1.442695, %v4508_v28  ;;  %v8947_v48 = vadd.f32 1e-05, %v3496_v55  ;;  %5832 = vmatmul.msk.f32.gmra.mxu3 %vm882_vm0, %v3982_v36  ;;  %5880 = vmatmul.msk.f32.gmra.mxu1 %vm882_vm0, %v3982_v36 }
 0x88d   : > { %v3794_v53 = vmul.f32 %v6234_v26, %v3527_v23  ;;  %vm3800_vm14 = vweird.f32 %v6234_v26 }
 0x88e   : > { %6235 = vpow2.f32 %v4575_v25  ;;  %vm3801_vm1 = vmor %vm3799_vm15, %vm3800_vm14  ;;  %vm3809_vm4 = vweird.f32 %v8947_v48 }
 0x88f   : > { %v3795_v51 = vmul.f32 %v6234_v26, %v3794_v53  ;;  %6237 = vpow2.f32 %v4577_v42 }
 0x890   : > { %6239 = vrsqrt.f32 %v8947_v48 }
 0x891   : > { %v3796_v30 = vmul.f32 0.5, %v3795_v51  ;;  %v3459_v58 = vpop.xlane.xlu0 %3458  ;;  %v4418_v57 = vpop.xlane.xlu1 %4417 }
 0x892   : > { %v3497_v5 = vmul.f32 %v3459_v58, %v8268_v34  ;;  %v4509_v22 = vsub.f32 %v8804_v46, %v4418_v57  ;;  %v4510_v17 = vsub.f32 %v8809_v29, %v4418_v57 }
 0x893   : > { %v3797_v44 = vsub.f32 1.5, %v3796_v30 }
 0x894   : > { %v8961_v24 = vpop.eup %6235  ;;  %v8963_v63 = vadd.f32 1e-05, %v3497_v5  ;;  %v4579_v4 = vmul.f32 1.442695, %v4509_v22  ;;  %v4581_v20 = vmul.f32 1.442695, %v4510_v17 }
 0x895   : > { %v8965_v21 = vpop.eup %6237  ;;  %v3798_v18 = vmul.f32 %v6234_v26, %v3797_v44  ;;  %v8996_v44 = vpop.f32.mrf.mxu3 }
 0x896   : > { %v6240_v7 = vpop.eup %6239  ;;  %6241 = vrsqrt.f32 %v8963_v63  ;;  %v4701_v46 = vadd.f32 %v8965_v21, %v8961_v24  ;;  %vm3819_vm7 = vweird.f32 %v8963_v63 }
 0x897   : > { %v3802_v29 = vsel %vm3801_vm1, %v6234_v26, %v3798_v18  ;;  %v3804_v45 = vmul.f32 %v6240_v7, %v8947_v48  ;;  %6243 = vpow2.f32 %v4579_v4  ;;  %vm3810_vm3 = vweird.f32 %v6240_v7 }
 0x898   : > { %v3879_v54 = vmul.f32 %v3802_v29, %v8783_v41  ;;  %6245 = vpow2.f32 %v4581_v20  ;;  %4702 = vadd.xlane.f32.xlu0 %v4701_v46  ;;  %vm3811_vm5 = vmor %vm3809_vm4, %vm3810_vm3 }
 0x899   : > { %v3805_v1 = vmul.f32 %v6240_v7, %v3804_v45  ;;  %v3462_v33 = vpop.xlane.xlu2 %3461  ;;  %v4421_v23 = vpop.xlane.xlu0 %4420 }
 0x89a   : > { %v3498_v43 = vmul.f32 %v3462_v33, %v8268_v34  ;;  %v4511_v0 = vsub.f32 %v8820_v39, %v4421_v23  ;;  %v4512_v19 = vsub.f32 %v8828_v47, %v4421_v23  ;;  %v3915_v28 = vmul.f32 %v8788_v37, %v3879_v54 }
 0x89b   : > { %v3806_v55 = vmul.f32 0.5, %v3805_v1  ;;  %v4437_v39 = vmax.f32 %v8951_v2, %v8954_v60 }
 0x89c   : > { %v6242_v26 = vpop.eup %6241  ;;  %v8980_v25 = vadd.f32 1e-05, %v3498_v43  ;;  %v4583_v41 = vmul.f32 1.442695, %v4511_v0  ;;  %v4585_v42 = vmul.f32 1.442695, %v4512_v19  ;;  %v3951_v3 = vadd.f32 %v8796_v59, %v3915_v28 }
 0x89d   : > { %v8983_v53 = vpop.eup %6243  ;;  %v3807_v15 = vsub.f32 1.5, %v3806_v55  ;;  %v3814_v51 = vmul.f32 %v6242_v26, %v8963_v63  ;;  %vm3820_vm6 = vweird.f32 %v6242_v26  ;;  %v4440_v0 = vmax.f32 %v8971_v8, %v8974_v50 }
 0x89e   : > { %v8986_v36 = vpop.eup %6245  ;;  %6247 = vrsqrt.f32 %v8980_v25  ;;  %v3983_v47 = vmul.f32 0.25, %v3951_v3  ;;  %vm3821_vm8 = vmor %vm3819_vm7, %vm3820_vm6  ;;  %vm3829_vm10 = vweird.f32 %v8980_v25 }
 0x89f   : > { %v3808_v30 = vmul.f32 %v6240_v7, %v3807_v15  ;;  %v3815_v58 = vmul.f32 %v6242_v26, %v3814_v51  ;;  %6249 = vpow2.f32 %v4583_v41  ;;  %v4704_v57 = vadd.f32 %v8986_v36, %v8983_v53 }
 0x8a0   : > { %6251 = vpow2.f32 %v4585_v42  ;;  %4438 = vmax.xlane.f32.xlu0 %v4437_v39  ;;  %5833 = vmatmul.msk.f32.gmra.mxu3 %vm882_vm0, %v3983_v47 }
 0x8a1   : > { %v3812_v5 = vsel %vm3811_vm5, %v6240_v7, %v3808_v30  ;;  %v3816_v22 = vmul.f32 0.5, %v3815_v58  ;;  %4705 = vadd.xlane.f32.xlu2 %v4704_v57  ;;  %5881 = vmatmul.msk.f32.gmra.mxu1 %vm882_vm0, %v3983_v47  ;;  %v4424_v48 = vpop.xlane.xlu2 %4423  ;;  %v3465_v17 = vpop.xlane.xlu1 %3464 }
 0x8a2   : > { %v3880_v4 = vmul.f32 %v3812_v5, %v8807_v6  ;;  %v4513_v20 = vsub.f32 %v8848_v61, %v4424_v48  ;;  %v4514_v18 = vsub.f32 %v8854_v13, %v4424_v48  ;;  %v3499_v46 = vmul.f32 %v3465_v17, %v8268_v34  ;;  %v9002_v7 = vpop.f32.mrf.mxu1  ;;  %v9027_v30 = vpop.f32.mrf.mxu3 }
 0x8a3   : > { %v3817_v29 = vsub.f32 1.5, %v3816_v22 }
 0x8a4   : > { %v6248_v45 = vpop.eup %6247  ;;  %v4587_v54 = vmul.f32 1.442695, %v4513_v20  ;;  %v4589_v1 = vmul.f32 1.442695, %v4514_v18  ;;  %v9004_v33 = vadd.f32 1e-05, %v3499_v46  ;;  %v3916_v23 = vmul.f32 %v8788_v37, %v3880_v4 }
 0x8a5   : > { %v9007_v43 = vpop.eup %6249  ;;  %v3818_v6 = vmul.f32 %v6242_v26, %v3817_v29  ;;  %v3824_v61 = vmul.f32 %v6248_v45, %v8980_v25  ;;  %vm3830_vm9 = vweird.f32 %v6248_v45  ;;  %v4443_v46 = vmax.f32 %v8996_v44, %v9002_v7 }
 0x8a6   : > { %v9011_v13 = vpop.eup %6251  ;;  %6253 = vpow2.f32 %v4587_v54  ;;  %v3952_v19 = vadd.f32 %v8796_v59, %v3916_v23  ;;  %vm3831_vm2 = vmor %vm3829_vm10, %vm3830_vm9  ;;  %vm3839_vm12 = vweird.f32 %v9004_v33 }
 0x8a7   : > { %v3822_v28 = vsel %vm3821_vm8, %v6242_v26, %v3818_v6  ;;  %v3825_v55 = vmul.f32 %v6248_v45, %v3824_v61  ;;  %6255 = vpow2.f32 %v4589_v1  ;;  %v4707_v41 = vadd.f32 %v9011_v13, %v9007_v43 }
 0x8a8   : > { %v3881_v42 = vmul.f32 %v3822_v28, %v8825_v52  ;;  %6257 = vrsqrt.f32 %v9004_v33  ;;  %v3984_v63 = vmul.f32 0.25, %v3952_v19 }
 0x8a9   : > { %v3826_v3 = vmul.f32 0.5, %v3825_v55  ;;  %4708 = vadd.xlane.f32.xlu1 %v4707_v41  ;;  %4441 = vmax.xlane.f32.xlu2 %v4440_v0  ;;  %v4427_v15 = vpop.xlane.xlu1 %4426 }
 0x8aa   : > { %5834 = vmatmul.msk.f32.gmra.mxu3 %vm882_vm0, %v3984_v63  ;;  %5882 = vmatmul.msk.f32.gmra.mxu1 %vm882_vm0, %v3984_v63  ;;  %v3917_v26 = vmul.f32 %v8788_v37, %v3881_v42  ;;  %v4515_v39 = vsub.f32 %v8873_v9, %v4427_v15  ;;  %v4516_v47 = vsub.f32 %v8881_v16, %v4427_v15  ;;  %v9033_v20 = vpop.f32.mrf.mxu1  ;;  %v9055_v41 = vpop.f32.mrf.mxu3 }
 0x8ab   : > { %v3827_v51 = vsub.f32 1.5, %v3826_v3  ;;  %v4446_v55 = vmax.f32 %v9027_v30, %v9033_v20 }
 0x8ac   : > { %v9025_v52 = vpop.eup %6253  ;;  %v3953_v58 = vadd.f32 %v8796_v59, %v3917_v26  ;;  %v4591_v22 = vmul.f32 1.442695, %v4515_v39  ;;  %v4593_v48 = vmul.f32 1.442695, %v4516_v47 }
 0x8ad   : > { %v9030_v57 = vpop.eup %6255  ;;  %v3828_v5 = vmul.f32 %v6248_v45, %v3827_v51  ;;  %v3468_v17 = vpop.xlane.xlu0 %3467 }
 0x8ae   : > { %v6258_v4 = vpop.eup %6257  ;;  %v3500_v9 = vmul.f32 %v3468_v17, %v8268_v34  ;;  %v4710_v16 = vadd.f32 %v9030_v57, %v9025_v52  ;;  %v3985_v18 = vmul.f32 0.25, %v3953_v58  ;;  %6259 = vpow2.f32 %v4591_v22 }
 0x8af   : > { %v3832_v29 = vsel %vm3831_vm2, %v6248_v45, %v3828_v5  ;;  %v3834_v54 = vmul.f32 %v6258_v4, %v9004_v33  ;;  %6261 = vpow2.f32 %v4593_v48  ;;  %vm3840_vm11 = vweird.f32 %v6258_v4 }
 0x8b0   : > { %v3882_v25 = vmul.f32 %v3832_v29, %v8843_v14  ;;  %v9042_v1 = vadd.f32 1e-05, %v3500_v9  ;;  %4711 = vadd.xlane.f32.xlu0 %v4710_v16  ;;  %v4697_v23 = vpop.xlane.xlu2 %4696  ;;  %vm3841_vm13 = vmor %vm3839_vm12, %vm3840_vm11 }
 0x8b1   : > { %v3835_v6 = vmul.f32 %v6258_v4, %v3834_v54  ;;  %4444 = vmax.xlane.f32.xlu1 %v4443_v46  ;;  %6263 = vrcp.f32 %v4697_v23 }
 0x8b2   : > { %6265 = vrsqrt.f32 %v9042_v1  ;;  %5835 = vmatmul.msk.f32.gmra.mxu3 %vm882_vm0, %v3985_v18  ;;  %5883 = vmatmul.msk.f32.gmra.mxu1 %vm882_vm0, %v3985_v18  ;;  %v3918_v34 = vmul.f32 %v8788_v37, %v3882_v25  ;;  %v9062_v47 = vpop.f32.mrf.mxu1  ;;  %v9078_v25 = vpop.f32.mrf.mxu3  ;;  %vm3849_vm15 = vweird.f32 %v9042_v1 }
 0x8b3   : > { %v3836_v45 = vmul.f32 0.5, %v3835_v6 }
 0x8b4   : > { %v3954_v61 = vadd.f32 %v8796_v59, %v3918_v34  ;;  %v9049_v14 = vpop.eup %6259 }
 0x8b5   : > { %v3837_v0 = vsub.f32 1.5, %v3836_v45  ;;  %v4430_v19 = vpop.xlane.xlu0 %4429  ;;  %v9051_v28 = vpop.eup %6261 }
 0x8b6   : > { %v4517_v42 = vsub.f32 %v8895_v56, %v4430_v19  ;;  %v4518_v63 = vsub.f32 %v8902_v10, %v4430_v19  ;;  %v3986_v3 = vmul.f32 0.25, %v3954_v61  ;;  %v4713_v51 = vadd.f32 %v9051_v28, %v9049_v14 }
 0x8b7   : > { %v6264_v15 = vpop.eup %6263  ;;  %v3838_v26 = vmul.f32 %v6258_v4, %v3837_v0 }
 0x8b8   : > { %v6266_v39 = vpop.eup %6265  ;;  %v4823_v58 = vmul.f32 %v6264_v15, %v8904_v40  ;;  %v4824_v5 = vmul.f32 %v6264_v15, %v8908_v31  ;;  %v4595_v22 = vmul.f32 1.442695, %v4517_v42  ;;  %v4597_v56 = vmul.f32 1.442695, %v4518_v63  ;;  %4447 = vmax.xlane.f32.xlu0 %v4446_v55  ;;  %v4433_v10 = vpop.xlane.xlu2 %4432  ;;  %4714 = vadd.xlane.f32.xlu2 %v4713_v51 }
 0x8b9   : > { %v3842_v48 = vsel %vm3841_vm13, %v6258_v4, %v3838_v26  ;;  %v3844_v17 = vmul.f32 %v6266_v39, %v9042_v1  ;;  %v4519_v33 = vsub.f32 %v8916_v49, %v4433_v10  ;;  %v4520_v16 = vsub.f32 %v8921_v12, %v4433_v10 }
 0x8ba   : > { %v3883_v9 = vmul.f32 %v3842_v48, %v8865_v35  ;;  %6267 = vpow2.f32 %v4595_v22  ;;  %5836 = vmatmul.msk.f32.gmra.mxu3 %vm882_vm0, %v3986_v3  ;;  %5884 = vmatmul.msk.f32.gmra.mxu1 %vm882_vm0, %v3986_v3  ;;  %v4449_v12 = vmax.f32 %v9055_v41, %v9062_v47  ;;  %vm3850_vm14 = vweird.f32 %v6266_v39  ;;  %v9083_v45 = vpop.f32.mrf.mxu1 }
 0x8bb   : > { %v3845_v40 = vmul.f32 %v6266_v39, %v3844_v17  ;;  %6269 = vpow2.f32 %v4597_v56  ;;  %v4599_v31 = vmul.f32 1.442695, %v4519_v33  ;;  %4903 = vmatmul.f32.vlgmr.msrb.gmra.mxu2 %v4823_v58  ;;  %5016 = vmatmul.f32.vlgmr.msra.gmra.mxu0 %v4824_v5  ;;  %v4601_v4 = vmul.f32 1.442695, %v4520_v16  ;;  %vm3851_vm1 = vmor %vm3849_vm15, %vm3850_vm14 }
 0x8bc   : > { %v4700_v18 = vpop.xlane.xlu1 %4699  ;;  %v3919_v46 = vmul.f32 %v8788_v37, %v3883_v9 }
 0x8bd   : > { %v3846_v49 = vmul.f32 0.5, %v3845_v40  ;;  %6271 = vpow2.f32 %v4599_v31 }
 0x8be   : > { %6273 = vpow2.f32 %v4601_v4  ;;  %v3955_v35 = vadd.f32 %v8796_v59, %v3919_v46 }
 0x8bf   : > { %v3847_v29 = vsub.f32 1.5, %v3846_v49  ;;  %6275 = vrcp.f32 %v4700_v18 }
 0x8c0   : > { %v9076_v54 = vpop.eup %6267  ;;  %v3987_v23 = vmul.f32 0.25, %v3955_v35  ;;  %4450 = vmax.xlane.f32.xlu2 %v4449_v12 }
 0x8c1   : > { %v9080_v6 = vpop.eup %6269  ;;  %v3848_v34 = vmul.f32 %v6266_v39, %v3847_v29 }
 0x8c2   : > { %5837 = vmatmul.msk.f32.gmra.mxu3 %vm882_vm0, %v3987_v23  ;;  %5885 = vmatmul.msk.f32.gmra.mxu1 %vm882_vm0, %v3987_v23  ;;  %v4716_v61 = vadd.f32 %v9080_v6, %v9076_v54 }
 0x8c3   : > { %v9089_v0 = vpop.eup %6271  ;;  %v3852_v19 = vsel %vm3851_vm1, %v6266_v39, %v3848_v34 }
 0x8c4   : > { %v9091_v55 = vpop.eup %6273  ;;  %v3884_v42 = vmul.f32 %v3852_v19, %v8891_v38  ;;  %4717 = vadd.xlane.f32.xlu1 %v4716_v61  ;;  %v4436_v1 = vpop.xlane.xlu1 %4435 }
 0x8c5   : > { %v6276_v63 = vpop.eup %6275  ;;  %v4521_v3 = vsub.f32 %v8935_v11, %v4436_v1  ;;  %v4522_v15 = vsub.f32 %v8937_v62, %v4436_v1  ;;  %v4719_v26 = vadd.f32 %v9091_v55, %v9089_v0  ;;  %v4452_v11 = vmax.f32 %v9078_v25, %v9083_v45  ;;  %v9104_v62 = vpop.f32.mrf.mxu3 }
 0x8c6   : > { %v4825_v51 = vmul.f32 %v6276_v63, %v8926_v27  ;;  %v4826_v58 = vmul.f32 %v6276_v63, %v8929_v32  ;;  %v3920_v39 = vmul.f32 %v8788_v37, %v3884_v42  ;;  %v9106_v27 = vpop.f32.mrf.mxu1 }
 0x8c7   : > { %v4603_v5 = vmul.f32 1.442695, %v4521_v3  ;;  %v4605_v22 = vmul.f32 1.442695, %v4522_v15  ;;  %4720 = vadd.xlane.f32.xlu0 %v4719_v26  ;;  %v4455_v37 = vmax.f32 %v9104_v62, %v9106_v27 }
 0x8c8   : > { %4906 = vmatmul.f32.gmra.mxu2 %v4825_v51  ;;  %5019 = vmatmul.f32.gmra.mxu0 %v4826_v58  ;;  %v3956_v38 = vadd.f32 %v8796_v59, %v3920_v39 }
 0x8c9   : > { %6277 = vpow2.f32 %v4603_v5 }
 0x8ca   : > { %6279 = vpow2.f32 %v4605_v22  ;;  %v3988_v56 = vmul.f32 0.25, %v3956_v38 }
 0x8cc   : > { %4453 = vmax.xlane.f32.xlu1 %v4452_v11  ;;  %5838 = vmatmul.msk.f32.gmra.mxu3 %vm882_vm0, %v3988_v56 }
 0x8cd   : > { %5886 = vmatmul.msk.f32.gmra.mxu1 %vm882_vm0, %v3988_v56  ;;  %v9118_v48 = vpop.f32.mrf.mxu3 }
 0x8ce   : > { %v9120_v17 = vpop.f32.mrf.mxu1 }
 0x8cf   : > { %v9112_v32 = vpop.eup %6277  ;;  %4456 = vmax.xlane.f32.xlu0 %v4455_v37  ;;  %v4458_v33 = vmax.f32 %v9118_v48, %v9120_v17 }
 0x8d0   : > { %v9114_v59 = vpop.eup %6279 }
 0x8d1   : > { %v4722_v10 = vadd.f32 %v9114_v59, %v9112_v32 }
 0x8d3   : > { %4723 = vadd.xlane.f32.xlu2 %v4722_v10 }
 0x8d5   : > { %v9128_v29 = vpop.f32.mrf.mxu3 }
 0x8d6   : > { %v9130_v34 = vpop.f32.mrf.mxu1 }
 0x8d7   : > { %v4461_v37 = vmax.f32 %v9128_v29, %v9130_v34 }
 0x8db   : > { %4459 = vmax.xlane.f32.xlu2 %v4458_v33 }
 0x8de   : > { %v9148_v5 = vpop.f32.mrf.mxu1 }
 0x90b   : > { %v4703_v9 = vpop.xlane.xlu0 %4702 }
 0x90c   : > { %6281 = vrcp.f32 %v4703_v9 }
 0x912   : > { %v6282_v16 = vpop.eup %6281 }
 0x913   : > { %v4439_v40 = vpop.xlane.xlu0 %4438  ;;  %v4827_v31 = vmul.f32 %v6282_v16, %v8961_v24  ;;  %v4828_v4 = vmul.f32 %v6282_v16, %v8965_v21 }
 0x914   : > { %v4523_v18 = vsub.f32 %v8951_v2, %v4439_v40  ;;  %v4524_v46 = vsub.f32 %v8954_v60, %v4439_v40  ;;  %v4706_v49 = vpop.xlane.xlu2 %4705 }
 0x915   : > { %6283 = vrcp.f32 %v4706_v49  ;;  %4909 = vmatmul.f32.gmra.mxu2 %v4827_v31  ;;  %5022 = vmatmul.f32.gmra.mxu0 %v4828_v4  ;;  %v9168_v49 = vpop.f32.mrf.mxu1 }
 0x916   : > { %v4607_v35 = vmul.f32 1.442695, %v4523_v18  ;;  %v4609_v12 = vmul.f32 1.442695, %v4524_v46 }
 0x918   : > { %6285 = vpow2.f32 %v4607_v35 }
 0x919   : > { %6287 = vpow2.f32 %v4609_v12 }
 0x91b   : > { %v6284_v23 = vpop.eup %6283 }
 0x91c   : > { %v4442_v24 = vpop.xlane.xlu2 %4441  ;;  %v4709_v61 = vpop.xlane.xlu1 %4708  ;;  %v4829_v21 = vmul.f32 %v6284_v23, %v8983_v53  ;;  %v4830_v2 = vmul.f32 %v6284_v23, %v8986_v36 }
 0x91d   : > { %v4525_v60 = vsub.f32 %v8971_v8, %v4442_v24  ;;  %v4526_v19 = vsub.f32 %v8974_v50, %v4442_v24  ;;  %6289 = vrcp.f32 %v4709_v61  ;;  %v9142_v8 = vpop.f32.mrf.mxu3 }
 0x91e   : > { %v9136_v42 = vpop.eup %6285  ;;  %4912 = vmatmul.f32.gmra.mxu2 %v4829_v21  ;;  %5025 = vmatmul.f32.gmra.mxu0 %v4830_v2 }
 0x91f   : > { %v9138_v1 = vpop.eup %6287  ;;  %v4611_v63 = vmul.f32 1.442695, %v4525_v60  ;;  %v4613_v3 = vmul.f32 1.442695, %v4526_v19 }
 0x920   : > { %v4725_v15 = vadd.f32 %v9138_v1, %v9136_v42 }
 0x921   : > { %6291 = vpow2.f32 %v4611_v63 }
 0x922   : > { %6293 = vpow2.f32 %v4613_v3  ;;  %4726 = vadd.xlane.f32.xlu1 %v4725_v15 }
 0x923   : > { %v6290_v53 = vpop.eup %6289  ;;  %v4712_v36 = vpop.xlane.xlu0 %4711 }
 0x924   : > { %6295 = vrcp.f32 %v4712_v36  ;;  %v4445_v50 = vpop.xlane.xlu1 %4444  ;;  %v4831_v26 = vmul.f32 %v6290_v53, %v9007_v43  ;;  %v4832_v51 = vmul.f32 %v6290_v53, %v9011_v13 }
 0x925   : > { %v4527_v58 = vsub.f32 %v8996_v44, %v4445_v50  ;;  %v4528_v39 = vsub.f32 %v9002_v7, %v4445_v50  ;;  %v9162_v40 = vpop.f32.mrf.mxu3 }
 0x926   : > { %4915 = vmatmul.f32.gmra.mxu2 %v4831_v26  ;;  %5028 = vmatmul.f32.gmra.mxu0 %v4832_v51 }
 0x927   : > { %v9150_v22 = vpop.eup %6291  ;;  %v4615_v38 = vmul.f32 1.442695, %v4527_v58  ;;  %v4617_v11 = vmul.f32 1.442695, %v4528_v39 }
 0x928   : > { %v9152_v56 = vpop.eup %6293 }
 0x929   : > { %6297 = vpow2.f32 %v4615_v38  ;;  %v4728_v43 = vadd.f32 %v9152_v56, %v9150_v22 }
 0x92a   : > { %v6296_v44 = vpop.eup %6295  ;;  %6299 = vpow2.f32 %v4617_v11  ;;  %4462 = vmax.xlane.f32.xlu1 %v4461_v37 }
 0x92b   : > { %4729 = vadd.xlane.f32.xlu0 %v4728_v43  ;;  %v4448_v7 = vpop.xlane.xlu0 %4447  ;;  %v4833_v13 = vmul.f32 %v6296_v44, %v9025_v52  ;;  %v4834_v10 = vmul.f32 %v6296_v44, %v9030_v57  ;;  %v4715_v16 = vpop.xlane.xlu2 %4714  ;;  %v4464_v52 = vmax.f32 %v9142_v8, %v9148_v5 }
 0x92c   : > { %v4529_v33 = vsub.f32 %v9027_v30, %v4448_v7  ;;  %v4530_v9 = vsub.f32 %v9033_v20, %v4448_v7  ;;  %6301 = vrcp.f32 %v4715_v16 }
 0x92d   : > { %v9182_v63 = vpop.f32.mrf.mxu3 }
 0x92e   : > { %v4619_v31 = vmul.f32 1.442695, %v4529_v33  ;;  %v4621_v4 = vmul.f32 1.442695, %v4530_v9  ;;  %4918 = vmatmul.f32.gmra.mxu2 %v4833_v13  ;;  %5031 = vmatmul.f32.gmra.mxu0 %v4834_v10 }
 0x92f   : > { %v9164_v18 = vpop.eup %6297 }
 0x930   : > { %v9166_v46 = vpop.eup %6299  ;;  %6303 = vpow2.f32 %v4619_v31 }
 0x931   : > { %6305 = vpow2.f32 %v4621_v4  ;;  %v4731_v30 = vadd.f32 %v9166_v46, %v9164_v18 }
 0x932   : > { %v6302_v57 = vpop.eup %6301 }
 0x933   : > { %4465 = vmax.xlane.f32.xlu0 %v4464_v52  ;;  %4732 = vadd.xlane.f32.xlu2 %v4731_v30  ;;  %v4451_v20 = vpop.xlane.xlu2 %4450  ;;  %v4835_v35 = vmul.f32 %v6302_v57, %v9049_v14  ;;  %v4836_v12 = vmul.f32 %v6302_v57, %v9051_v28  ;;  %v4467_v28 = vmax.f32 %v9162_v40, %v9168_v49 }
 0x934   : > { %v4531_v23 = vsub.f32 %v9055_v41, %v4451_v20  ;;  %v4532_v24 = vsub.f32 %v9062_v47, %v4451_v20  ;;  %v9188_v41 = vpop.f32.mrf.mxu1 }
 0x935   : > { %v4470_v51 = vmax.f32 %v9182_v63, %v9188_v41  ;;  %v9202_v11 = vpop.f32.mrf.mxu3 }
 0x936   : > { %v9178_v61 = vpop.eup %6303  ;;  %4921 = vmatmul.f32.gmra.mxu2 %v4835_v35  ;;  %5034 = vmatmul.f32.gmra.mxu0 %v4836_v12  ;;  %v4623_v2 = vmul.f32 1.442695, %v4531_v23  ;;  %v4625_v60 = vmul.f32 1.442695, %v4532_v24 }
 0x937   : > { %v9180_v21 = vpop.eup %6305  ;;  %v4718_v19 = vpop.xlane.xlu1 %4717 }
 0x938   : > { %6307 = vrcp.f32 %v4718_v19  ;;  %v4734_v14 = vadd.f32 %v9180_v21, %v9178_v61 }
 0x939   : > { %6309 = vpow2.f32 %v4623_v2 }
 0x93a   : > { %6311 = vpow2.f32 %v4625_v60  ;;  %4735 = vadd.xlane.f32.xlu1 %v4734_v14  ;;  %v4721_v47 = vpop.xlane.xlu0 %4720 }
 0x93b   : > { %4468 = vmax.xlane.f32.xlu2 %v4467_v28  ;;  %6313 = vrcp.f32 %v4721_v47 }
 0x93d   : > { %v9216_v31 = vpop.f32.mrf.mxu3 }
 0x93e   : > { %v6308_v3 = vpop.eup %6307 }
 0x93f   : > { %v9190_v15 = vpop.eup %6309  ;;  %v4454_v53 = vpop.xlane.xlu1 %4453  ;;  %v4837_v36 = vmul.f32 %v6308_v3, %v9076_v54  ;;  %v4838_v50 = vmul.f32 %v6308_v3, %v9080_v6 }
 0x940   : > { %v9194_v26 = vpop.eup %6311  ;;  %v4533_v58 = vsub.f32 %v9078_v25, %v4454_v53  ;;  %v4534_v39 = vsub.f32 %v9083_v45, %v4454_v53  ;;  %v9206_v25 = vpop.f32.mrf.mxu1 }
 0x941   : > { %4924 = vmatmul.f32.gmra.mxu2 %v4837_v36  ;;  %5037 = vmatmul.f32.gmra.mxu0 %v4838_v50  ;;  %v4737_v38 = vadd.f32 %v9194_v26, %v9190_v15  ;;  %v6314_v7 = vpop.eup %6313 }
 0x942   : > { %v4627_v37 = vmul.f32 1.442695, %v4533_v58  ;;  %v4629_v54 = vmul.f32 1.442695, %v4534_v39  ;;  %4471 = vmax.xlane.f32.xlu1 %v4470_v51  ;;  %v4457_v6 = vpop.xlane.xlu0 %4456  ;;  %v4839_v33 = vmul.f32 %v6314_v7, %v9089_v0  ;;  %v4840_v9 = vmul.f32 %v6314_v7, %v9091_v55 }
 0x943   : > { %v4535_v43 = vsub.f32 %v9104_v62, %v4457_v6  ;;  %v4536_v44 = vsub.f32 %v9106_v27, %v4457_v6  ;;  %4738 = vadd.xlane.f32.xlu0 %v4737_v38  ;;  %v4473_v62 = vmax.f32 %v9202_v11, %v9206_v25 }
 0x944   : > { %6315 = vpow2.f32 %v4627_v37 }
 0x945   : > { %6317 = vpow2.f32 %v4629_v54  ;;  %v4631_v45 = vmul.f32 1.442695, %v4535_v43  ;;  %v4633_v13 = vmul.f32 1.442695, %v4536_v44  ;;  %v9234_v14 = vpop.f32.mrf.mxu3 }
 0x946   : > { %v4724_v10 = vpop.xlane.xlu2 %4723 }
 0x947   : > { %6319 = vpow2.f32 %v4631_v45 }
 0x948   : > { %6321 = vpow2.f32 %v4633_v13  ;;  %v9224_v52 = vpop.f32.mrf.mxu1 }
 0x949   : > { %6323 = vrcp.f32 %v4724_v10  ;;  %4927 = vmatmul.f32.gmra.mxu2 %v4839_v33  ;;  %5040 = vmatmul.f32.gmra.mxu0 %v4840_v9  ;;  %v4476_v19 = vmax.f32 %v9216_v31, %v9224_v52 }
 0x94a   : > { %v9212_v27 = vpop.eup %6315 }
 0x94b   : > { %v9214_v16 = vpop.eup %6317  ;;  %4474 = vmax.xlane.f32.xlu0 %v4473_v62 }
 0x94c   : > { %v4740_v4 = vadd.f32 %v9214_v16, %v9212_v27 }
 0x94d   : > { %v9220_v0 = vpop.eup %6319  ;;  %v9246_v47 = vpop.f32.mrf.mxu3 }
 0x94e   : > { %v9222_v55 = vpop.eup %6321  ;;  %v4460_v30 = vpop.xlane.xlu2 %4459  ;;  %4741 = vadd.xlane.f32.xlu2 %v4740_v4 }
 0x94f   : > { %v6324_v57 = vpop.eup %6323  ;;  %v4537_v20 = vsub.f32 %v9118_v48, %v4460_v30  ;;  %v4538_v35 = vsub.f32 %v9120_v17, %v4460_v30  ;;  %v4743_v12 = vadd.f32 %v9222_v55, %v9220_v0 }
 0x950   : > { %v4841_v23 = vmul.f32 %v6324_v57, %v9112_v32  ;;  %v4842_v24 = vmul.f32 %v6324_v57, %v9114_v59  ;;  %v9236_v48 = vpop.f32.mrf.mxu1 }
 0x951   : > { %v4635_v2 = vmul.f32 1.442695, %v4537_v20  ;;  %v4637_v60 = vmul.f32 1.442695, %v4538_v35  ;;  %4744 = vadd.xlane.f32.xlu1 %v4743_v12  ;;  %v4479_v32 = vmax.f32 %v9234_v14, %v9236_v48 }
 0x952   : > { %4930 = vmatmul.f32.gmra.mxu2 %v4841_v23  ;;  %5043 = vmatmul.f32.gmra.mxu0 %v4842_v24 }
 0x953   : > { %6325 = vpow2.f32 %v4635_v2 }
 0x954   : > { %6327 = vpow2.f32 %v4637_v60 }
 0x956   : > { %4477 = vmax.xlane.f32.xlu2 %v4476_v19 }
 0x958   : > { %v9248_v3 = vpop.f32.mrf.mxu1 }
 0x959   : > { %v9240_v17 = vpop.eup %6325  ;;  %4480 = vmax.xlane.f32.xlu1 %v4479_v32  ;;  %v4482_v53 = vmax.f32 %v9246_v47, %v9248_v3 }
 0x95a   : > { %v9242_v59 = vpop.eup %6327 }
 0x95b   : > { %v4746_v28 = vadd.f32 %v9242_v59, %v9240_v17 }
 0x95d   : > { %4747 = vadd.xlane.f32.xlu0 %v4746_v28 }
 0x960   : > { %v9266_v4 = vpop.f32.mrf.mxu1 }
 0x965   : > { %4483 = vmax.xlane.f32.xlu0 %v4482_v53 }
 0x995   : > { %v4727_v36 = vpop.xlane.xlu1 %4726 }
 0x996   : > { %6329 = vrcp.f32 %v4727_v36 }
 0x99c   : > { %v6330_v50 = vpop.eup %6329 }
 0x99d   : > { %v4463_v51 = vpop.xlane.xlu1 %4462  ;;  %v4843_v58 = vmul.f32 %v6330_v50, %v9136_v42  ;;  %v4844_v39 = vmul.f32 %v6330_v50, %v9138_v1  ;;  %v9258_v1 = vpop.f32.mrf.mxu3 }
 0x99e   : > { %v4730_v38 = vpop.xlane.xlu0 %4729  ;;  %v4539_v37 = vsub.f32 %v9128_v29, %v4463_v51  ;;  %v4540_v54 = vsub.f32 %v9130_v34, %v4463_v51  ;;  %v4485_v19 = vmax.f32 %v9258_v1, %v9266_v4 }
 0x99f   : > { %6331 = vrcp.f32 %v4730_v38  ;;  %4933 = vmatmul.f32.gmra.mxu2 %v4843_v58  ;;  %5046 = vmatmul.f32.gmra.mxu0 %v4844_v39 }
 0x9a0   : > { %v4639_v6 = vmul.f32 1.442695, %v4539_v37  ;;  %v4641_v43 = vmul.f32 1.442695, %v4540_v54 }
 0x9a2   : > { %6333 = vpow2.f32 %v4639_v6 }
 0x9a3   : > { %6335 = vpow2.f32 %v4641_v43 }
 0x9a5   : > { %v6332_v44 = vpop.eup %6331  ;;  %v9276_v23 = vpop.f32.mrf.mxu3 }
 0x9a6   : > { %v4466_v7 = vpop.xlane.xlu0 %4465  ;;  %v4733_v45 = vpop.xlane.xlu2 %4732  ;;  %v4845_v13 = vmul.f32 %v6332_v44, %v9150_v22  ;;  %v4846_v42 = vmul.f32 %v6332_v44, %v9152_v56 }
 0x9a7   : > { %v4541_v29 = vsub.f32 %v9142_v8, %v4466_v7  ;;  %v4542_v34 = vsub.f32 %v9148_v5, %v4466_v7  ;;  %6337 = vrcp.f32 %v4733_v45 }
 0x9a8   : > { %v9262_v10 = vpop.eup %6333  ;;  %4936 = vmatmul.f32.gmra.mxu2 %v4845_v13  ;;  %5049 = vmatmul.f32.gmra.mxu0 %v4846_v42  ;;  %v9308_v13 = vpop.f32.mrf.mxu0 }
 0x9a9   : > { %v9264_v33 = vpop.eup %6335  ;;  %v4643_v9 = vmul.f32 1.442695, %v4541_v29  ;;  %v4645_v62 = vmul.f32 1.442695, %v4542_v34 }
 0x9aa   : > { %v4749_v22 = vadd.f32 %v9264_v33, %v9262_v10 }
 0x9ab   : > { %6339 = vpow2.f32 %v4643_v9 }
 0x9ac   : > { %6341 = vpow2.f32 %v4645_v62  ;;  %4750 = vadd.xlane.f32.xlu2 %v4749_v22  ;;  %v9318_v62 = vpop.f32.mrf.mxu2 }
 0x9ad   : > { %v6338_v8 = vpop.eup %6337  ;;  %v4736_v56 = vpop.xlane.xlu1 %4735 }
 0x9ae   : > { %v4469_v5 = vpop.xlane.xlu2 %4468  ;;  %6343 = vrcp.f32 %v4736_v56  ;;  %v4847_v30 = vmul.f32 %v6338_v8, %v9164_v18  ;;  %v4848_v57 = vmul.f32 %v6338_v8, %v9166_v46  ;;  %v9284_v46 = vpop.f32.mrf.mxu1 }
 0x9af   : > { %v4543_v20 = vsub.f32 %v9162_v40, %v4469_v5  ;;  %v4544_v35 = vsub.f32 %v9168_v49, %v4469_v5  ;;  %v9296_v37 = vpop.f32.mrf.mxu3 }
 0x9b0   : > { %4939 = vmatmul.f32.gmra.mxu2 %v4847_v30  ;;  %5052 = vmatmul.f32.gmra.mxu0 %v4848_v57  ;;  %v9322_v56 = vpop.f32.mrf.mxu0 }
 0x9b1   : > { %v9274_v12 = vpop.eup %6339  ;;  %v4647_v24 = vmul.f32 1.442695, %v4543_v20  ;;  %v4649_v2 = vmul.f32 1.442695, %v4544_v35 }
 0x9b2   : > { %v9278_v60 = vpop.eup %6341 }
 0x9b3   : > { %6345 = vpow2.f32 %v4647_v24  ;;  %v4752_v18 = vadd.f32 %v9278_v60, %v9274_v12 }
 0x9b4   : > { %v6344_v40 = vpop.eup %6343  ;;  %6347 = vpow2.f32 %v4649_v2  ;;  %4486 = vmax.xlane.f32.xlu2 %v4485_v19 }
 0x9b5   : > { %4753 = vadd.xlane.f32.xlu1 %v4752_v18  ;;  %v4472_v49 = vpop.xlane.xlu1 %4471  ;;  %v4849_v32 = vmul.f32 %v6344_v40, %v9178_v61  ;;  %v4850_v28 = vmul.f32 %v6344_v40, %v9180_v21  ;;  %v4488_v61 = vmax.f32 %v9276_v23, %v9284_v46 }
 0x9b6   : > { %v4739_v53 = vpop.xlane.xlu0 %4738  ;;  %v4545_v36 = vsub.f32 %v9182_v63, %v4472_v49  ;;  %v4546_v50 = vsub.f32 %v9188_v41, %v4472_v49  ;;  %v9300_v41 = vpop.f32.mrf.mxu1 }
 0x9b7   : > { %6349 = vrcp.f32 %v4739_v53  ;;  %v9338_v53 = vpop.f32.mrf.mxu2 }
 0x9b8   : > { %v4651_v51 = vmul.f32 1.442695, %v4545_v36  ;;  %v4653_v58 = vmul.f32 1.442695, %v4546_v50  ;;  %4942 = vmatmul.f32.gmra.mxu2 %v4849_v32  ;;  %5055 = vmatmul.f32.gmra.mxu0 %v4850_v28  ;;  %v9342_v50 = vpop.f32.mrf.mxu0 }
 0x9b9   : > { %v9290_v39 = vpop.eup %6345 }
 0x9ba   : > { %v9292_v38 = vpop.eup %6347  ;;  %6351 = vpow2.f32 %v4651_v51 }
 0x9bb   : > { %6353 = vpow2.f32 %v4653_v58  ;;  %v4755_v21 = vadd.f32 %v9292_v38, %v9290_v39 }
 0x9bd   : > { %v6350_v63 = vpop.eup %6349  ;;  %4489 = vmax.xlane.f32.xlu1 %v4488_v61  ;;  %4756 = vadd.xlane.f32.xlu0 %v4755_v21 }
 0x9be   : > { %v4475_v54 = vpop.xlane.xlu0 %4474  ;;  %v4851_v6 = vmul.f32 %v6350_v63, %v9190_v15  ;;  %v4852_v43 = vmul.f32 %v6350_v63, %v9194_v26  ;;  %v4491_v26 = vmax.f32 %v9296_v37, %v9300_v41  ;;  %v9320_v8 = vpop.f32.mrf.mxu1 }
 0x9bf   : > { %v4547_v44 = vsub.f32 %v9202_v11, %v4475_v54  ;;  %v4548_v7 = vsub.f32 %v9206_v25, %v4475_v54  ;;  %v9316_v25 = vpop.f32.mrf.mxu3  ;;  %v9354_v54 = vpop.f32.mrf.mxu2 }
 0x9c0   : > { %v9306_v45 = vpop.eup %6351  ;;  %4945 = vmatmul.f32.gmra.mxu2 %v4851_v6  ;;  %5058 = vmatmul.f32.gmra.mxu0 %v4852_v43  ;;  %v4494_v24 = vmax.f32 %v9316_v25, %v9320_v8 }
 0x9c1   : > { %v9310_v42 = vpop.eup %6353  ;;  %v4655_v29 = vmul.f32 1.442695, %v4547_v44  ;;  %v4657_v34 = vmul.f32 1.442695, %v4548_v7  ;;  %v4742_v9 = vpop.xlane.xlu2 %4741 }
 0x9c2   : > { %6355 = vrcp.f32 %v4742_v9  ;;  %v4758_v15 = vadd.f32 %v9310_v42, %v9306_v45  ;;  %v9366_v9 = vpop.f32.mrf.mxu0 }
 0x9c3   : > { %6357 = vpow2.f32 %v4655_v29 }
 0x9c4   : > { %6359 = vpow2.f32 %v4657_v34  ;;  %4759 = vadd.xlane.f32.xlu2 %v4758_v15  ;;  %v4745_v11 = vpop.xlane.xlu1 %4744 }
 0x9c5   : > { %4492 = vmax.xlane.f32.xlu0 %v4491_v26  ;;  %6361 = vrcp.f32 %v4745_v11 }
 0x9c8   : > { %v6356_v22 = vpop.eup %6355 }
 0x9c9   : > { %v9324_v5 = vpop.eup %6357  ;;  %v4478_v30 = vpop.xlane.xlu2 %4477  ;;  %v4853_v57 = vmul.f32 %v6356_v22, %v9212_v27  ;;  %v4854_v20 = vmul.f32 %v6356_v22, %v9214_v16 }
 0x9ca   : > { %v9328_v35 = vpop.eup %6359  ;;  %v4549_v2 = vsub.f32 %v9216_v31, %v4478_v30  ;;  %v4550_v19 = vsub.f32 %v9224_v52, %v4478_v30  ;;  %v9340_v31 = vpop.f32.mrf.mxu3 }
 0x9cb   : > { %4948 = vmatmul.f32.gmra.mxu2 %v4853_v57  ;;  %5061 = vmatmul.f32.gmra.mxu0 %v4854_v20  ;;  %v4761_v18 = vadd.f32 %v9328_v35, %v9324_v5  ;;  %v6362_v28 = vpop.eup %6361  ;;  %v9382_v20 = vpop.f32.mrf.mxu0 }
 0x9cc   : > { %v4659_v40 = vmul.f32 1.442695, %v4549_v2  ;;  %v4661_v49 = vmul.f32 1.442695, %v4550_v19  ;;  %4495 = vmax.xlane.f32.xlu2 %v4494_v24  ;;  %v4481_v27 = vpop.xlane.xlu1 %4480  ;;  %v4855_v58 = vmul.f32 %v6362_v28, %v9220_v0  ;;  %v4856_v61 = vmul.f32 %v6362_v28, %v9222_v55 }
 0x9cd   : > { %4762 = vadd.xlane.f32.xlu1 %v4761_v18  ;;  %v4551_v16 = vsub.f32 %v9234_v14, %v4481_v27  ;;  %v4552_v32 = vsub.f32 %v9236_v48, %v4481_v27  ;;  %v9346_v14 = vpop.f32.mrf.mxu1 }
 0x9ce   : > { %6363 = vpow2.f32 %v4659_v40  ;;  %v4497_v48 = vmax.f32 %v9340_v31, %v9346_v14 }
 0x9cf   : > { %6365 = vpow2.f32 %v4661_v49  ;;  %v4663_v52 = vmul.f32 1.442695, %v4551_v16  ;;  %v4665_v36 = vmul.f32 1.442695, %v4552_v32 }
 0x9d0   : > { %v4748_v51 = vpop.xlane.xlu0 %4747 }
 0x9d1   : > { %6367 = vpow2.f32 %v4663_v52 }
 0x9d2   : > { %6369 = vpow2.f32 %v4665_v36  ;;  %v9370_v11 = vpop.f32.mrf.mxu3 }
 0x9d3   : > { %6371 = vrcp.f32 %v4748_v51  ;;  %4951 = vmatmul.f32.gmra.mxu2 %v4855_v58  ;;  %5064 = vmatmul.f32.gmra.mxu0 %v4856_v61  ;;  %v9388_v19 = vpop.f32.mrf.mxu0 }
 0x9d4   : > { %v9350_v21 = vpop.eup %6363 }
 0x9d5   : > { %v9352_v63 = vpop.eup %6365  ;;  %4498 = vmax.xlane.f32.xlu1 %v4497_v48  ;;  %v9372_v57 = vpop.f32.mrf.mxu1 }
 0x9d6   : > { %v4764_v0 = vadd.f32 %v9352_v63, %v9350_v21 }
 0x9d7   : > { %v9358_v55 = vpop.eup %6367 }
 0x9d8   : > { %v9360_v6 = vpop.eup %6369  ;;  %v4484_v43 = vpop.xlane.xlu0 %4483  ;;  %4765 = vadd.xlane.f32.xlu0 %v4764_v0 }
 0x9d9   : > { %v6372_v44 = vpop.eup %6371  ;;  %v4553_v7 = vsub.f32 %v9246_v47, %v4484_v43  ;;  %v4554_v29 = vsub.f32 %v9248_v3, %v4484_v43  ;;  %v4767_v34 = vadd.f32 %v9360_v6, %v9358_v55  ;;  %v4500_v47 = vmax.f32 %v9370_v11, %v9372_v57  ;;  %v9376_v3 = vpop.f32.mrf.mxu2 }
 0x9da   : > { %v4857_v15 = vmul.f32 %v6372_v44, %v9240_v17  ;;  %v4858_v26 = vmul.f32 %v6372_v44, %v9242_v59 }
 0x9db   : > { %v4667_v22 = vmul.f32 1.442695, %v4553_v7  ;;  %v4669_v30 = vmul.f32 1.442695, %v4554_v29  ;;  %4768 = vadd.xlane.f32.xlu2 %v4767_v34  ;;  %v9392_v40 = vpop.f32.mrf.mxu0 }
 0x9dc   : > { %4954 = vmatmul.f32.gmra.mxu2 %v4857_v15  ;;  %5067 = vmatmul.f32.gmra.mxu0 %v4858_v26 }
 0x9dd   : > { %6373 = vpow2.f32 %v4667_v22 }
 0x9de   : > { %6375 = vpow2.f32 %v4669_v30 }
 0x9e0   : > { %4501 = vmax.xlane.f32.xlu0 %v4500_v47 }
 0x9e1   : > { %v9386_v2 = vpop.f32.mrf.mxu2 }
 0x9e3   : > { %v9378_v17 = vpop.eup %6373  ;;  %v9396_v27 = vpop.f32.mrf.mxu0 }
 0x9e4   : > { %v9380_v59 = vpop.eup %6375 }
 0x9e5   : > { %v4770_v24 = vadd.f32 %v9380_v59, %v9378_v17 }
 0x9e7   : > { %4771 = vadd.xlane.f32.xlu1 %v4770_v24 }
 0x9e9   : > { %v9390_v18 = vpop.f32.mrf.mxu2 }
 0x9eb   : > { %v9400_v32 = vpop.f32.mrf.mxu0 }
 0x9f1   : > { %v9394_v49 = vpop.f32.mrf.mxu2 }
 0x9f3   : > { %v9404_v52 = vpop.f32.mrf.mxu0 }
 0x9f9   : > { %v9398_v16 = vpop.f32.mrf.mxu2 }
 0xa01   : > { %v9402_v28 = vpop.f32.mrf.mxu2 }
 0xa09   : > { %v9406_v36 = vpop.f32.mrf.mxu2 }
 0xa1c   : > { %v5047_v51 = vpop.f32.mrf.mxu0 }
 0xa1f   : > { %v4751_v58 = vpop.xlane.xlu2 %4750 }
 0xa20   : > { %6377 = vrcp.f32 %v4751_v58 }
 0xa22   : > { %v4934_v61 = vpop.f32.mrf.mxu2 }
 0xa23   : > { %v9408_v48 = vadd.f32 %v5047_v51, %v4934_v61 }
 0xa25   : > { %v5050_v0 = vpop.f32.mrf.mxu0 }
 0xa26   : > { %v6378_v43 = vpop.eup %6377 }
 0xa27   : > { %v4487_v44 = vpop.xlane.xlu2 %4486  ;;  %v4859_v7 = vmul.f32 %v6378_v43, %v9262_v10  ;;  %v4860_v29 = vmul.f32 %v6378_v43, %v9264_v33 }
 0xa28   : > { %v4555_v34 = vsub.f32 %v9258_v1, %v4487_v44  ;;  %v4556_v15 = vsub.f32 %v9266_v4, %v4487_v44  ;;  %v4754_v26 = vpop.xlane.xlu1 %4753 }
 0xa29   : > { %6379 = vrcp.f32 %v4754_v26  ;;  %4957 = vmatmul.f32.gmra.mxu2 %v4859_v7  ;;  %5070 = vmatmul.f32.gmra.mxu0 %v4860_v29 }
 0xa2a   : > { %v4671_v22 = vmul.f32 1.442695, %v4555_v34  ;;  %v4673_v30 = vmul.f32 1.442695, %v4556_v15 }
 0xa2b   : > { %v4937_v47 = vpop.f32.mrf.mxu2 }
 0xa2c   : > { %6381 = vpow2.f32 %v4671_v22  ;;  %v9414_v24 = vadd.f32 %v5050_v0, %v4937_v47 }
 0xa2d   : > { %6383 = vpow2.f32 %v4673_v30  ;;  %v5053_v58 = vpop.f32.mrf.mxu0 }
 0xa2f   : > { %v6380_v51 = vpop.eup %6379 }
 0xa30   : > { %v4757_v10 = vpop.xlane.xlu0 %4756  ;;  %v4490_v61 = vpop.xlane.xlu1 %4489  ;;  %v4861_v33 = vmul.f32 %v6380_v51, %v9274_v12  ;;  %v4862_v1 = vmul.f32 %v6380_v51, %v9278_v60 }
 0xa31   : > { %6385 = vrcp.f32 %v4757_v10  ;;  %v4557_v4 = vsub.f32 %v9276_v23, %v4490_v61  ;;  %v4558_v43 = vsub.f32 %v9284_v46, %v4490_v61 }
 0xa32   : > { %v9420_v44 = vpop.eup %6381  ;;  %4960 = vmatmul.f32.gmra.mxu2 %v4861_v33  ;;  %5073 = vmatmul.f32.gmra.mxu0 %v4862_v1 }
 0xa33   : > { %v9422_v0 = vpop.eup %6383  ;;  %v4675_v7 = vmul.f32 1.442695, %v4557_v4  ;;  %v4677_v29 = vmul.f32 1.442695, %v4558_v43  ;;  %v4940_v34 = vpop.f32.mrf.mxu2 }
 0xa34   : > { %v9424_v15 = vadd.f32 %v5053_v58, %v4940_v34  ;;  %v4773_v12 = vadd.f32 %v9422_v0, %v9420_v44 }
 0xa35   : > { %6387 = vpow2.f32 %v4675_v7  ;;  %v5056_v30 = vpop.f32.mrf.mxu0 }
 0xa36   : > { %6389 = vpow2.f32 %v4677_v29  ;;  %4774 = vadd.xlane.f32.xlu2 %v4773_v12 }
 0xa37   : > { %v6386_v23 = vpop.eup %6385  ;;  %v4760_v60 = vpop.xlane.xlu2 %4759 }
 0xa38   : > { %v4493_v46 = vpop.xlane.xlu0 %4492  ;;  %6391 = vrcp.f32 %v4760_v60  ;;  %v4863_v26 = vmul.f32 %v6386_v23, %v9290_v39  ;;  %v4864_v22 = vmul.f32 %v6386_v23, %v9292_v38 }
 0xa39   : > { %v4559_v47 = vsub.f32 %v9296_v37, %v4493_v46  ;;  %v4560_v51 = vsub.f32 %v9300_v41, %v4493_v46 }
 0xa3a   : > { %4963 = vmatmul.f32.gmra.mxu2 %v4863_v26  ;;  %5076 = vmatmul.f32.gmra.mxu0 %v4864_v22 }
 0xa3b   : > { %v9432_v58 = vpop.eup %6387  ;;  %v4679_v10 = vmul.f32 1.442695, %v4559_v47  ;;  %v4681_v61 = vmul.f32 1.442695, %v4560_v51  ;;  %v4943_v33 = vpop.f32.mrf.mxu2 }
 0xa3c   : > { %v9434_v1 = vpop.eup %6389  ;;  %v9436_v4 = vadd.f32 %v5056_v30, %v4943_v33 }
 0xa3d   : > { %6393 = vpow2.f32 %v4679_v10  ;;  %v4776_v39 = vadd.f32 %v9434_v1, %v9432_v58  ;;  %v5059_v46 = vpop.f32.mrf.mxu0 }
 0xa3e   : > { %v6392_v38 = vpop.eup %6391  ;;  %6395 = vpow2.f32 %v4681_v61 }
 0xa3f   : > { %4777 = vadd.xlane.f32.xlu0 %v4776_v39  ;;  %v4496_v37 = vpop.xlane.xlu2 %4495  ;;  %v4865_v41 = vmul.f32 %v6392_v38, %v9306_v45  ;;  %v4866_v43 = vmul.f32 %v6392_v38, %v9310_v42 }
 0xa40   : > { %v4561_v7 = vsub.f32 %v9316_v25, %v4496_v37  ;;  %v4562_v29 = vsub.f32 %v9320_v8, %v4496_v37  ;;  %v4763_v34 = vpop.xlane.xlu1 %4762 }
 0xa41   : > { %6397 = vrcp.f32 %v4763_v34 }
 0xa42   : > { %v4683_v12 = vmul.f32 1.442695, %v4561_v7  ;;  %v4685_v23 = vmul.f32 1.442695, %v4562_v29  ;;  %4966 = vmatmul.f32.gmra.mxu2 %v4865_v41  ;;  %5079 = vmatmul.f32.gmra.mxu0 %v4866_v43 }
 0xa43   : > { %v9444_v60 = vpop.eup %6393  ;;  %v4946_v26 = vpop.f32.mrf.mxu2 }
 0xa44   : > { %v9446_v22 = vpop.eup %6395  ;;  %6399 = vpow2.f32 %v4683_v12  ;;  %v9448_v45 = vadd.f32 %v5059_v46, %v4946_v26 }
 0xa45   : > { %6401 = vpow2.f32 %v4685_v23  ;;  %v4779_v42 = vadd.f32 %v9446_v22, %v9444_v60 }
 0xa47   : > { %v6398_v25 = vpop.eup %6397  ;;  %4780 = vadd.xlane.f32.xlu1 %v4779_v42 }
 0xa48   : > { %v4499_v8 = vpop.xlane.xlu1 %4498  ;;  %v4867_v30 = vmul.f32 %v6398_v25, %v9324_v5  ;;  %v4868_v47 = vmul.f32 %v6398_v25, %v9328_v35  ;;  %v5062_v5 = vpop.f32.mrf.mxu0 }
 0xa49   : > { %v4563_v51 = vsub.f32 %v9340_v31, %v4499_v8  ;;  %v4564_v10 = vsub.f32 %v9346_v14, %v4499_v8 }
 0xa4a   : > { %v9456_v61 = vpop.eup %6399  ;;  %4969 = vmatmul.f32.gmra.mxu2 %v4867_v30  ;;  %5082 = vmatmul.f32.gmra.mxu0 %v4868_v47 }
 0xa4b   : > { %v9458_v33 = vpop.eup %6401  ;;  %v4687_v39 = vmul.f32 1.442695, %v4563_v51  ;;  %v4689_v38 = vmul.f32 1.442695, %v4564_v10  ;;  %v4766_v37 = vpop.xlane.xlu0 %4765 }
 0xa4c   : > { %6403 = vrcp.f32 %v4766_v37  ;;  %v4782_v41 = vadd.f32 %v9458_v33, %v9456_v61 }
 0xa4d   : > { %6405 = vpow2.f32 %v4687_v39 }
 0xa4e   : > { %6407 = vpow2.f32 %v4689_v38  ;;  %4783 = vadd.xlane.f32.xlu2 %v4782_v41  ;;  %v4949_v35 = vpop.f32.mrf.mxu2  ;;  %v4769_v31 = vpop.xlane.xlu2 %4768  ;;  %v5021_v41 = vadd.f32 %v9322_v56, %v9338_v53  ;;  %v5033_v56 = vadd.f32 %v9388_v19, %v9390_v18  ;;  %v5036_v53 = vadd.f32 %v9392_v40, %v9394_v49 }
 0xa4f   : > { %v9462_v14 = vadd.f32 %v5062_v5, %v4949_v35  ;;  %6409 = vrcp.f32 %v4769_v31  ;;  %v5042_v40 = vadd.f32 %v9400_v32, %v9402_v28 }
 0xa50   : > { %v5065_v37 = vpop.f32.mrf.mxu0 }
 0xa52   : > { %v6404_v43 = vpop.eup %6403 }
 0xa53   : > { %v9464_v7 = vpop.eup %6405  ;;  %v4502_v29 = vpop.xlane.xlu0 %4501  ;;  %v4869_v34 = vmul.f32 %v6404_v43, %v9350_v21  ;;  %v4870_v12 = vmul.f32 %v6404_v43, %v9352_v63 }
 0xa54   : > { %v9468_v23 = vpop.eup %6407  ;;  %v4565_v46 = vsub.f32 %v9370_v11, %v4502_v29  ;;  %v4566_v26 = vsub.f32 %v9372_v57, %v4502_v29 }
 0xa55   : > { %4972 = vmatmul.f32.gmra.mxu2 %v4869_v34  ;;  %5085 = vmatmul.f32.gmra.mxu0 %v4870_v12  ;;  %v4785_v42 = vadd.f32 %v9468_v23, %v9464_v7  ;;  %v6410_v30 = vpop.eup %6409 }
 0xa56   : > { %v4691_v25 = vmul.f32 1.442695, %v4565_v46  ;;  %v4693_v8 = vmul.f32 1.442695, %v4566_v26  ;;  %v4871_v63 = vmul.f32 %v6410_v30, %v9358_v55  ;;  %v4872_v47 = vmul.f32 %v6410_v30, %v9360_v6  ;;  %v4952_v6 = vpop.f32.mrf.mxu2 }
 0xa57   : > { %4786 = vadd.xlane.f32.xlu0 %v4785_v42  ;;  %v5018_v55 = vadd.f32 %v9308_v13, %v9318_v62  ;;  %v5066_v5 = vadd.f32 %v5065_v37, %v4952_v6  ;;  %v5027_v13 = vadd.f32 %v9366_v9, %v9376_v3  ;;  %v5030_v62 = vadd.f32 %v9382_v20, %v9386_v2 }
 0xa58   : > { %6411 = vpow2.f32 %v4691_v25  ;;  %v5039_v9 = vadd.f32 %v9396_v27, %v9398_v16 }
 0xa59   : > { %6413 = vpow2.f32 %v4693_v8  ;;  %v5068_v31 = vpop.f32.mrf.mxu0 }
 0xa5a   : > { %v4772_v21 = vpop.xlane.xlu1 %4771 }
 0xa5b   : > { %6415 = vrcp.f32 %v4772_v21 }
 0xa5d   : > { %4975 = vmatmul.f32.gmra.mxu2 %v4871_v63  ;;  %5088 = vmatmul.f32.gmra.mxu0 %v4872_v47 }
 0xa5e   : > { %v9476_v11 = vpop.eup %6411 }
 0xa5f   : > { %v9478_v57 = vpop.eup %6413  ;;  %v4955_v35 = vpop.f32.mrf.mxu2 }
 0xa60   : > { %v4788_v51 = vadd.f32 %v9478_v57, %v9476_v11 }
 0xa61   : > { %v6416_v10 = vpop.eup %6415 }
 0xa62   : > { %4789 = vadd.xlane.f32.xlu1 %v4788_v51  ;;  %v4873_v39 = vmul.f32 %v6416_v10, %v9378_v17  ;;  %v4874_v38 = vmul.f32 %v6416_v10, %v9380_v59  ;;  %v5024_v17 = vadd.f32 %v9342_v50, %v9354_v54  ;;  %v5069_v59 = vadd.f32 %v5068_v31, %v4955_v35 }
 0xa65   : > { %4978 = vmatmul.f32.gmra.mxu2 %v4873_v39  ;;  %5091 = vmatmul.f32.gmra.mxu0 %v4874_v38 }
 0xa77   : > { %5113 = vxpose.xlu2.b32.start [1/16] (narrow) %v5018_v55, 16 }
 0xa7f   : > { %5114 = vxpose.xlu2.b32.cont [2/16] (narrow) %v5021_v41, 16 }
 0xa80   : > { %5145 = vxpose.xlu0.b32.start [1/16] (narrow) %v5066_v5, 16 }
 0xa87   : > { %5115 = vxpose.xlu2.b32.cont [3/16] (narrow) %v5024_v17, 16 }
 0xa88   : > { %5146 = vxpose.xlu0.b32.cont [2/16] (narrow) %v5069_v59, 16 }
 0xa8f   : > { %5116 = vxpose.xlu2.b32.cont [4/16] (narrow) %v5027_v13, 16 }
 0xa97   : > { %5117 = vxpose.xlu2.b32.cont [5/16] (narrow) %v5030_v62, 16 }
 0xa9f   : > { %5118 = vxpose.xlu2.b32.cont [6/16] (narrow) %v5033_v56, 16 }
 0xaa6   : > { %v5071_v50 = vpop.f32.mrf.mxu0 }
 0xaa7   : > { %5119 = vxpose.xlu2.b32.cont [7/16] (narrow) %v5036_v53, 16 }
 0xaa9   : > { %v4775_v54 = vpop.xlane.xlu2 %4774 }
 0xaaa   : > { %6417 = vrcp.f32 %v4775_v54 }
 0xaac   : > { %v4958_v43 = vpop.f32.mrf.mxu2 }
 0xaad   : > { %v5072_v3 = vadd.f32 %v5071_v50, %v4958_v43 }
 0xaaf   : > { %5120 = vxpose.xlu2.b32.cont [8/16] (narrow) %v5039_v9, 16  ;;  %v5074_v29 = vpop.f32.mrf.mxu0  ;;  %5147 = vxpose.xlu0.b32.cont [3/16] (narrow) %v5072_v3, 16 }
 0xab0   : > { %v6418_v20 = vpop.eup %6417 }
 0xab1   : > { %v4875_v2 = vmul.f32 %v6418_v20, %v9420_v44  ;;  %v4876_v19 = vmul.f32 %v6418_v20, %v9422_v0  ;;  %v5045_v0 = vadd.f32 %v9404_v52, %v9406_v36 }
 0xab2   : > { %v4778_v18 = vpop.xlane.xlu0 %4777 }
 0xab3   : > { %6419 = vrcp.f32 %v4778_v18  ;;  %4981 = vmatmul.f32.gmra.mxu2 %v4875_v2  ;;  %5094 = vmatmul.f32.gmra.mxu0 %v4876_v19 }
 0xab5   : > { %v4961_v49 = vpop.f32.mrf.mxu2 }
 0xab6   : > { %v5075_v34 = vadd.f32 %v5074_v29, %v4961_v49 }
 0xab7   : > { %5121 = vxpose.xlu2.b32.cont [9/16] (narrow) %v5042_v40, 16  ;;  %v5077_v27 = vpop.f32.mrf.mxu0 }
 0xab8   : > { %5148 = vxpose.xlu0.b32.cont [4/16] (narrow) %v5075_v34, 16 }
 0xab9   : > { %v6420_v16 = vpop.eup %6419 }
 0xaba   : > { %v4781_v12 = vpop.xlane.xlu1 %4780  ;;  %v4877_v46 = vmul.f32 %v6420_v16, %v9432_v58  ;;  %v4878_v44 = vmul.f32 %v6420_v16, %v9434_v1 }
 0xabb   : > { %6421 = vrcp.f32 %v4781_v12 }
 0xabc   : > { %4984 = vmatmul.f32.gmra.mxu2 %v4877_v46  ;;  %5097 = vmatmul.f32.gmra.mxu0 %v4878_v44 }
 0xabd   : > { %v4964_v26 = vpop.f32.mrf.mxu2 }
 0xabe   : > { %v5078_v42 = vadd.f32 %v5077_v27, %v4964_v26  ;;  %v9599_v26 = vld [vmem:[#allocation2_spill] sm:$0xff] }
 0xabf   : > { %5122 = vxpose.xlu2.b32.cont [10/16] (narrow) %v5045_v0, 16  ;;  %v5080_v25 = vpop.f32.mrf.mxu0 }
 0xac0   : > { %5149 = vxpose.xlu0.b32.cont [5/16] (narrow) %v5078_v42, 16 }
 0xac1   : > { %v6422_v32 = vpop.eup %6421  ;;  %v4784_v28 = vpop.xlane.xlu2 %4783 }
 0xac2   : > { %6423 = vrcp.f32 %v4784_v28  ;;  %v4879_v8 = vmul.f32 %v6422_v32, %v9444_v60  ;;  %v4880_v58 = vmul.f32 %v6422_v32, %v9446_v22 }
 0xac4   : > { %4987 = vmatmul.f32.gmra.mxu2 %v4879_v8  ;;  %5100 = vmatmul.f32.gmra.mxu0 %v4880_v58 }
 0xac5   : > { %v4967_v1 = vpop.f32.mrf.mxu2 }
 0xac6   : > { %v5081_v30 = vadd.f32 %v5080_v25, %v4967_v1 }
 0xac7   : > { %5123 = vxpose.xlu2.b32.cont [11/16] (narrow) %v9408_v48, 16  ;;  %v5083_v47 = vpop.f32.mrf.mxu0 }
 0xac8   : > { %v6424_v21 = vpop.eup %6423  ;;  %5150 = vxpose.xlu0.b32.cont [6/16] (narrow) %v5081_v30, 16 }
 0xac9   : > { %v4881_v52 = vmul.f32 %v6424_v21, %v9456_v61  ;;  %v4882_v36 = vmul.f32 %v6424_v21, %v9458_v33 }
 0xaca   : > { %v4787_v63 = vpop.xlane.xlu0 %4786 }
 0xacb   : > { %6425 = vrcp.f32 %v4787_v63 }
 0xacc   : > { %4990 = vmatmul.f32.gmra.mxu2 %v4881_v52  ;;  %5103 = vmatmul.f32.gmra.mxu0 %v4882_v36 }
 0xacd   : > { %v4970_v60 = vpop.f32.mrf.mxu2 }
 0xace   : > { %v5084_v51 = vadd.f32 %v5083_v47, %v4970_v60 }
 0xacf   : > { %5124 = vxpose.xlu2.b32.cont [12/16] (narrow) %v9414_v24, 16 }
 0xad0   : > { %5151 = vxpose.xlu0.b32.cont [7/16] (narrow) %v5084_v51, 16 }
 0xad1   : > { %v6426_v22 = vpop.eup %6425 }
 0xad2   : > { %v4883_v10 = vmul.f32 %v6426_v22, %v9464_v7  ;;  %v4884_v48 = vmul.f32 %v6426_v22, %v9468_v23  ;;  %v5086_v39 = vpop.f32.mrf.mxu0 }
 0xad4   : > { %4993 = vmatmul.f32.gmra.mxu2 %v4883_v10  ;;  %5106 = vmatmul.f32.gmra.mxu0 %v4884_v48 }
 0xad5   : > { %v4790_v61 = vpop.xlane.xlu1 %4789 }
 0xad6   : > { %6427 = vrcp.f32 %v4790_v61 }
 0xad7   : > { %5125 = vxpose.xlu2.b32.cont [13/16] (narrow) %v9424_v15, 16 }
 0xad8   : > { %v4973_v33 = vpop.f32.mrf.mxu2 }
 0xad9   : > { %v5087_v38 = vadd.f32 %v5086_v39, %v4973_v33 }
 0xada   : > { %v5089_v24 = vpop.f32.mrf.mxu0 }
 0xadb   : > { %5152 = vxpose.xlu0.b32.cont [8/16] (narrow) %v5087_v38, 16 }
 0xadc   : > { %v6428_v55 = vpop.eup %6427 }
 0xadd   : > { %v4885_v6 = vmul.f32 %v6428_v55, %v9476_v11  ;;  %v4886_v23 = vmul.f32 %v6428_v55, %v9478_v57 }
 0xadf   : > { %4996 = vmatmul.f32.gmra.mxu2 %v4885_v6  ;;  %5126 = vxpose.xlu2.b32.cont [14/16] (narrow) %v9436_v4, 16 }
 0xae0   : > { %v4976_v7 = vpop.f32.mrf.mxu2 }
 0xae1   : > { %v5090_v37 = vadd.f32 %v5089_v24, %v4976_v7 }
 0xae2   : > { %v5092_v41 = vpop.f32.mrf.mxu0 }
 0xae3   : > { %5153 = vxpose.xlu0.b32.cont [9/16] (narrow) %v5090_v37, 16 }
 0xae7   : > { %5109 = vmatmul.f32.vlgmr.msra.gmra.mxu2 %v4886_v23  ;;  %5127 = vxpose.xlu2.b32.cont [15/16] (narrow) %v9448_v45, 16  ;;  %v5224_v23 = vld [vmem:[%s9560_s5] sm:$0xff] }
 0xae8   : > { %v4979_v15 = vpop.f32.mrf.mxu2 }
 0xae9   : > { %v5093_v5 = vadd.f32 %v5092_v41, %v4979_v15  ;;  %v5225_v41 = vld [vmem:[%s9560_s5 + $0x8] sm:$0xff]  ;;  %v5226_v15 = vld [vmem:[%s9560_s5 + $0x10] sm:$0xff] }
 0xaeb   : > { %5154 = vxpose.xlu0.b32.cont [10/16] (narrow) %v5093_v5, 16  ;;  %v5227_v5 = vld [vmem:[%s9560_s5 + $0x18] sm:$0xff] }
 0xaef   : > { %5128 = vxpose.xlu2.b32.end [16/16] (narrow) %v9462_v14, 16 }
 0xb10   : > { %v5129_v29 = vpop.trf.xlu2 }
 0xb18   : > { %v5130_v19 = vpop.trf.xlu2 }
 0xb30   : > { %v5095_v35 = vpop.f32.mrf.mxu0 }
 0xb36   : > { %v4982_v11 = vpop.f32.mrf.mxu2 }
 0xb37   : > { %v5096_v17 = vadd.f32 %v5095_v35, %v4982_v11  ;;  %v5232_v11 = vld [vmem:[%s9561_s6] sm:$0xff] }
 0xb39   : > { %v5098_v31 = vpop.f32.mrf.mxu0  ;;  %5155 = vxpose.xlu0.b32.cont [11/16] (narrow) %v5096_v17, 16 }
 0xb3f   : > { %v4985_v4 = vpop.f32.mrf.mxu2 }
 0xb40   : > { %v5099_v59 = vadd.f32 %v5098_v31, %v4985_v4 }
 0xb41   : > { %v5101_v13 = vpop.f32.mrf.mxu0 }
 0xb42   : > { %5156 = vxpose.xlu0.b32.cont [12/16] (narrow) %v5099_v59, 16 }
 0xb47   : > { %v4988_v62 = vpop.f32.mrf.mxu2 }
 0xb48   : > { %v5102_v57 = vadd.f32 %v5101_v13, %v4988_v62  ;;  %v5233_v13 = vld [vmem:[%s9561_s6 + $0x8] sm:$0xff]  ;;  %v5234_v62 = vld [vmem:[%s9561_s6 + $0x10] sm:$0xff] }
 0xb49   : > { %v5104_v56 = vpop.f32.mrf.mxu0 }
 0xb4a   : > { %5157 = vxpose.xlu0.b32.cont [13/16] (narrow) %v5102_v57, 16  ;;  %v5235_v57 = vld [vmem:[%s9561_s6 + $0x18] sm:$0xff] }
 0xb4f   : > { %v4991_v45 = vpop.f32.mrf.mxu2 }
 0xb50   : > { %v5105_v53 = vadd.f32 %v5104_v56, %v4991_v45 }
 0xb51   : > { %v5107_v50 = vpop.f32.mrf.mxu0 }
 0xb52   : > { %5158 = vxpose.xlu0.b32.cont [14/16] (narrow) %v5105_v53, 16 }
 0xb57   : > { %v4994_v54 = vpop.f32.mrf.mxu2 }
 0xb58   : > { %v5108_v43 = vadd.f32 %v5107_v50, %v4994_v54 }
 0xb5a   : > { %5159 = vxpose.xlu0.b32.cont [15/16] (narrow) %v5108_v43, 16 }
 0xb62   : > { %v4997_v14 = vpop.f32.mrf.mxu2 }
 0xb6a   : > { %v5110_v9 = vpop.f32.mrf.mxu2 }
 0xb6b   : > { %v5111_v3 = vadd.f32 %v5110_v9, %v4997_v14 }
 0xb6d   : > { %5160 = vxpose.xlu0.b32.end [16/16] (narrow) %v5111_v3, 16 }
 0xb99   : > { %v5161_v20 = vpop.trf.xlu0 }
 0xb9a   : > { %v5177_v2 = vadd.f32 %v5161_v20, %v5129_v29 }
 0xb9c   : > { %v5178_v18 = vadd.f32 %v5177_v2, %v5130_v19 }
 0xba1   : > { %v5162_v40 = vpop.trf.xlu0 }
 0xba2   : > { %v5179_v49 = vadd.f32 %v5178_v18, %v5162_v40 }
 0xba4   : > { %5180 = vadd.xlane.f32.xlu1 %v5179_v49 }
 0xc17   : > { %v5181_v34 = vpop.xlane.xlu1 %5180 }
 0xc18   : > { %v5182_v27 = vrot.slane %v5181_v34, 4 }
 0xc1a   : > { %v5183_v16 = vadd.f32 %v5182_v27, %v5181_v34 }
 0xc1c   : > { %v5184_v12 = vrot.slane %v5183_v16, 2 }
 0xc1e   : > { %v5185_v46 = vadd.f32 %v5184_v12, %v5183_v16 }
 0xc20   : > { %v5186_v44 = vrot.slane %v5185_v46, 1 }
 0xc22   : > { %v5187_v0 = vadd.f32 %v5186_v44, %v5185_v46 }
 0xc24   : > { %v5188_v42 = vmul.f32 %v5187_v0, %v9599_v26 }
 0xc26   : > { %v5189_v32 = vsub.f32 %v5129_v29, %v5188_v42  ;;  %v5190_v28 = vsub.f32 %v5161_v20, %v5188_v42  ;;  %v5191_v25 = vsub.f32 %v5130_v19, %v5188_v42  ;;  %v5192_v8 = vsub.f32 %v5162_v40, %v5188_v42 }
 0xc28   : > { %v5193_v58 = vmul.f32 %v5189_v32, %v5189_v32  ;;  %v5194_v1 = vmul.f32 %v5190_v28, %v5190_v28  ;;  %v5195_v30 = vmul.f32 %v5191_v25, %v5191_v25  ;;  %v5196_v52 = vmul.f32 %v5192_v8, %v5192_v8 }
 0xc2a   : > { %v5197_v21 = vadd.f32 %v5194_v1, %v5193_v58 }
 0xc2c   : > { %v5198_v36 = vadd.f32 %v5197_v21, %v5195_v30 }
 0xc2e   : > { %v5199_v63 = vadd.f32 %v5198_v36, %v5196_v52 }
 0xc30   : > { %5200 = vadd.xlane.f32.xlu1 %v5199_v63 }
 0xca3   : > { %v5201_v47 = vpop.xlane.xlu1 %5200 }
 0xca4   : > { %v5202_v60 = vrot.slane %v5201_v47, 4 }
 0xca6   : > { %v5203_v51 = vadd.f32 %v5202_v60, %v5201_v47 }
 0xca8   : > { %v5204_v22 = vrot.slane %v5203_v51, 2 }
 0xcaa   : > { %v5205_v10 = vadd.f32 %v5204_v22, %v5203_v51 }
 0xcac   : > { %v5206_v48 = vrot.slane %v5205_v10, 1 }
 0xcae   : > { %v5207_v39 = vadd.f32 %v5206_v48, %v5205_v10 }
 0xcb0   : > { %v5208_v61 = vmul.f32 %v5207_v39, %v9599_v26 }
 0xcb2   : > { %v5209_v33 = vadd.f32 1e-05, %v5208_v61 }
 0xcb4   : > { %6429 = vrsqrt.f32 %v5209_v33  ;;  %vm5216_vm3 = vweird.f32 %v5209_v33 }
 0xcba   : > { %v6430_v38 = vpop.eup %6429 }
 0xcbb   : > { %v5211_v55 = vmul.f32 %v6430_v38, %v5209_v33  ;;  %vm5217_vm0 = vweird.f32 %v6430_v38 }
 0xcbc   : > { %vm5218_vm4 = vmor %vm5216_vm3, %vm5217_vm0 }
 0xcbd   : > { %v5212_v6 = vmul.f32 %v6430_v38, %v5211_v55 }
 0xcbf   : > { %v5213_v24 = vmul.f32 0.5, %v5212_v6 }
 0xcc1   : > { %v5214_v7 = vsub.f32 1.5, %v5213_v24 }
 0xcc3   : > { %v5215_v37 = vmul.f32 %v6430_v38, %v5214_v7 }
 0xcc5   : > { %v5219_v35 = vsel %vm5218_vm4, %v6430_v38, %v5215_v37 }
 0xcc6   : > { %v5220_v17 = vmul.f32 %v5219_v35, %v5189_v32  ;;  %v5221_v31 = vmul.f32 %v5219_v35, %v5190_v28  ;;  %v5222_v4 = vmul.f32 %v5219_v35, %v5191_v25  ;;  %v5223_v59 = vmul.f32 %v5219_v35, %v5192_v8 }
 0xcc8   : > { %v5228_v56 = vmul.f32 %v5224_v23, %v5220_v17  ;;  %v5229_v45 = vmul.f32 %v5225_v41, %v5221_v31  ;;  %v5230_v53 = vmul.f32 %v5226_v15, %v5222_v4  ;;  %v5231_v50 = vmul.f32 %v5227_v5, %v5223_v59 }
 0xcca   : > { %v5236_v54 = vadd.f32 %v5232_v11, %v5228_v56  ;;  %v5237_v43 = vadd.f32 %v5233_v13, %v5229_v45  ;;  %v5238_v14 = vadd.f32 %v5234_v62, %v5230_v53  ;;  %v5239_v9 = vadd.f32 %v5235_v57, %v5231_v50 }
 0xccc   : > { %vm5240_vm5 = vcmp.ge.f32.partialorder %v5236_v54, 0.0  ;;  %vm5241_vm6 = vcmp.ge.f32.partialorder %v5237_v43, 0.0  ;;  %vm5242_vm7 = vcmp.ge.f32.partialorder %v5238_v14, 0.0  ;;  %vm5243_vm8 = vcmp.ge.f32.partialorder %v5239_v9, 0.0 }
 0xccd   : > { %v5244_v3 = vmul.f32 0.1, %v5236_v54  ;;  %v5245_v29 = vmul.f32 0.1, %v5237_v43  ;;  %v5246_v20 = vmul.f32 0.1, %v5238_v14 }
 0xcce   : > { %v5247_v2 = vmul.f32 0.1, %v5239_v9 }
 0xccf   : > { %v5248_v19 = vsel %vm5240_vm5, %v5236_v54, %v5244_v3  ;;  %v5249_v18 = vsel %vm5241_vm6, %v5237_v43, %v5245_v29  ;;  %v5250_v40 = vsel %vm5242_vm7, %v5238_v14, %v5246_v20 }
 0xcd0   : > { %v5251_v49 = vsel %vm5243_vm8, %v5239_v9, %v5247_v2  ;;  %5252 = vst [vmem:[%s595_s30] sm:$0xff] %v5248_v19 }
 0xcd1   : > { %5253 = vst [vmem:[%s595_s30 + $0x8] sm:$0xff] %v5249_v18 }
 0xcd2   : > { %5254 = vst [vmem:[%s595_s30 + $0x10] sm:$0xff] %v5250_v40 }
 0xcd3   : > { %5255 = vst [vmem:[%s595_s30 + $0x18] sm:$0xff] %v5251_v49 }
 0xcd4 PF: > { %s28_s27 = sadd.s32 1, %s6439_s27  }
 0xcd5   : > { %p25_p4 = scmp.ge.s32.totalorder %s28_s27, 4  }
 0xcd7   :  { %27 = sbr.rel (!%p25_p4) target bundleno = 4 (0x4), region = 125 }

</bundles_post_ra>
